<compile_context>
chip_gen: v7x
topology: tpu7x:2x2x1
jax: 0.10.0
libtpu: 0.0.40
codegen_flags: <defaults>
</compile_context>

<pallas_src>
import math

import jax
import jax.numpy as jnp
from jax import lax
from jax.experimental import pallas as pl
from jax.experimental.pallas import tpu as pltpu

# ---------------- problem sizes implied by the module ----------------
B, T = 2, 8                   # batch, temporal length
NNODE, CIN = 12, 2            # graph nodes, per-node input features (nfeat=2)
NHID = 16                     # gc1 hidden size
NOUT = 16                     # GAT / graph-TCN output size (12*16 = 192 = in_dim)
HEADS = 4
OPH = NOUT // HEADS
BT = B * T                    # 16 frames (graphs) per forward
FEAT = NNODE * NOUT           # 192 flattened per-frame features
CH = 64                       # temporal conv channels
NCLS = 3 + 3 + 2 + 2          # 10 classifier channels
NROWS = BT * NNODE            # 192 (frame,node) samples pooled by the graph BNs
EPS = 1e-5

# ---- packA layout: (224, 192) float32 ----
PA_WGCN = 0          # rows   0:24   kron(adj^T, W1)      (24,192)
PA_B1 = 24           # row   24      gc1 bias tiled over nodes (192,)
PA_W2 = 32           # rows  32:96   temporal conv k=3 d=1 stacked taps (64,192)
PA_W3 = 96           # rows  96:160  temporal conv k=3 d=2 stacked taps (64,192)
PA_W4 = 160          # rows 160:224  temporal conv k=3 d=2 stacked taps (64,192)
PA_ROWS = 224

# ---- packB layout: (304, 64) float32 ----
PB_WC1 = 0           # rows   0:192  temporal k=1 conv weight^T (192,64), node-major rows
PB_WCLS = 192        # rows 192:256  classifier stacked taps (64, 3*10) in lanes 0:30
PB_WCOMB = 256       # rows 256:272  (GAT @ graph-TCN tap) stacked (16, 3*16) in lanes 0:48
PB_BNH_G = 272       # rows 272:276  gammas of the 4 temporal-head BNs (64 lanes)
PB_BNH_B = 276       # rows 276:280  betas  of the 4 temporal-head BNs
PB_VEC = 280         # rows 280..284: graph-TCN bias, bn1 g, bn1 b, bn2 g, bn2 b (lanes 0:16)
PB_MASK = 288        # rows 288:304  per-frame time-boundary masks (16, 4)
PB_ROWS = 304


# ======================= fully fused kernel =======================
def fused_kernel(x_ref, pa_ref, pb_ref, out_ref):
    f32 = jnp.float32

    # ---- GCN fused with adjacency: relu(x @ kron(adj^T, W1) + b1) ----
    x = x_ref[...]                                              # (BT, NNODE*CIN)
    g = jnp.dot(x, pa_ref[PA_WGCN:PA_WGCN + NNODE * CIN, :],
                preferred_element_type=f32)
    g = jnp.maximum(g + pa_ref[PA_B1:PA_B1 + 1, :], 0.0)        # (16, 192) lane-dense

    # ---- bn1: per-hidden-channel stats pooled over (frame, node) ----
    s1 = jnp.sum(g, axis=0, keepdims=True)                      # (1, 192)
    s2 = jnp.sum(g * g, axis=0, keepdims=True)
    cs1 = jnp.zeros((1, NHID), f32)
    cs2 = jnp.zeros((1, NHID), f32)
    for i in range(NNODE):
        cs1 = cs1 + s1[:, i * NHID:(i + 1) * NHID]
        cs2 = cs2 + s2[:, i * NHID:(i + 1) * NHID]
    mu1 = cs1 / NROWS
    var1 = cs2 / NROWS - mu1 * mu1
    a1 = pb_ref[PB_VEC + 1:PB_VEC + 2, 0:NHID] * lax.rsqrt(var1 + EPS)
    b1n = pb_ref[PB_VEC + 2:PB_VEC + 3, 0:NHID] - mu1 * a1

    # ---- per node: bn1-apply + relu + fused (GAT x conv-tap) channel mixing ----
    wcomb = pb_ref[PB_WCOMB:PB_WCOMB + NHID, 0:3 * NOUT]        # (16, 48)
    taps = []
    for i in range(NNODE):
        h_i = jnp.maximum(g[:, i * NHID:(i + 1) * NHID] * a1 + b1n, 0.0)  # (16,16)
        taps.append(jnp.dot(h_i, wcomb, preferred_element_type=f32))      # (16,48)

    # ---- node-axis Conv1d(k=3, pad=1): assemble from neighbour taps + bias ----
    btcn = pb_ref[PB_VEC:PB_VEC + 1, 0:NOUT]                    # (1, 16)
    ys = []
    t1 = jnp.zeros((1, NOUT), f32)
    t2 = jnp.zeros((1, NOUT), f32)
    for i in range(NNODE):
        y = taps[i][:, NOUT:2 * NOUT] + btcn                    # centre tap
        if i > 0:
            y = y + taps[i - 1][:, 0:NOUT]                      # W0 * x[n-1]
        if i < NNODE - 1:
            y = y + taps[i + 1][:, 2 * NOUT:3 * NOUT]           # W2 * x[n+1]
        ys.append(y)
        t1 = t1 + jnp.sum(y, axis=0, keepdims=True)
        t2 = t2 + jnp.sum(y * y, axis=0, keepdims=True)

    # ---- graph-TCN BatchNorm (batch stats, one pass) ----
    mu2 = t1 / NROWS
    var2 = t2 / NROWS - mu2 * mu2
    a2 = pb_ref[PB_VEC + 3:PB_VEC + 4, 0:NOUT] * lax.rsqrt(var2 + EPS)
    b2n = pb_ref[PB_VEC + 4:PB_VEC + 5, 0:NOUT] - mu2 * a2
    # TODO(synk): nn.Dropout(0.2) in the TCN block treated as identity (eval).

    # ---- relu + temporal Conv1d(192->64, k=1) fused with the node re-layout ----
    z = jnp.zeros((BT, CH), f32)
    for i in range(NNODE):
        fi = jnp.maximum(ys[i] * a2 + b2n, 0.0)                 # (16, 16) frame block
        z = z + jnp.dot(fi, pb_ref[PB_WC1 + i * NOUT:PB_WC1 + (i + 1) * NOUT, :],
                        preferred_element_type=f32)             # (16, 64)

    # ---- temporal head: BN/ReLU + three k=3 convs + classifier ----
    tm = pb_ref[PB_MASK:PB_MASK + BT, 0:4]                      # (16, 4) boundary masks
    m1p, m1n = tm[:, 0:1], tm[:, 1:2]                           # dilation 1
    m2p, m2n = tm[:, 2:3], tm[:, 3:4]                           # dilation 2

    def bn_relu(h, idx):
        mu = jnp.mean(h, axis=0, keepdims=True)
        ex2 = jnp.mean(h * h, axis=0, keepdims=True)
        a = pb_ref[PB_BNH_G + idx:PB_BNH_G + idx + 1, :] * lax.rsqrt(ex2 - mu * mu + EPS)
        b = pb_ref[PB_BNH_B + idx:PB_BNH_B + idx + 1, :] - mu * a
        return jnp.maximum(h * a + b, 0.0)

    def conv3(h, w, mp, mn, d, co):
        # one stacked matmul for all 3 taps, then masked sublane rolls
        y3 = jnp.dot(h, w, preferred_element_type=f32)          # (BT, 3*co)
        y = y3[:, co:2 * co]
        y = y + mp * pltpu.roll(y3[:, 0:co], shift=d, axis=0)             # t - d
        y = y + mn * pltpu.roll(y3[:, 2 * co:3 * co], shift=BT - d, axis=0)  # t + d
        return y

    h = bn_relu(z, 0)
    h = bn_relu(conv3(h, pa_ref[PA_W2:PA_W2 + CH, :], m1p, m1n, 1, CH), 1)
    h = bn_relu(conv3(h, pa_ref[PA_W3:PA_W3 + CH, :], m2p, m2n, 2, CH), 2)
    h = bn_relu(conv3(h, pa_ref[PA_W4:PA_W4 + CH, :], m2p, m2n, 2, CH), 3)
    out_ref[...] = conv3(h, pb_ref[PB_WCLS:PB_WCLS + CH, 0:3 * NCLS],
                         m2p, m2n, 2, NCLS)


# ======================= wrapper =======================
@jax.jit
def auw_forward(x, params):
    """x: (B, T, NNODE, CIN) -> (B, NCLS, T), matching the PyTorch module."""
    vmem = pl.BlockSpec(memory_space=pltpu.MemorySpace.VMEM)
    x2 = x.reshape(BT, NNODE * CIN)                             # pure row-major view
    logits = pl.pallas_call(
        fused_kernel,
        out_shape=jax.ShapeDtypeStruct((BT, NCLS), jnp.float32),
        in_specs=[vmem, vmem, vmem],
        out_specs=vmem,
    )(x2, params['packA'], params['packB'])
    return logits.reshape(B, T, NCLS).transpose(0, 2, 1)        # (b, 10, t)


# ======================= parameter / constant packing =======================
def make_params(key, adj):
    f32 = jnp.float32
    ks = jax.random.split(key, 10)

    # GraphConvolution: uniform(-1/sqrt(out), 1/sqrt(out)) weight + bias
    stdv = 1.0 / math.sqrt(NHID)
    w1 = jax.random.uniform(ks[0], (CIN, NHID), f32, -stdv, stdv)
    b1 = jax.random.uniform(ks[1], (NHID,), f32, -stdv, stdv)

    # GAT head linears (bias=False), xavier_normal_
    gain = math.sqrt(2.0 / (NHID + OPH))
    wg = gain * jax.random.normal(ks[2], (HEADS, OPH, NHID), f32)
    wg_all = jnp.transpose(wg, (2, 0, 1)).reshape(NHID, NOUT)   # column h*OPH+o = W_h^T

    # graph TCN Conv1d(16,16,3): kaiming_normal_ weight, default-uniform bias
    wtcn = math.sqrt(2.0 / (NOUT * 3)) * jax.random.normal(ks[3], (NOUT, NOUT, 3), f32)
    bb = 1.0 / math.sqrt(NOUT * 3)
    btcn = jax.random.uniform(ks[4], (NOUT,), f32, -bb, bb)
    # pre-multiply the GAT projection into each conv tap: (16, 48)
    wcomb = jnp.concatenate([wg_all @ wtcn[:, :, k].T for k in range(3)], axis=1)

    # temporal head convs (kaiming_normal_, bias=False)
    wc1 = math.sqrt(2.0 / FEAT) * jax.random.normal(ks[5], (CH, FEAT), f32)

    def stack3(k, cout, cin):
        w = math.sqrt(2.0 / (cin * 3)) * jax.random.normal(k, (cout, cin, 3), f32)
        return jnp.concatenate([w[:, :, t].T for t in range(3)], axis=1)    # (cin, 3*cout)

    w2 = stack3(ks[6], CH, CH)
    w3 = stack3(ks[7], CH, CH)
    w4 = stack3(ks[8], CH, CH)
    wcls = stack3(ks[9], NCLS, CH)                              # (64, 30)

    # fused GCN weight: Wgcn[j*CIN+k, i*NHID+c] = adj[i,j] * W1[k,c]
    wgcn = jnp.einsum('ij,kc->jkic', adj.astype(f32), w1).reshape(NNODE * CIN,
                                                                  NNODE * NHID)

    packA = jnp.zeros((PA_ROWS, FEAT), f32)
    packA = packA.at[PA_WGCN:PA_WGCN + NNODE * CIN, :].set(wgcn)
    packA = packA.at[PA_B1, :].set(jnp.tile(b1, NNODE))
    packA = packA.at[PA_W2:PA_W2 + CH, :].set(w2)
    packA = packA.at[PA_W3:PA_W3 + CH, :].set(w3)
    packA = packA.at[PA_W4:PA_W4 + CH, :].set(w4)

    # per-frame time-boundary masks (rows are g = b*T + t)
    tt = jnp.arange(BT) % T
    tmask = jnp.stack([tt >= 1, tt <= T - 2, tt >= 2, tt <= T - 3],
                      axis=1).astype(f32)                       # (16, 4)

    packB = jnp.zeros((PB_ROWS, CH), f32)
    packB = packB.at[PB_WC1:PB_WC1 + FEAT, :].set(wc1.T)        # node-major rows
    packB = packB.at[PB_WCLS:PB_WCLS + CH, 0:3 * NCLS].set(wcls)
    packB = packB.at[PB_WCOMB:PB_WCOMB + NHID, 0:3 * NOUT].set(wcomb)
    packB = packB.at[PB_BNH_G:PB_BNH_G + 4, :].set(jnp.ones((4, CH), f32))
    packB = packB.at[PB_BNH_B:PB_BNH_B + 4, :].set(jnp.zeros((4, CH), f32))
    packB = packB.at[PB_VEC, 0:NOUT].set(btcn)
    packB = packB.at[PB_VEC + 1, 0:NHID].set(jnp.ones((NHID,), f32))   # bn1 gamma
    packB = packB.at[PB_VEC + 2, 0:NHID].set(jnp.zeros((NHID,), f32))  # bn1 beta
    packB = packB.at[PB_VEC + 3, 0:NOUT].set(jnp.ones((NOUT,), f32))   # TCN bn gamma
    packB = packB.at[PB_VEC + 4, 0:NOUT].set(jnp.zeros((NOUT,), f32))  # TCN bn beta
    packB = packB.at[PB_MASK:PB_MASK + BT, 0:4].set(tmask)

    return dict(packA=packA, packB=packB)


if __name__ == "__main__":
    key = jax.random.PRNGKey(0)
    kp, ka, kx = jax.random.split(key, 3)

    # deterministic stand-in for the np.load'ed adjacency buffer:
    # symmetric binary adjacency with self-loops, row-normalized.
    amask = (jax.random.uniform(ka, (NNODE, NNODE)) > 0.5).astype(jnp.float32)
    adj = jnp.clip(amask + amask.T + jnp.eye(NNODE, dtype=jnp.float32), 0.0, 1.0)
    adj = adj / jnp.sum(adj, axis=1, keepdims=True)

    params = make_params(kp, adj)
    x = jax.random.normal(kx, (B, T, NNODE, CIN), jnp.float32)

    out = auw_forward(x, params)
    jax.block_until_ready(out)
    assert out.shape == (B, NCLS, T)
    print("KERNEL_OK")
</pallas_src>

<mosaic_0001>
module attributes {stable_mosaic.version = 11 : i64} {
  func.func @fused_kernel(%arg0: memref<16x24xf32, #tpu.memory_space<vmem>>, %arg1: memref<224x192xf32, #tpu.memory_space<vmem>>, %arg2: memref<304x64xf32, #tpu.memory_space<vmem>>, %arg3: memref<16x10xf32, #tpu.memory_space<vmem>>) attributes {dimension_semantics = [], scalar_prefetch = 0 : i64, scratch_operands = 0 : i64, tpu.core_type = #tpu.core_type<tc>} {
    %c0 = arith.constant 0 : index
    %c0_0 = arith.constant 0 : index
    %0 = vector.load %arg0[%c0, %c0_0] : memref<16x24xf32, #tpu.memory_space<vmem>>, vector<16x24xf32>
    %c0_1 = arith.constant 0 : index
    %c0_2 = arith.constant 0 : index
    %1 = vector.load %arg1[%c0_1, %c0_2] : memref<224x192xf32, #tpu.memory_space<vmem>>, vector<24x192xf32>
    %cst = arith.constant dense<0.000000e+00> : vector<16x192xf32>
    %2 = tpu.matmul %0, %1, %cst {dimension_numbers = #tpu.dot_dimension_numbers<[1], [0], [0], [1], [0, 0, 1, 1], [], []>} : vector<16x24xf32>, vector<24x192xf32>, vector<16x192xf32> -> vector<16x192xf32>
    %c24 = arith.constant 24 : index
    %c0_3 = arith.constant 0 : index
    %3 = vector.load %arg1[%c24, %c0_3] : memref<224x192xf32, #tpu.memory_space<vmem>>, vector<1x192xf32>
    %4 = vector.broadcast %3 : vector<1x192xf32> to vector<16x192xf32>
    %5 = arith.addf %2, %4 : vector<16x192xf32>
    %cst_4 = arith.constant 0.000000e+00 : f32
    %6 = vector.broadcast %cst_4 : f32 to vector<16x192xf32>
    %7 = arith.maximumf %5, %6 : vector<16x192xf32>
    %cst_5 = arith.constant dense<0.000000e+00> : vector<192xf32>
    %8 = vector.multi_reduction <add>, %7, %cst_5 [0] : vector<16x192xf32> to vector<192xf32>
    %9 = vector.shape_cast %8 : vector<192xf32> to vector<1x192xf32>
    %10 = arith.mulf %7, %7 : vector<16x192xf32>
    %cst_6 = arith.constant dense<0.000000e+00> : vector<192xf32>
    %11 = vector.multi_reduction <add>, %10, %cst_6 [0] : vector<16x192xf32> to vector<192xf32>
    %12 = vector.shape_cast %11 : vector<192xf32> to vector<1x192xf32>
    %cst_7 = arith.constant 0.000000e+00 : f32
    %13 = vector.broadcast %cst_7 : f32 to vector<1x16xf32>
    %cst_8 = arith.constant 0.000000e+00 : f32
    %14 = vector.broadcast %cst_8 : f32 to vector<1x16xf32>
    %15 = vector.extract_strided_slice %9 {offsets = [0, 0], sizes = [1, 16], strides = [1, 1]} : vector<1x192xf32> to vector<1x16xf32>
    %16 = arith.addf %13, %15 : vector<1x16xf32>
    %17 = vector.extract_strided_slice %12 {offsets = [0, 0], sizes = [1, 16], strides = [1, 1]} : vector<1x192xf32> to vector<1x16xf32>
    %18 = arith.addf %14, %17 : vector<1x16xf32>
    %19 = vector.extract_strided_slice %9 {offsets = [0, 16], sizes = [1, 16], strides = [1, 1]} : vector<1x192xf32> to vector<1x16xf32>
    %20 = arith.addf %16, %19 : vector<1x16xf32>
    %21 = vector.extract_strided_slice %12 {offsets = [0, 16], sizes = [1, 16], strides = [1, 1]} : vector<1x192xf32> to vector<1x16xf32>
    %22 = arith.addf %18, %21 : vector<1x16xf32>
    %23 = vector.extract_strided_slice %9 {offsets = [0, 32], sizes = [1, 16], strides = [1, 1]} : vector<1x192xf32> to vector<1x16xf32>
    %24 = arith.addf %20, %23 : vector<1x16xf32>
    %25 = vector.extract_strided_slice %12 {offsets = [0, 32], sizes = [1, 16], strides = [1, 1]} : vector<1x192xf32> to vector<1x16xf32>
    %26 = arith.addf %22, %25 : vector<1x16xf32>
    %27 = vector.extract_strided_slice %9 {offsets = [0, 48], sizes = [1, 16], strides = [1, 1]} : vector<1x192xf32> to vector<1x16xf32>
    %28 = arith.addf %24, %27 : vector<1x16xf32>
    %29 = vector.extract_strided_slice %12 {offsets = [0, 48], sizes = [1, 16], strides = [1, 1]} : vector<1x192xf32> to vector<1x16xf32>
    %30 = arith.addf %26, %29 : vector<1x16xf32>
    %31 = vector.extract_strided_slice %9 {offsets = [0, 64], sizes = [1, 16], strides = [1, 1]} : vector<1x192xf32> to vector<1x16xf32>
    %32 = arith.addf %28, %31 : vector<1x16xf32>
    %33 = vector.extract_strided_slice %12 {offsets = [0, 64], sizes = [1, 16], strides = [1, 1]} : vector<1x192xf32> to vector<1x16xf32>
    %34 = arith.addf %30, %33 : vector<1x16xf32>
    %35 = vector.extract_strided_slice %9 {offsets = [0, 80], sizes = [1, 16], strides = [1, 1]} : vector<1x192xf32> to vector<1x16xf32>
    %36 = arith.addf %32, %35 : vector<1x16xf32>
    %37 = vector.extract_strided_slice %12 {offsets = [0, 80], sizes = [1, 16], strides = [1, 1]} : vector<1x192xf32> to vector<1x16xf32>
    %38 = arith.addf %34, %37 : vector<1x16xf32>
    %39 = vector.extract_strided_slice %9 {offsets = [0, 96], sizes = [1, 16], strides = [1, 1]} : vector<1x192xf32> to vector<1x16xf32>
    %40 = arith.addf %36, %39 : vector<1x16xf32>
    %41 = vector.extract_strided_slice %12 {offsets = [0, 96], sizes = [1, 16], strides = [1, 1]} : vector<1x192xf32> to vector<1x16xf32>
    %42 = arith.addf %38, %41 : vector<1x16xf32>
    %43 = vector.extract_strided_slice %9 {offsets = [0, 112], sizes = [1, 16], strides = [1, 1]} : vector<1x192xf32> to vector<1x16xf32>
    %44 = arith.addf %40, %43 : vector<1x16xf32>
    %45 = vector.extract_strided_slice %12 {offsets = [0, 112], sizes = [1, 16], strides = [1, 1]} : vector<1x192xf32> to vector<1x16xf32>
    %46 = arith.addf %42, %45 : vector<1x16xf32>
    %47 = vector.extract_strided_slice %9 {offsets = [0, 128], sizes = [1, 16], strides = [1, 1]} : vector<1x192xf32> to vector<1x16xf32>
    %48 = arith.addf %44, %47 : vector<1x16xf32>
    %49 = vector.extract_strided_slice %12 {offsets = [0, 128], sizes = [1, 16], strides = [1, 1]} : vector<1x192xf32> to vector<1x16xf32>
    %50 = arith.addf %46, %49 : vector<1x16xf32>
    %51 = vector.extract_strided_slice %9 {offsets = [0, 144], sizes = [1, 16], strides = [1, 1]} : vector<1x192xf32> to vector<1x16xf32>
    %52 = arith.addf %48, %51 : vector<1x16xf32>
    %53 = vector.extract_strided_slice %12 {offsets = [0, 144], sizes = [1, 16], strides = [1, 1]} : vector<1x192xf32> to vector<1x16xf32>
    %54 = arith.addf %50, %53 : vector<1x16xf32>
    %55 = vector.extract_strided_slice %9 {offsets = [0, 160], sizes = [1, 16], strides = [1, 1]} : vector<1x192xf32> to vector<1x16xf32>
    %56 = arith.addf %52, %55 : vector<1x16xf32>
    %57 = vector.extract_strided_slice %12 {offsets = [0, 160], sizes = [1, 16], strides = [1, 1]} : vector<1x192xf32> to vector<1x16xf32>
    %58 = arith.addf %54, %57 : vector<1x16xf32>
    %59 = vector.extract_strided_slice %9 {offsets = [0, 176], sizes = [1, 16], strides = [1, 1]} : vector<1x192xf32> to vector<1x16xf32>
    %60 = arith.addf %56, %59 : vector<1x16xf32>
    %61 = vector.extract_strided_slice %12 {offsets = [0, 176], sizes = [1, 16], strides = [1, 1]} : vector<1x192xf32> to vector<1x16xf32>
    %62 = arith.addf %58, %61 : vector<1x16xf32>
    %cst_9 = arith.constant 1.920000e+02 : f32
    %63 = vector.broadcast %cst_9 : f32 to vector<1x16xf32>
    %64 = arith.divf %60, %63 : vector<1x16xf32>
    %cst_10 = arith.constant 1.920000e+02 : f32
    %65 = vector.broadcast %cst_10 : f32 to vector<1x16xf32>
    %66 = arith.divf %62, %65 : vector<1x16xf32>
    %67 = arith.mulf %64, %64 : vector<1x16xf32>
    %68 = arith.subf %66, %67 : vector<1x16xf32>
    %c281 = arith.constant 281 : index
    %c0_11 = arith.constant 0 : index
    %69 = vector.load %arg2[%c281, %c0_11] : memref<304x64xf32, #tpu.memory_space<vmem>>, vector<1x16xf32>
    %cst_12 = arith.constant 9.99999974E-6 : f32
    %70 = vector.broadcast %cst_12 : f32 to vector<1x16xf32>
    %71 = arith.addf %68, %70 : vector<1x16xf32>
    %72 = math.rsqrt %71 : vector<1x16xf32>
    %73 = arith.mulf %69, %72 : vector<1x16xf32>
    %c282 = arith.constant 282 : index
    %c0_13 = arith.constant 0 : index
    %74 = vector.load %arg2[%c282, %c0_13] : memref<304x64xf32, #tpu.memory_space<vmem>>, vector<1x16xf32>
    %75 = arith.mulf %64, %73 : vector<1x16xf32>
    %76 = arith.subf %74, %75 : vector<1x16xf32>
    %c256 = arith.constant 256 : index
    %c0_14 = arith.constant 0 : index
    %77 = vector.load %arg2[%c256, %c0_14] : memref<304x64xf32, #tpu.memory_space<vmem>>, vector<16x48xf32>
    %78 = vector.extract_strided_slice %7 {offsets = [0, 0], sizes = [16, 16], strides = [1, 1]} : vector<16x192xf32> to vector<16x16xf32>
    %79 = vector.broadcast %73 : vector<1x16xf32> to vector<16x16xf32>
    %80 = arith.mulf %78, %79 : vector<16x16xf32>
    %81 = vector.broadcast %76 : vector<1x16xf32> to vector<16x16xf32>
    %82 = arith.addf %80, %81 : vector<16x16xf32>
    %cst_15 = arith.constant 0.000000e+00 : f32
    %83 = vector.broadcast %cst_15 : f32 to vector<16x16xf32>
    %84 = arith.maximumf %82, %83 : vector<16x16xf32>
    %cst_16 = arith.constant dense<0.000000e+00> : vector<16x48xf32>
    %85 = tpu.matmul %84, %77, %cst_16 {dimension_numbers = #tpu.dot_dimension_numbers<[1], [0], [0], [1], [0, 0, 1, 1], [], []>} : vector<16x16xf32>, vector<16x48xf32>, vector<16x48xf32> -> vector<16x48xf32>
    %86 = vector.extract_strided_slice %7 {offsets = [0, 16], sizes = [16, 16], strides = [1, 1]} : vector<16x192xf32> to vector<16x16xf32>
    %87 = vector.broadcast %73 : vector<1x16xf32> to vector<16x16xf32>
    %88 = arith.mulf %86, %87 : vector<16x16xf32>
    %89 = vector.broadcast %76 : vector<1x16xf32> to vector<16x16xf32>
    %90 = arith.addf %88, %89 : vector<16x16xf32>
    %cst_17 = arith.constant 0.000000e+00 : f32
    %91 = vector.broadcast %cst_17 : f32 to vector<16x16xf32>
    %92 = arith.maximumf %90, %91 : vector<16x16xf32>
    %cst_18 = arith.constant dense<0.000000e+00> : vector<16x48xf32>
    %93 = tpu.matmul %92, %77, %cst_18 {dimension_numbers = #tpu.dot_dimension_numbers<[1], [0], [0], [1], [0, 0, 1, 1], [], []>} : vector<16x16xf32>, vector<16x48xf32>, vector<16x48xf32> -> vector<16x48xf32>
    %94 = vector.extract_strided_slice %7 {offsets = [0, 32], sizes = [16, 16], strides = [1, 1]} : vector<16x192xf32> to vector<16x16xf32>
    %95 = vector.broadcast %73 : vector<1x16xf32> to vector<16x16xf32>
    %96 = arith.mulf %94, %95 : vector<16x16xf32>
    %97 = vector.broadcast %76 : vector<1x16xf32> to vector<16x16xf32>
    %98 = arith.addf %96, %97 : vector<16x16xf32>
    %cst_19 = arith.constant 0.000000e+00 : f32
    %99 = vector.broadcast %cst_19 : f32 to vector<16x16xf32>
    %100 = arith.maximumf %98, %99 : vector<16x16xf32>
    %cst_20 = arith.constant dense<0.000000e+00> : vector<16x48xf32>
    %101 = tpu.matmul %100, %77, %cst_20 {dimension_numbers = #tpu.dot_dimension_numbers<[1], [0], [0], [1], [0, 0, 1, 1], [], []>} : vector<16x16xf32>, vector<16x48xf32>, vector<16x48xf32> -> vector<16x48xf32>
    %102 = vector.extract_strided_slice %7 {offsets = [0, 48], sizes = [16, 16], strides = [1, 1]} : vector<16x192xf32> to vector<16x16xf32>
    %103 = vector.broadcast %73 : vector<1x16xf32> to vector<16x16xf32>
    %104 = arith.mulf %102, %103 : vector<16x16xf32>
    %105 = vector.broadcast %76 : vector<1x16xf32> to vector<16x16xf32>
    %106 = arith.addf %104, %105 : vector<16x16xf32>
    %cst_21 = arith.constant 0.000000e+00 : f32
    %107 = vector.broadcast %cst_21 : f32 to vector<16x16xf32>
    %108 = arith.maximumf %106, %107 : vector<16x16xf32>
    %cst_22 = arith.constant dense<0.000000e+00> : vector<16x48xf32>
    %109 = tpu.matmul %108, %77, %cst_22 {dimension_numbers = #tpu.dot_dimension_numbers<[1], [0], [0], [1], [0, 0, 1, 1], [], []>} : vector<16x16xf32>, vector<16x48xf32>, vector<16x48xf32> -> vector<16x48xf32>
    %110 = vector.extract_strided_slice %7 {offsets = [0, 64], sizes = [16, 16], strides = [1, 1]} : vector<16x192xf32> to vector<16x16xf32>
    %111 = vector.broadcast %73 : vector<1x16xf32> to vector<16x16xf32>
    %112 = arith.mulf %110, %111 : vector<16x16xf32>
    %113 = vector.broadcast %76 : vector<1x16xf32> to vector<16x16xf32>
    %114 = arith.addf %112, %113 : vector<16x16xf32>
    %cst_23 = arith.constant 0.000000e+00 : f32
    %115 = vector.broadcast %cst_23 : f32 to vector<16x16xf32>
    %116 = arith.maximumf %114, %115 : vector<16x16xf32>
    %cst_24 = arith.constant dense<0.000000e+00> : vector<16x48xf32>
    %117 = tpu.matmul %116, %77, %cst_24 {dimension_numbers = #tpu.dot_dimension_numbers<[1], [0], [0], [1], [0, 0, 1, 1], [], []>} : vector<16x16xf32>, vector<16x48xf32>, vector<16x48xf32> -> vector<16x48xf32>
    %118 = vector.extract_strided_slice %7 {offsets = [0, 80], sizes = [16, 16], strides = [1, 1]} : vector<16x192xf32> to vector<16x16xf32>
    %119 = vector.broadcast %73 : vector<1x16xf32> to vector<16x16xf32>
    %120 = arith.mulf %118, %119 : vector<16x16xf32>
    %121 = vector.broadcast %76 : vector<1x16xf32> to vector<16x16xf32>
    %122 = arith.addf %120, %121 : vector<16x16xf32>
    %cst_25 = arith.constant 0.000000e+00 : f32
    %123 = vector.broadcast %cst_25 : f32 to vector<16x16xf32>
    %124 = arith.maximumf %122, %123 : vector<16x16xf32>
    %cst_26 = arith.constant dense<0.000000e+00> : vector<16x48xf32>
    %125 = tpu.matmul %124, %77, %cst_26 {dimension_numbers = #tpu.dot_dimension_numbers<[1], [0], [0], [1], [0, 0, 1, 1], [], []>} : vector<16x16xf32>, vector<16x48xf32>, vector<16x48xf32> -> vector<16x48xf32>
    %126 = vector.extract_strided_slice %7 {offsets = [0, 96], sizes = [16, 16], strides = [1, 1]} : vector<16x192xf32> to vector<16x16xf32>
    %127 = vector.broadcast %73 : vector<1x16xf32> to vector<16x16xf32>
    %128 = arith.mulf %126, %127 : vector<16x16xf32>
    %129 = vector.broadcast %76 : vector<1x16xf32> to vector<16x16xf32>
    %130 = arith.addf %128, %129 : vector<16x16xf32>
    %cst_27 = arith.constant 0.000000e+00 : f32
    %131 = vector.broadcast %cst_27 : f32 to vector<16x16xf32>
    %132 = arith.maximumf %130, %131 : vector<16x16xf32>
    %cst_28 = arith.constant dense<0.000000e+00> : vector<16x48xf32>
    %133 = tpu.matmul %132, %77, %cst_28 {dimension_numbers = #tpu.dot_dimension_numbers<[1], [0], [0], [1], [0, 0, 1, 1], [], []>} : vector<16x16xf32>, vector<16x48xf32>, vector<16x48xf32> -> vector<16x48xf32>
    %134 = vector.extract_strided_slice %7 {offsets = [0, 112], sizes = [16, 16], strides = [1, 1]} : vector<16x192xf32> to vector<16x16xf32>
    %135 = vector.broadcast %73 : vector<1x16xf32> to vector<16x16xf32>
    %136 = arith.mulf %134, %135 : vector<16x16xf32>
    %137 = vector.broadcast %76 : vector<1x16xf32> to vector<16x16xf32>
    %138 = arith.addf %136, %137 : vector<16x16xf32>
    %cst_29 = arith.constant 0.000000e+00 : f32
    %139 = vector.broadcast %cst_29 : f32 to vector<16x16xf32>
    %140 = arith.maximumf %138, %139 : vector<16x16xf32>
    %cst_30 = arith.constant dense<0.000000e+00> : vector<16x48xf32>
    %141 = tpu.matmul %140, %77, %cst_30 {dimension_numbers = #tpu.dot_dimension_numbers<[1], [0], [0], [1], [0, 0, 1, 1], [], []>} : vector<16x16xf32>, vector<16x48xf32>, vector<16x48xf32> -> vector<16x48xf32>
    %142 = vector.extract_strided_slice %7 {offsets = [0, 128], sizes = [16, 16], strides = [1, 1]} : vector<16x192xf32> to vector<16x16xf32>
    %143 = vector.broadcast %73 : vector<1x16xf32> to vector<16x16xf32>
    %144 = arith.mulf %142, %143 : vector<16x16xf32>
    %145 = vector.broadcast %76 : vector<1x16xf32> to vector<16x16xf32>
    %146 = arith.addf %144, %145 : vector<16x16xf32>
    %cst_31 = arith.constant 0.000000e+00 : f32
    %147 = vector.broadcast %cst_31 : f32 to vector<16x16xf32>
    %148 = arith.maximumf %146, %147 : vector<16x16xf32>
    %cst_32 = arith.constant dense<0.000000e+00> : vector<16x48xf32>
    %149 = tpu.matmul %148, %77, %cst_32 {dimension_numbers = #tpu.dot_dimension_numbers<[1], [0], [0], [1], [0, 0, 1, 1], [], []>} : vector<16x16xf32>, vector<16x48xf32>, vector<16x48xf32> -> vector<16x48xf32>
    %150 = vector.extract_strided_slice %7 {offsets = [0, 144], sizes = [16, 16], strides = [1, 1]} : vector<16x192xf32> to vector<16x16xf32>
    %151 = vector.broadcast %73 : vector<1x16xf32> to vector<16x16xf32>
    %152 = arith.mulf %150, %151 : vector<16x16xf32>
    %153 = vector.broadcast %76 : vector<1x16xf32> to vector<16x16xf32>
    %154 = arith.addf %152, %153 : vector<16x16xf32>
    %cst_33 = arith.constant 0.000000e+00 : f32
    %155 = vector.broadcast %cst_33 : f32 to vector<16x16xf32>
    %156 = arith.maximumf %154, %155 : vector<16x16xf32>
    %cst_34 = arith.constant dense<0.000000e+00> : vector<16x48xf32>
    %157 = tpu.matmul %156, %77, %cst_34 {dimension_numbers = #tpu.dot_dimension_numbers<[1], [0], [0], [1], [0, 0, 1, 1], [], []>} : vector<16x16xf32>, vector<16x48xf32>, vector<16x48xf32> -> vector<16x48xf32>
    %158 = vector.extract_strided_slice %7 {offsets = [0, 160], sizes = [16, 16], strides = [1, 1]} : vector<16x192xf32> to vector<16x16xf32>
    %159 = vector.broadcast %73 : vector<1x16xf32> to vector<16x16xf32>
    %160 = arith.mulf %158, %159 : vector<16x16xf32>
    %161 = vector.broadcast %76 : vector<1x16xf32> to vector<16x16xf32>
    %162 = arith.addf %160, %161 : vector<16x16xf32>
    %cst_35 = arith.constant 0.000000e+00 : f32
    %163 = vector.broadcast %cst_35 : f32 to vector<16x16xf32>
    %164 = arith.maximumf %162, %163 : vector<16x16xf32>
    %cst_36 = arith.constant dense<0.000000e+00> : vector<16x48xf32>
    %165 = tpu.matmul %164, %77, %cst_36 {dimension_numbers = #tpu.dot_dimension_numbers<[1], [0], [0], [1], [0, 0, 1, 1], [], []>} : vector<16x16xf32>, vector<16x48xf32>, vector<16x48xf32> -> vector<16x48xf32>
    %166 = vector.extract_strided_slice %7 {offsets = [0, 176], sizes = [16, 16], strides = [1, 1]} : vector<16x192xf32> to vector<16x16xf32>
    %167 = vector.broadcast %73 : vector<1x16xf32> to vector<16x16xf32>
    %168 = arith.mulf %166, %167 : vector<16x16xf32>
    %169 = vector.broadcast %76 : vector<1x16xf32> to vector<16x16xf32>
    %170 = arith.addf %168, %169 : vector<16x16xf32>
    %cst_37 = arith.constant 0.000000e+00 : f32
    %171 = vector.broadcast %cst_37 : f32 to vector<16x16xf32>
    %172 = arith.maximumf %170, %171 : vector<16x16xf32>
    %cst_38 = arith.constant dense<0.000000e+00> : vector<16x48xf32>
    %173 = tpu.matmul %172, %77, %cst_38 {dimension_numbers = #tpu.dot_dimension_numbers<[1], [0], [0], [1], [0, 0, 1, 1], [], []>} : vector<16x16xf32>, vector<16x48xf32>, vector<16x48xf32> -> vector<16x48xf32>
    %c280 = arith.constant 280 : index
    %c0_39 = arith.constant 0 : index
    %174 = vector.load %arg2[%c280, %c0_39] : memref<304x64xf32, #tpu.memory_space<vmem>>, vector<1x16xf32>
    %cst_40 = arith.constant 0.000000e+00 : f32
    %175 = vector.broadcast %cst_40 : f32 to vector<1x16xf32>
    %cst_41 = arith.constant 0.000000e+00 : f32
    %176 = vector.broadcast %cst_41 : f32 to vector<1x16xf32>
    %177 = vector.extract_strided_slice %85 {offsets = [0, 16], sizes = [16, 16], strides = [1, 1]} : vector<16x48xf32> to vector<16x16xf32>
    %178 = vector.broadcast %174 : vector<1x16xf32> to vector<16x16xf32>
    %179 = arith.addf %177, %178 : vector<16x16xf32>
    %180 = vector.extract_strided_slice %93 {offsets = [0, 32], sizes = [16, 16], strides = [1, 1]} : vector<16x48xf32> to vector<16x16xf32>
    %181 = arith.addf %179, %180 : vector<16x16xf32>
    %cst_42 = arith.constant dense<0.000000e+00> : vector<16xf32>
    %182 = vector.multi_reduction <add>, %181, %cst_42 [0] : vector<16x16xf32> to vector<16xf32>
    %183 = vector.shape_cast %182 : vector<16xf32> to vector<1x16xf32>
    %184 = arith.addf %175, %183 : vector<1x16xf32>
    %185 = arith.mulf %181, %181 : vector<16x16xf32>
    %cst_43 = arith.constant dense<0.000000e+00> : vector<16xf32>
    %186 = vector.multi_reduction <add>, %185, %cst_43 [0] : vector<16x16xf32> to vector<16xf32>
    %187 = vector.shape_cast %186 : vector<16xf32> to vector<1x16xf32>
    %188 = arith.addf %176, %187 : vector<1x16xf32>
    %189 = vector.extract_strided_slice %93 {offsets = [0, 16], sizes = [16, 16], strides = [1, 1]} : vector<16x48xf32> to vector<16x16xf32>
    %190 = vector.broadcast %174 : vector<1x16xf32> to vector<16x16xf32>
    %191 = arith.addf %189, %190 : vector<16x16xf32>
    %192 = vector.extract_strided_slice %85 {offsets = [0, 0], sizes = [16, 16], strides = [1, 1]} : vector<16x48xf32> to vector<16x16xf32>
    %193 = arith.addf %191, %192 : vector<16x16xf32>
    %194 = vector.extract_strided_slice %101 {offsets = [0, 32], sizes = [16, 16], strides = [1, 1]} : vector<16x48xf32> to vector<16x16xf32>
    %195 = arith.addf %193, %194 : vector<16x16xf32>
    %cst_44 = arith.constant dense<0.000000e+00> : vector<16xf32>
    %196 = vector.multi_reduction <add>, %195, %cst_44 [0] : vector<16x16xf32> to vector<16xf32>
    %197 = vector.shape_cast %196 : vector<16xf32> to vector<1x16xf32>
    %198 = arith.addf %184, %197 : vector<1x16xf32>
    %199 = arith.mulf %195, %195 : vector<16x16xf32>
    %cst_45 = arith.constant dense<0.000000e+00> : vector<16xf32>
    %200 = vector.multi_reduction <add>, %199, %cst_45 [0] : vector<16x16xf32> to vector<16xf32>
    %201 = vector.shape_cast %200 : vector<16xf32> to vector<1x16xf32>
    %202 = arith.addf %188, %201 : vector<1x16xf32>
    %203 = vector.extract_strided_slice %101 {offsets = [0, 16], sizes = [16, 16], strides = [1, 1]} : vector<16x48xf32> to vector<16x16xf32>
    %204 = vector.broadcast %174 : vector<1x16xf32> to vector<16x16xf32>
    %205 = arith.addf %203, %204 : vector<16x16xf32>
    %206 = vector.extract_strided_slice %93 {offsets = [0, 0], sizes = [16, 16], strides = [1, 1]} : vector<16x48xf32> to vector<16x16xf32>
    %207 = arith.addf %205, %206 : vector<16x16xf32>
    %208 = vector.extract_strided_slice %109 {offsets = [0, 32], sizes = [16, 16], strides = [1, 1]} : vector<16x48xf32> to vector<16x16xf32>
    %209 = arith.addf %207, %208 : vector<16x16xf32>
    %cst_46 = arith.constant dense<0.000000e+00> : vector<16xf32>
    %210 = vector.multi_reduction <add>, %209, %cst_46 [0] : vector<16x16xf32> to vector<16xf32>
    %211 = vector.shape_cast %210 : vector<16xf32> to vector<1x16xf32>
    %212 = arith.addf %198, %211 : vector<1x16xf32>
    %213 = arith.mulf %209, %209 : vector<16x16xf32>
    %cst_47 = arith.constant dense<0.000000e+00> : vector<16xf32>
    %214 = vector.multi_reduction <add>, %213, %cst_47 [0] : vector<16x16xf32> to vector<16xf32>
    %215 = vector.shape_cast %214 : vector<16xf32> to vector<1x16xf32>
    %216 = arith.addf %202, %215 : vector<1x16xf32>
    %217 = vector.extract_strided_slice %109 {offsets = [0, 16], sizes = [16, 16], strides = [1, 1]} : vector<16x48xf32> to vector<16x16xf32>
    %218 = vector.broadcast %174 : vector<1x16xf32> to vector<16x16xf32>
    %219 = arith.addf %217, %218 : vector<16x16xf32>
    %220 = vector.extract_strided_slice %101 {offsets = [0, 0], sizes = [16, 16], strides = [1, 1]} : vector<16x48xf32> to vector<16x16xf32>
    %221 = arith.addf %219, %220 : vector<16x16xf32>
    %222 = vector.extract_strided_slice %117 {offsets = [0, 32], sizes = [16, 16], strides = [1, 1]} : vector<16x48xf32> to vector<16x16xf32>
    %223 = arith.addf %221, %222 : vector<16x16xf32>
    %cst_48 = arith.constant dense<0.000000e+00> : vector<16xf32>
    %224 = vector.multi_reduction <add>, %223, %cst_48 [0] : vector<16x16xf32> to vector<16xf32>
    %225 = vector.shape_cast %224 : vector<16xf32> to vector<1x16xf32>
    %226 = arith.addf %212, %225 : vector<1x16xf32>
    %227 = arith.mulf %223, %223 : vector<16x16xf32>
    %cst_49 = arith.constant dense<0.000000e+00> : vector<16xf32>
    %228 = vector.multi_reduction <add>, %227, %cst_49 [0] : vector<16x16xf32> to vector<16xf32>
    %229 = vector.shape_cast %228 : vector<16xf32> to vector<1x16xf32>
    %230 = arith.addf %216, %229 : vector<1x16xf32>
    %231 = vector.extract_strided_slice %117 {offsets = [0, 16], sizes = [16, 16], strides = [1, 1]} : vector<16x48xf32> to vector<16x16xf32>
    %232 = vector.broadcast %174 : vector<1x16xf32> to vector<16x16xf32>
    %233 = arith.addf %231, %232 : vector<16x16xf32>
    %234 = vector.extract_strided_slice %109 {offsets = [0, 0], sizes = [16, 16], strides = [1, 1]} : vector<16x48xf32> to vector<16x16xf32>
    %235 = arith.addf %233, %234 : vector<16x16xf32>
    %236 = vector.extract_strided_slice %125 {offsets = [0, 32], sizes = [16, 16], strides = [1, 1]} : vector<16x48xf32> to vector<16x16xf32>
    %237 = arith.addf %235, %236 : vector<16x16xf32>
    %cst_50 = arith.constant dense<0.000000e+00> : vector<16xf32>
    %238 = vector.multi_reduction <add>, %237, %cst_50 [0] : vector<16x16xf32> to vector<16xf32>
    %239 = vector.shape_cast %238 : vector<16xf32> to vector<1x16xf32>
    %240 = arith.addf %226, %239 : vector<1x16xf32>
    %241 = arith.mulf %237, %237 : vector<16x16xf32>
    %cst_51 = arith.constant dense<0.000000e+00> : vector<16xf32>
    %242 = vector.multi_reduction <add>, %241, %cst_51 [0] : vector<16x16xf32> to vector<16xf32>
    %243 = vector.shape_cast %242 : vector<16xf32> to vector<1x16xf32>
    %244 = arith.addf %230, %243 : vector<1x16xf32>
    %245 = vector.extract_strided_slice %125 {offsets = [0, 16], sizes = [16, 16], strides = [1, 1]} : vector<16x48xf32> to vector<16x16xf32>
    %246 = vector.broadcast %174 : vector<1x16xf32> to vector<16x16xf32>
    %247 = arith.addf %245, %246 : vector<16x16xf32>
    %248 = vector.extract_strided_slice %117 {offsets = [0, 0], sizes = [16, 16], strides = [1, 1]} : vector<16x48xf32> to vector<16x16xf32>
    %249 = arith.addf %247, %248 : vector<16x16xf32>
    %250 = vector.extract_strided_slice %133 {offsets = [0, 32], sizes = [16, 16], strides = [1, 1]} : vector<16x48xf32> to vector<16x16xf32>
    %251 = arith.addf %249, %250 : vector<16x16xf32>
    %cst_52 = arith.constant dense<0.000000e+00> : vector<16xf32>
    %252 = vector.multi_reduction <add>, %251, %cst_52 [0] : vector<16x16xf32> to vector<16xf32>
    %253 = vector.shape_cast %252 : vector<16xf32> to vector<1x16xf32>
    %254 = arith.addf %240, %253 : vector<1x16xf32>
    %255 = arith.mulf %251, %251 : vector<16x16xf32>
    %cst_53 = arith.constant dense<0.000000e+00> : vector<16xf32>
    %256 = vector.multi_reduction <add>, %255, %cst_53 [0] : vector<16x16xf32> to vector<16xf32>
    %257 = vector.shape_cast %256 : vector<16xf32> to vector<1x16xf32>
    %258 = arith.addf %244, %257 : vector<1x16xf32>
    %259 = vector.extract_strided_slice %133 {offsets = [0, 16], sizes = [16, 16], strides = [1, 1]} : vector<16x48xf32> to vector<16x16xf32>
    %260 = vector.broadcast %174 : vector<1x16xf32> to vector<16x16xf32>
    %261 = arith.addf %259, %260 : vector<16x16xf32>
    %262 = vector.extract_strided_slice %125 {offsets = [0, 0], sizes = [16, 16], strides = [1, 1]} : vector<16x48xf32> to vector<16x16xf32>
    %263 = arith.addf %261, %262 : vector<16x16xf32>
    %264 = vector.extract_strided_slice %141 {offsets = [0, 32], sizes = [16, 16], strides = [1, 1]} : vector<16x48xf32> to vector<16x16xf32>
    %265 = arith.addf %263, %264 : vector<16x16xf32>
    %cst_54 = arith.constant dense<0.000000e+00> : vector<16xf32>
    %266 = vector.multi_reduction <add>, %265, %cst_54 [0] : vector<16x16xf32> to vector<16xf32>
    %267 = vector.shape_cast %266 : vector<16xf32> to vector<1x16xf32>
    %268 = arith.addf %254, %267 : vector<1x16xf32>
    %269 = arith.mulf %265, %265 : vector<16x16xf32>
    %cst_55 = arith.constant dense<0.000000e+00> : vector<16xf32>
    %270 = vector.multi_reduction <add>, %269, %cst_55 [0] : vector<16x16xf32> to vector<16xf32>
    %271 = vector.shape_cast %270 : vector<16xf32> to vector<1x16xf32>
    %272 = arith.addf %258, %271 : vector<1x16xf32>
    %273 = vector.extract_strided_slice %141 {offsets = [0, 16], sizes = [16, 16], strides = [1, 1]} : vector<16x48xf32> to vector<16x16xf32>
    %274 = vector.broadcast %174 : vector<1x16xf32> to vector<16x16xf32>
    %275 = arith.addf %273, %274 : vector<16x16xf32>
    %276 = vector.extract_strided_slice %133 {offsets = [0, 0], sizes = [16, 16], strides = [1, 1]} : vector<16x48xf32> to vector<16x16xf32>
    %277 = arith.addf %275, %276 : vector<16x16xf32>
    %278 = vector.extract_strided_slice %149 {offsets = [0, 32], sizes = [16, 16], strides = [1, 1]} : vector<16x48xf32> to vector<16x16xf32>
    %279 = arith.addf %277, %278 : vector<16x16xf32>
    %cst_56 = arith.constant dense<0.000000e+00> : vector<16xf32>
    %280 = vector.multi_reduction <add>, %279, %cst_56 [0] : vector<16x16xf32> to vector<16xf32>
    %281 = vector.shape_cast %280 : vector<16xf32> to vector<1x16xf32>
    %282 = arith.addf %268, %281 : vector<1x16xf32>
    %283 = arith.mulf %279, %279 : vector<16x16xf32>
    %cst_57 = arith.constant dense<0.000000e+00> : vector<16xf32>
    %284 = vector.multi_reduction <add>, %283, %cst_57 [0] : vector<16x16xf32> to vector<16xf32>
    %285 = vector.shape_cast %284 : vector<16xf32> to vector<1x16xf32>
    %286 = arith.addf %272, %285 : vector<1x16xf32>
    %287 = vector.extract_strided_slice %149 {offsets = [0, 16], sizes = [16, 16], strides = [1, 1]} : vector<16x48xf32> to vector<16x16xf32>
    %288 = vector.broadcast %174 : vector<1x16xf32> to vector<16x16xf32>
    %289 = arith.addf %287, %288 : vector<16x16xf32>
    %290 = vector.extract_strided_slice %141 {offsets = [0, 0], sizes = [16, 16], strides = [1, 1]} : vector<16x48xf32> to vector<16x16xf32>
    %291 = arith.addf %289, %290 : vector<16x16xf32>
    %292 = vector.extract_strided_slice %157 {offsets = [0, 32], sizes = [16, 16], strides = [1, 1]} : vector<16x48xf32> to vector<16x16xf32>
    %293 = arith.addf %291, %292 : vector<16x16xf32>
    %cst_58 = arith.constant dense<0.000000e+00> : vector<16xf32>
    %294 = vector.multi_reduction <add>, %293, %cst_58 [0] : vector<16x16xf32> to vector<16xf32>
    %295 = vector.shape_cast %294 : vector<16xf32> to vector<1x16xf32>
    %296 = arith.addf %282, %295 : vector<1x16xf32>
    %297 = arith.mulf %293, %293 : vector<16x16xf32>
    %cst_59 = arith.constant dense<0.000000e+00> : vector<16xf32>
    %298 = vector.multi_reduction <add>, %297, %cst_59 [0] : vector<16x16xf32> to vector<16xf32>
    %299 = vector.shape_cast %298 : vector<16xf32> to vector<1x16xf32>
    %300 = arith.addf %286, %299 : vector<1x16xf32>
    %301 = vector.extract_strided_slice %157 {offsets = [0, 16], sizes = [16, 16], strides = [1, 1]} : vector<16x48xf32> to vector<16x16xf32>
    %302 = vector.broadcast %174 : vector<1x16xf32> to vector<16x16xf32>
    %303 = arith.addf %301, %302 : vector<16x16xf32>
    %304 = vector.extract_strided_slice %149 {offsets = [0, 0], sizes = [16, 16], strides = [1, 1]} : vector<16x48xf32> to vector<16x16xf32>
    %305 = arith.addf %303, %304 : vector<16x16xf32>
    %306 = vector.extract_strided_slice %165 {offsets = [0, 32], sizes = [16, 16], strides = [1, 1]} : vector<16x48xf32> to vector<16x16xf32>
    %307 = arith.addf %305, %306 : vector<16x16xf32>
    %cst_60 = arith.constant dense<0.000000e+00> : vector<16xf32>
    %308 = vector.multi_reduction <add>, %307, %cst_60 [0] : vector<16x16xf32> to vector<16xf32>
    %309 = vector.shape_cast %308 : vector<16xf32> to vector<1x16xf32>
    %310 = arith.addf %296, %309 : vector<1x16xf32>
    %311 = arith.mulf %307, %307 : vector<16x16xf32>
    %cst_61 = arith.constant dense<0.000000e+00> : vector<16xf32>
    %312 = vector.multi_reduction <add>, %311, %cst_61 [0] : vector<16x16xf32> to vector<16xf32>
    %313 = vector.shape_cast %312 : vector<16xf32> to vector<1x16xf32>
    %314 = arith.addf %300, %313 : vector<1x16xf32>
    %315 = vector.extract_strided_slice %165 {offsets = [0, 16], sizes = [16, 16], strides = [1, 1]} : vector<16x48xf32> to vector<16x16xf32>
    %316 = vector.broadcast %174 : vector<1x16xf32> to vector<16x16xf32>
    %317 = arith.addf %315, %316 : vector<16x16xf32>
    %318 = vector.extract_strided_slice %157 {offsets = [0, 0], sizes = [16, 16], strides = [1, 1]} : vector<16x48xf32> to vector<16x16xf32>
    %319 = arith.addf %317, %318 : vector<16x16xf32>
    %320 = vector.extract_strided_slice %173 {offsets = [0, 32], sizes = [16, 16], strides = [1, 1]} : vector<16x48xf32> to vector<16x16xf32>
    %321 = arith.addf %319, %320 : vector<16x16xf32>
    %cst_62 = arith.constant dense<0.000000e+00> : vector<16xf32>
    %322 = vector.multi_reduction <add>, %321, %cst_62 [0] : vector<16x16xf32> to vector<16xf32>
    %323 = vector.shape_cast %322 : vector<16xf32> to vector<1x16xf32>
    %324 = arith.addf %310, %323 : vector<1x16xf32>
    %325 = arith.mulf %321, %321 : vector<16x16xf32>
    %cst_63 = arith.constant dense<0.000000e+00> : vector<16xf32>
    %326 = vector.multi_reduction <add>, %325, %cst_63 [0] : vector<16x16xf32> to vector<16xf32>
    %327 = vector.shape_cast %326 : vector<16xf32> to vector<1x16xf32>
    %328 = arith.addf %314, %327 : vector<1x16xf32>
    %329 = vector.extract_strided_slice %173 {offsets = [0, 16], sizes = [16, 16], strides = [1, 1]} : vector<16x48xf32> to vector<16x16xf32>
    %330 = vector.broadcast %174 : vector<1x16xf32> to vector<16x16xf32>
    %331 = arith.addf %329, %330 : vector<16x16xf32>
    %332 = vector.extract_strided_slice %165 {offsets = [0, 0], sizes = [16, 16], strides = [1, 1]} : vector<16x48xf32> to vector<16x16xf32>
    %333 = arith.addf %331, %332 : vector<16x16xf32>
    %cst_64 = arith.constant dense<0.000000e+00> : vector<16xf32>
    %334 = vector.multi_reduction <add>, %333, %cst_64 [0] : vector<16x16xf32> to vector<16xf32>
    %335 = vector.shape_cast %334 : vector<16xf32> to vector<1x16xf32>
    %336 = arith.addf %324, %335 : vector<1x16xf32>
    %337 = arith.mulf %333, %333 : vector<16x16xf32>
    %cst_65 = arith.constant dense<0.000000e+00> : vector<16xf32>
    %338 = vector.multi_reduction <add>, %337, %cst_65 [0] : vector<16x16xf32> to vector<16xf32>
    %339 = vector.shape_cast %338 : vector<16xf32> to vector<1x16xf32>
    %340 = arith.addf %328, %339 : vector<1x16xf32>
    %cst_66 = arith.constant 1.920000e+02 : f32
    %341 = vector.broadcast %cst_66 : f32 to vector<1x16xf32>
    %342 = arith.divf %336, %341 : vector<1x16xf32>
    %cst_67 = arith.constant 1.920000e+02 : f32
    %343 = vector.broadcast %cst_67 : f32 to vector<1x16xf32>
    %344 = arith.divf %340, %343 : vector<1x16xf32>
    %345 = arith.mulf %342, %342 : vector<1x16xf32>
    %346 = arith.subf %344, %345 : vector<1x16xf32>
    %c283 = arith.constant 283 : index
    %c0_68 = arith.constant 0 : index
    %347 = vector.load %arg2[%c283, %c0_68] : memref<304x64xf32, #tpu.memory_space<vmem>>, vector<1x16xf32>
    %cst_69 = arith.constant 9.99999974E-6 : f32
    %348 = vector.broadcast %cst_69 : f32 to vector<1x16xf32>
    %349 = arith.addf %346, %348 : vector<1x16xf32>
    %350 = math.rsqrt %349 : vector<1x16xf32>
    %351 = arith.mulf %347, %350 : vector<1x16xf32>
    %c284 = arith.constant 284 : index
    %c0_70 = arith.constant 0 : index
    %352 = vector.load %arg2[%c284, %c0_70] : memref<304x64xf32, #tpu.memory_space<vmem>>, vector<1x16xf32>
    %353 = arith.mulf %342, %351 : vector<1x16xf32>
    %354 = arith.subf %352, %353 : vector<1x16xf32>
    %cst_71 = arith.constant 0.000000e+00 : f32
    %355 = vector.broadcast %cst_71 : f32 to vector<16x64xf32>
    %356 = vector.broadcast %351 : vector<1x16xf32> to vector<16x16xf32>
    %357 = arith.mulf %181, %356 : vector<16x16xf32>
    %358 = vector.broadcast %354 : vector<1x16xf32> to vector<16x16xf32>
    %359 = arith.addf %357, %358 : vector<16x16xf32>
    %cst_72 = arith.constant 0.000000e+00 : f32
    %360 = vector.broadcast %cst_72 : f32 to vector<16x16xf32>
    %361 = arith.maximumf %359, %360 : vector<16x16xf32>
    %c0_73 = arith.constant 0 : index
    %c0_74 = arith.constant 0 : index
    %362 = vector.load %arg2[%c0_73, %c0_74] : memref<304x64xf32, #tpu.memory_space<vmem>>, vector<16x64xf32>
    %cst_75 = arith.constant dense<0.000000e+00> : vector<16x64xf32>
    %363 = tpu.matmul %361, %362, %cst_75 {dimension_numbers = #tpu.dot_dimension_numbers<[1], [0], [0], [1], [0, 0, 1, 1], [], []>} : vector<16x16xf32>, vector<16x64xf32>, vector<16x64xf32> -> vector<16x64xf32>
    %364 = arith.addf %355, %363 : vector<16x64xf32>
    %365 = vector.broadcast %351 : vector<1x16xf32> to vector<16x16xf32>
    %366 = arith.mulf %195, %365 : vector<16x16xf32>
    %367 = vector.broadcast %354 : vector<1x16xf32> to vector<16x16xf32>
    %368 = arith.addf %366, %367 : vector<16x16xf32>
    %cst_76 = arith.constant 0.000000e+00 : f32
    %369 = vector.broadcast %cst_76 : f32 to vector<16x16xf32>
    %370 = arith.maximumf %368, %369 : vector<16x16xf32>
    %c16 = arith.constant 16 : index
    %c0_77 = arith.constant 0 : index
    %371 = vector.load %arg2[%c16, %c0_77] : memref<304x64xf32, #tpu.memory_space<vmem>>, vector<16x64xf32>
    %cst_78 = arith.constant dense<0.000000e+00> : vector<16x64xf32>
    %372 = tpu.matmul %370, %371, %cst_78 {dimension_numbers = #tpu.dot_dimension_numbers<[1], [0], [0], [1], [0, 0, 1, 1], [], []>} : vector<16x16xf32>, vector<16x64xf32>, vector<16x64xf32> -> vector<16x64xf32>
    %373 = arith.addf %364, %372 : vector<16x64xf32>
    %374 = vector.broadcast %351 : vector<1x16xf32> to vector<16x16xf32>
    %375 = arith.mulf %209, %374 : vector<16x16xf32>
    %376 = vector.broadcast %354 : vector<1x16xf32> to vector<16x16xf32>
    %377 = arith.addf %375, %376 : vector<16x16xf32>
    %cst_79 = arith.constant 0.000000e+00 : f32
    %378 = vector.broadcast %cst_79 : f32 to vector<16x16xf32>
    %379 = arith.maximumf %377, %378 : vector<16x16xf32>
    %c32 = arith.constant 32 : index
    %c0_80 = arith.constant 0 : index
    %380 = vector.load %arg2[%c32, %c0_80] : memref<304x64xf32, #tpu.memory_space<vmem>>, vector<16x64xf32>
    %cst_81 = arith.constant dense<0.000000e+00> : vector<16x64xf32>
    %381 = tpu.matmul %379, %380, %cst_81 {dimension_numbers = #tpu.dot_dimension_numbers<[1], [0], [0], [1], [0, 0, 1, 1], [], []>} : vector<16x16xf32>, vector<16x64xf32>, vector<16x64xf32> -> vector<16x64xf32>
    %382 = arith.addf %373, %381 : vector<16x64xf32>
    %383 = vector.broadcast %351 : vector<1x16xf32> to vector<16x16xf32>
    %384 = arith.mulf %223, %383 : vector<16x16xf32>
    %385 = vector.broadcast %354 : vector<1x16xf32> to vector<16x16xf32>
    %386 = arith.addf %384, %385 : vector<16x16xf32>
    %cst_82 = arith.constant 0.000000e+00 : f32
    %387 = vector.broadcast %cst_82 : f32 to vector<16x16xf32>
    %388 = arith.maximumf %386, %387 : vector<16x16xf32>
    %c48 = arith.constant 48 : index
    %c0_83 = arith.constant 0 : index
    %389 = vector.load %arg2[%c48, %c0_83] : memref<304x64xf32, #tpu.memory_space<vmem>>, vector<16x64xf32>
    %cst_84 = arith.constant dense<0.000000e+00> : vector<16x64xf32>
    %390 = tpu.matmul %388, %389, %cst_84 {dimension_numbers = #tpu.dot_dimension_numbers<[1], [0], [0], [1], [0, 0, 1, 1], [], []>} : vector<16x16xf32>, vector<16x64xf32>, vector<16x64xf32> -> vector<16x64xf32>
    %391 = arith.addf %382, %390 : vector<16x64xf32>
    %392 = vector.broadcast %351 : vector<1x16xf32> to vector<16x16xf32>
    %393 = arith.mulf %237, %392 : vector<16x16xf32>
    %394 = vector.broadcast %354 : vector<1x16xf32> to vector<16x16xf32>
    %395 = arith.addf %393, %394 : vector<16x16xf32>
    %cst_85 = arith.constant 0.000000e+00 : f32
    %396 = vector.broadcast %cst_85 : f32 to vector<16x16xf32>
    %397 = arith.maximumf %395, %396 : vector<16x16xf32>
    %c64 = arith.constant 64 : index
    %c0_86 = arith.constant 0 : index
    %398 = vector.load %arg2[%c64, %c0_86] : memref<304x64xf32, #tpu.memory_space<vmem>>, vector<16x64xf32>
    %cst_87 = arith.constant dense<0.000000e+00> : vector<16x64xf32>
    %399 = tpu.matmul %397, %398, %cst_87 {dimension_numbers = #tpu.dot_dimension_numbers<[1], [0], [0], [1], [0, 0, 1, 1], [], []>} : vector<16x16xf32>, vector<16x64xf32>, vector<16x64xf32> -> vector<16x64xf32>
    %400 = arith.addf %391, %399 : vector<16x64xf32>
    %401 = vector.broadcast %351 : vector<1x16xf32> to vector<16x16xf32>
    %402 = arith.mulf %251, %401 : vector<16x16xf32>
    %403 = vector.broadcast %354 : vector<1x16xf32> to vector<16x16xf32>
    %404 = arith.addf %402, %403 : vector<16x16xf32>
    %cst_88 = arith.constant 0.000000e+00 : f32
    %405 = vector.broadcast %cst_88 : f32 to vector<16x16xf32>
    %406 = arith.maximumf %404, %405 : vector<16x16xf32>
    %c80 = arith.constant 80 : index
    %c0_89 = arith.constant 0 : index
    %407 = vector.load %arg2[%c80, %c0_89] : memref<304x64xf32, #tpu.memory_space<vmem>>, vector<16x64xf32>
    %cst_90 = arith.constant dense<0.000000e+00> : vector<16x64xf32>
    %408 = tpu.matmul %406, %407, %cst_90 {dimension_numbers = #tpu.dot_dimension_numbers<[1], [0], [0], [1], [0, 0, 1, 1], [], []>} : vector<16x16xf32>, vector<16x64xf32>, vector<16x64xf32> -> vector<16x64xf32>
    %409 = arith.addf %400, %408 : vector<16x64xf32>
    %410 = vector.broadcast %351 : vector<1x16xf32> to vector<16x16xf32>
    %411 = arith.mulf %265, %410 : vector<16x16xf32>
    %412 = vector.broadcast %354 : vector<1x16xf32> to vector<16x16xf32>
    %413 = arith.addf %411, %412 : vector<16x16xf32>
    %cst_91 = arith.constant 0.000000e+00 : f32
    %414 = vector.broadcast %cst_91 : f32 to vector<16x16xf32>
    %415 = arith.maximumf %413, %414 : vector<16x16xf32>
    %c96 = arith.constant 96 : index
    %c0_92 = arith.constant 0 : index
    %416 = vector.load %arg2[%c96, %c0_92] : memref<304x64xf32, #tpu.memory_space<vmem>>, vector<16x64xf32>
    %cst_93 = arith.constant dense<0.000000e+00> : vector<16x64xf32>
    %417 = tpu.matmul %415, %416, %cst_93 {dimension_numbers = #tpu.dot_dimension_numbers<[1], [0], [0], [1], [0, 0, 1, 1], [], []>} : vector<16x16xf32>, vector<16x64xf32>, vector<16x64xf32> -> vector<16x64xf32>
    %418 = arith.addf %409, %417 : vector<16x64xf32>
    %419 = vector.broadcast %351 : vector<1x16xf32> to vector<16x16xf32>
    %420 = arith.mulf %279, %419 : vector<16x16xf32>
    %421 = vector.broadcast %354 : vector<1x16xf32> to vector<16x16xf32>
    %422 = arith.addf %420, %421 : vector<16x16xf32>
    %cst_94 = arith.constant 0.000000e+00 : f32
    %423 = vector.broadcast %cst_94 : f32 to vector<16x16xf32>
    %424 = arith.maximumf %422, %423 : vector<16x16xf32>
    %c112 = arith.constant 112 : index
    %c0_95 = arith.constant 0 : index
    %425 = vector.load %arg2[%c112, %c0_95] : memref<304x64xf32, #tpu.memory_space<vmem>>, vector<16x64xf32>
    %cst_96 = arith.constant dense<0.000000e+00> : vector<16x64xf32>
    %426 = tpu.matmul %424, %425, %cst_96 {dimension_numbers = #tpu.dot_dimension_numbers<[1], [0], [0], [1], [0, 0, 1, 1], [], []>} : vector<16x16xf32>, vector<16x64xf32>, vector<16x64xf32> -> vector<16x64xf32>
    %427 = arith.addf %418, %426 : vector<16x64xf32>
    %428 = vector.broadcast %351 : vector<1x16xf32> to vector<16x16xf32>
    %429 = arith.mulf %293, %428 : vector<16x16xf32>
    %430 = vector.broadcast %354 : vector<1x16xf32> to vector<16x16xf32>
    %431 = arith.addf %429, %430 : vector<16x16xf32>
    %cst_97 = arith.constant 0.000000e+00 : f32
    %432 = vector.broadcast %cst_97 : f32 to vector<16x16xf32>
    %433 = arith.maximumf %431, %432 : vector<16x16xf32>
    %c128 = arith.constant 128 : index
    %c0_98 = arith.constant 0 : index
    %434 = vector.load %arg2[%c128, %c0_98] : memref<304x64xf32, #tpu.memory_space<vmem>>, vector<16x64xf32>
    %cst_99 = arith.constant dense<0.000000e+00> : vector<16x64xf32>
    %435 = tpu.matmul %433, %434, %cst_99 {dimension_numbers = #tpu.dot_dimension_numbers<[1], [0], [0], [1], [0, 0, 1, 1], [], []>} : vector<16x16xf32>, vector<16x64xf32>, vector<16x64xf32> -> vector<16x64xf32>
    %436 = arith.addf %427, %435 : vector<16x64xf32>
    %437 = vector.broadcast %351 : vector<1x16xf32> to vector<16x16xf32>
    %438 = arith.mulf %307, %437 : vector<16x16xf32>
    %439 = vector.broadcast %354 : vector<1x16xf32> to vector<16x16xf32>
    %440 = arith.addf %438, %439 : vector<16x16xf32>
    %cst_100 = arith.constant 0.000000e+00 : f32
    %441 = vector.broadcast %cst_100 : f32 to vector<16x16xf32>
    %442 = arith.maximumf %440, %441 : vector<16x16xf32>
    %c144 = arith.constant 144 : index
    %c0_101 = arith.constant 0 : index
    %443 = vector.load %arg2[%c144, %c0_101] : memref<304x64xf32, #tpu.memory_space<vmem>>, vector<16x64xf32>
    %cst_102 = arith.constant dense<0.000000e+00> : vector<16x64xf32>
    %444 = tpu.matmul %442, %443, %cst_102 {dimension_numbers = #tpu.dot_dimension_numbers<[1], [0], [0], [1], [0, 0, 1, 1], [], []>} : vector<16x16xf32>, vector<16x64xf32>, vector<16x64xf32> -> vector<16x64xf32>
    %445 = arith.addf %436, %444 : vector<16x64xf32>
    %446 = vector.broadcast %351 : vector<1x16xf32> to vector<16x16xf32>
    %447 = arith.mulf %321, %446 : vector<16x16xf32>
    %448 = vector.broadcast %354 : vector<1x16xf32> to vector<16x16xf32>
    %449 = arith.addf %447, %448 : vector<16x16xf32>
    %cst_103 = arith.constant 0.000000e+00 : f32
    %450 = vector.broadcast %cst_103 : f32 to vector<16x16xf32>
    %451 = arith.maximumf %449, %450 : vector<16x16xf32>
    %c160 = arith.constant 160 : index
    %c0_104 = arith.constant 0 : index
    %452 = vector.load %arg2[%c160, %c0_104] : memref<304x64xf32, #tpu.memory_space<vmem>>, vector<16x64xf32>
    %cst_105 = arith.constant dense<0.000000e+00> : vector<16x64xf32>
    %453 = tpu.matmul %451, %452, %cst_105 {dimension_numbers = #tpu.dot_dimension_numbers<[1], [0], [0], [1], [0, 0, 1, 1], [], []>} : vector<16x16xf32>, vector<16x64xf32>, vector<16x64xf32> -> vector<16x64xf32>
    %454 = arith.addf %445, %453 : vector<16x64xf32>
    %455 = vector.broadcast %351 : vector<1x16xf32> to vector<16x16xf32>
    %456 = arith.mulf %333, %455 : vector<16x16xf32>
    %457 = vector.broadcast %354 : vector<1x16xf32> to vector<16x16xf32>
    %458 = arith.addf %456, %457 : vector<16x16xf32>
    %cst_106 = arith.constant 0.000000e+00 : f32
    %459 = vector.broadcast %cst_106 : f32 to vector<16x16xf32>
    %460 = arith.maximumf %458, %459 : vector<16x16xf32>
    %c176 = arith.constant 176 : index
    %c0_107 = arith.constant 0 : index
    %461 = vector.load %arg2[%c176, %c0_107] : memref<304x64xf32, #tpu.memory_space<vmem>>, vector<16x64xf32>
    %cst_108 = arith.constant dense<0.000000e+00> : vector<16x64xf32>
    %462 = tpu.matmul %460, %461, %cst_108 {dimension_numbers = #tpu.dot_dimension_numbers<[1], [0], [0], [1], [0, 0, 1, 1], [], []>} : vector<16x16xf32>, vector<16x64xf32>, vector<16x64xf32> -> vector<16x64xf32>
    %463 = arith.addf %454, %462 : vector<16x64xf32>
    %c288 = arith.constant 288 : index
    %c0_109 = arith.constant 0 : index
    %464 = vector.load %arg2[%c288, %c0_109] : memref<304x64xf32, #tpu.memory_space<vmem>>, vector<16x4xf32>
    %465 = vector.extract_strided_slice %464 {offsets = [0, 0], sizes = [16, 1], strides = [1, 1]} : vector<16x4xf32> to vector<16x1xf32>
    %466 = vector.extract_strided_slice %464 {offsets = [0, 1], sizes = [16, 1], strides = [1, 1]} : vector<16x4xf32> to vector<16x1xf32>
    %467 = vector.extract_strided_slice %464 {offsets = [0, 2], sizes = [16, 1], strides = [1, 1]} : vector<16x4xf32> to vector<16x1xf32>
    %468 = vector.extract_strided_slice %464 {offsets = [0, 3], sizes = [16, 1], strides = [1, 1]} : vector<16x4xf32> to vector<16x1xf32>
    %cst_110 = arith.constant dense<0.000000e+00> : vector<64xf32>
    %469 = vector.multi_reduction <add>, %463, %cst_110 [0] : vector<16x64xf32> to vector<64xf32>
    %470 = vector.shape_cast %469 : vector<64xf32> to vector<1x64xf32>
    %cst_111 = arith.constant 1.600000e+01 : f32
    %471 = vector.broadcast %cst_111 : f32 to vector<1x64xf32>
    %472 = arith.divf %470, %471 : vector<1x64xf32>
    %473 = arith.mulf %463, %463 : vector<16x64xf32>
    %cst_112 = arith.constant dense<0.000000e+00> : vector<64xf32>
    %474 = vector.multi_reduction <add>, %473, %cst_112 [0] : vector<16x64xf32> to vector<64xf32>
    %475 = vector.shape_cast %474 : vector<64xf32> to vector<1x64xf32>
    %cst_113 = arith.constant 1.600000e+01 : f32
    %476 = vector.broadcast %cst_113 : f32 to vector<1x64xf32>
    %477 = arith.divf %475, %476 : vector<1x64xf32>
    %c272 = arith.constant 272 : index
    %c0_114 = arith.constant 0 : index
    %478 = vector.load %arg2[%c272, %c0_114] : memref<304x64xf32, #tpu.memory_space<vmem>>, vector<1x64xf32>
    %479 = arith.mulf %472, %472 : vector<1x64xf32>
    %480 = arith.subf %477, %479 : vector<1x64xf32>
    %cst_115 = arith.constant 9.99999974E-6 : f32
    %481 = vector.broadcast %cst_115 : f32 to vector<1x64xf32>
    %482 = arith.addf %480, %481 : vector<1x64xf32>
    %483 = math.rsqrt %482 : vector<1x64xf32>
    %484 = arith.mulf %478, %483 : vector<1x64xf32>
    %c276 = arith.constant 276 : index
    %c0_116 = arith.constant 0 : index
    %485 = vector.load %arg2[%c276, %c0_116] : memref<304x64xf32, #tpu.memory_space<vmem>>, vector<1x64xf32>
    %486 = arith.mulf %472, %484 : vector<1x64xf32>
    %487 = arith.subf %485, %486 : vector<1x64xf32>
    %488 = vector.broadcast %484 : vector<1x64xf32> to vector<16x64xf32>
    %489 = arith.mulf %463, %488 : vector<16x64xf32>
    %490 = vector.broadcast %487 : vector<1x64xf32> to vector<16x64xf32>
    %491 = arith.addf %489, %490 : vector<16x64xf32>
    %cst_117 = arith.constant 0.000000e+00 : f32
    %492 = vector.broadcast %cst_117 : f32 to vector<16x64xf32>
    %493 = arith.maximumf %491, %492 : vector<16x64xf32>
    %c32_118 = arith.constant 32 : index
    %c0_119 = arith.constant 0 : index
    %494 = vector.load %arg1[%c32_118, %c0_119] : memref<224x192xf32, #tpu.memory_space<vmem>>, vector<64x192xf32>
    %cst_120 = arith.constant dense<0.000000e+00> : vector<16x192xf32>
    %495 = tpu.matmul %493, %494, %cst_120 {dimension_numbers = #tpu.dot_dimension_numbers<[1], [0], [0], [1], [0, 0, 1, 1], [], []>} : vector<16x64xf32>, vector<64x192xf32>, vector<16x192xf32> -> vector<16x192xf32>
    %496 = vector.extract_strided_slice %495 {offsets = [0, 64], sizes = [16, 64], strides = [1, 1]} : vector<16x192xf32> to vector<16x64xf32>
    %497 = vector.extract_strided_slice %495 {offsets = [0, 0], sizes = [16, 64], strides = [1, 1]} : vector<16x192xf32> to vector<16x64xf32>
    %c1_i32 = arith.constant 1 : i32
    %498 = tpu.dynamic_rotate %497 by %c1_i32 dim 0 : vector<16x64xf32>, i32 -> vector<16x64xf32>
    %499 = vector.broadcast %465 : vector<16x1xf32> to vector<16x64xf32>
    %500 = arith.mulf %499, %498 : vector<16x64xf32>
    %501 = arith.addf %496, %500 : vector<16x64xf32>
    %502 = vector.extract_strided_slice %495 {offsets = [0, 128], sizes = [16, 64], strides = [1, 1]} : vector<16x192xf32> to vector<16x64xf32>
    %c15_i32 = arith.constant 15 : i32
    %503 = tpu.dynamic_rotate %502 by %c15_i32 dim 0 : vector<16x64xf32>, i32 -> vector<16x64xf32>
    %504 = vector.broadcast %466 : vector<16x1xf32> to vector<16x64xf32>
    %505 = arith.mulf %504, %503 : vector<16x64xf32>
    %506 = arith.addf %501, %505 : vector<16x64xf32>
    %cst_121 = arith.constant dense<0.000000e+00> : vector<64xf32>
    %507 = vector.multi_reduction <add>, %506, %cst_121 [0] : vector<16x64xf32> to vector<64xf32>
    %508 = vector.shape_cast %507 : vector<64xf32> to vector<1x64xf32>
    %cst_122 = arith.constant 1.600000e+01 : f32
    %509 = vector.broadcast %cst_122 : f32 to vector<1x64xf32>
    %510 = arith.divf %508, %509 : vector<1x64xf32>
    %511 = arith.mulf %506, %506 : vector<16x64xf32>
    %cst_123 = arith.constant dense<0.000000e+00> : vector<64xf32>
    %512 = vector.multi_reduction <add>, %511, %cst_123 [0] : vector<16x64xf32> to vector<64xf32>
    %513 = vector.shape_cast %512 : vector<64xf32> to vector<1x64xf32>
    %cst_124 = arith.constant 1.600000e+01 : f32
    %514 = vector.broadcast %cst_124 : f32 to vector<1x64xf32>
    %515 = arith.divf %513, %514 : vector<1x64xf32>
    %c273 = arith.constant 273 : index
    %c0_125 = arith.constant 0 : index
    %516 = vector.load %arg2[%c273, %c0_125] : memref<304x64xf32, #tpu.memory_space<vmem>>, vector<1x64xf32>
    %517 = arith.mulf %510, %510 : vector<1x64xf32>
    %518 = arith.subf %515, %517 : vector<1x64xf32>
    %cst_126 = arith.constant 9.99999974E-6 : f32
    %519 = vector.broadcast %cst_126 : f32 to vector<1x64xf32>
    %520 = arith.addf %518, %519 : vector<1x64xf32>
    %521 = math.rsqrt %520 : vector<1x64xf32>
    %522 = arith.mulf %516, %521 : vector<1x64xf32>
    %c277 = arith.constant 277 : index
    %c0_127 = arith.constant 0 : index
    %523 = vector.load %arg2[%c277, %c0_127] : memref<304x64xf32, #tpu.memory_space<vmem>>, vector<1x64xf32>
    %524 = arith.mulf %510, %522 : vector<1x64xf32>
    %525 = arith.subf %523, %524 : vector<1x64xf32>
    %526 = vector.broadcast %522 : vector<1x64xf32> to vector<16x64xf32>
    %527 = arith.mulf %506, %526 : vector<16x64xf32>
    %528 = vector.broadcast %525 : vector<1x64xf32> to vector<16x64xf32>
    %529 = arith.addf %527, %528 : vector<16x64xf32>
    %cst_128 = arith.constant 0.000000e+00 : f32
    %530 = vector.broadcast %cst_128 : f32 to vector<16x64xf32>
    %531 = arith.maximumf %529, %530 : vector<16x64xf32>
    %c96_129 = arith.constant 96 : index
    %c0_130 = arith.constant 0 : index
    %532 = vector.load %arg1[%c96_129, %c0_130] : memref<224x192xf32, #tpu.memory_space<vmem>>, vector<64x192xf32>
    %cst_131 = arith.constant dense<0.000000e+00> : vector<16x192xf32>
    %533 = tpu.matmul %531, %532, %cst_131 {dimension_numbers = #tpu.dot_dimension_numbers<[1], [0], [0], [1], [0, 0, 1, 1], [], []>} : vector<16x64xf32>, vector<64x192xf32>, vector<16x192xf32> -> vector<16x192xf32>
    %534 = vector.extract_strided_slice %533 {offsets = [0, 64], sizes = [16, 64], strides = [1, 1]} : vector<16x192xf32> to vector<16x64xf32>
    %535 = vector.extract_strided_slice %533 {offsets = [0, 0], sizes = [16, 64], strides = [1, 1]} : vector<16x192xf32> to vector<16x64xf32>
    %c2_i32 = arith.constant 2 : i32
    %536 = tpu.dynamic_rotate %535 by %c2_i32 dim 0 : vector<16x64xf32>, i32 -> vector<16x64xf32>
    %537 = vector.broadcast %467 : vector<16x1xf32> to vector<16x64xf32>
    %538 = arith.mulf %537, %536 : vector<16x64xf32>
    %539 = arith.addf %534, %538 : vector<16x64xf32>
    %540 = vector.extract_strided_slice %533 {offsets = [0, 128], sizes = [16, 64], strides = [1, 1]} : vector<16x192xf32> to vector<16x64xf32>
    %c14_i32 = arith.constant 14 : i32
    %541 = tpu.dynamic_rotate %540 by %c14_i32 dim 0 : vector<16x64xf32>, i32 -> vector<16x64xf32>
    %542 = vector.broadcast %468 : vector<16x1xf32> to vector<16x64xf32>
    %543 = arith.mulf %542, %541 : vector<16x64xf32>
    %544 = arith.addf %539, %543 : vector<16x64xf32>
    %cst_132 = arith.constant dense<0.000000e+00> : vector<64xf32>
    %545 = vector.multi_reduction <add>, %544, %cst_132 [0] : vector<16x64xf32> to vector<64xf32>
    %546 = vector.shape_cast %545 : vector<64xf32> to vector<1x64xf32>
    %cst_133 = arith.constant 1.600000e+01 : f32
    %547 = vector.broadcast %cst_133 : f32 to vector<1x64xf32>
    %548 = arith.divf %546, %547 : vector<1x64xf32>
    %549 = arith.mulf %544, %544 : vector<16x64xf32>
    %cst_134 = arith.constant dense<0.000000e+00> : vector<64xf32>
    %550 = vector.multi_reduction <add>, %549, %cst_134 [0] : vector<16x64xf32> to vector<64xf32>
    %551 = vector.shape_cast %550 : vector<64xf32> to vector<1x64xf32>
    %cst_135 = arith.constant 1.600000e+01 : f32
    %552 = vector.broadcast %cst_135 : f32 to vector<1x64xf32>
    %553 = arith.divf %551, %552 : vector<1x64xf32>
    %c274 = arith.constant 274 : index
    %c0_136 = arith.constant 0 : index
    %554 = vector.load %arg2[%c274, %c0_136] : memref<304x64xf32, #tpu.memory_space<vmem>>, vector<1x64xf32>
    %555 = arith.mulf %548, %548 : vector<1x64xf32>
    %556 = arith.subf %553, %555 : vector<1x64xf32>
    %cst_137 = arith.constant 9.99999974E-6 : f32
    %557 = vector.broadcast %cst_137 : f32 to vector<1x64xf32>
    %558 = arith.addf %556, %557 : vector<1x64xf32>
    %559 = math.rsqrt %558 : vector<1x64xf32>
    %560 = arith.mulf %554, %559 : vector<1x64xf32>
    %c278 = arith.constant 278 : index
    %c0_138 = arith.constant 0 : index
    %561 = vector.load %arg2[%c278, %c0_138] : memref<304x64xf32, #tpu.memory_space<vmem>>, vector<1x64xf32>
    %562 = arith.mulf %548, %560 : vector<1x64xf32>
    %563 = arith.subf %561, %562 : vector<1x64xf32>
    %564 = vector.broadcast %560 : vector<1x64xf32> to vector<16x64xf32>
    %565 = arith.mulf %544, %564 : vector<16x64xf32>
    %566 = vector.broadcast %563 : vector<1x64xf32> to vector<16x64xf32>
    %567 = arith.addf %565, %566 : vector<16x64xf32>
    %cst_139 = arith.constant 0.000000e+00 : f32
    %568 = vector.broadcast %cst_139 : f32 to vector<16x64xf32>
    %569 = arith.maximumf %567, %568 : vector<16x64xf32>
    %c160_140 = arith.constant 160 : index
    %c0_141 = arith.constant 0 : index
    %570 = vector.load %arg1[%c160_140, %c0_141] : memref<224x192xf32, #tpu.memory_space<vmem>>, vector<64x192xf32>
    %cst_142 = arith.constant dense<0.000000e+00> : vector<16x192xf32>
    %571 = tpu.matmul %569, %570, %cst_142 {dimension_numbers = #tpu.dot_dimension_numbers<[1], [0], [0], [1], [0, 0, 1, 1], [], []>} : vector<16x64xf32>, vector<64x192xf32>, vector<16x192xf32> -> vector<16x192xf32>
    %572 = vector.extract_strided_slice %571 {offsets = [0, 64], sizes = [16, 64], strides = [1, 1]} : vector<16x192xf32> to vector<16x64xf32>
    %573 = vector.extract_strided_slice %571 {offsets = [0, 0], sizes = [16, 64], strides = [1, 1]} : vector<16x192xf32> to vector<16x64xf32>
    %c2_i32_143 = arith.constant 2 : i32
    %574 = tpu.dynamic_rotate %573 by %c2_i32_143 dim 0 : vector<16x64xf32>, i32 -> vector<16x64xf32>
    %575 = vector.broadcast %467 : vector<16x1xf32> to vector<16x64xf32>
    %576 = arith.mulf %575, %574 : vector<16x64xf32>
    %577 = arith.addf %572, %576 : vector<16x64xf32>
    %578 = vector.extract_strided_slice %571 {offsets = [0, 128], sizes = [16, 64], strides = [1, 1]} : vector<16x192xf32> to vector<16x64xf32>
    %c14_i32_144 = arith.constant 14 : i32
    %579 = tpu.dynamic_rotate %578 by %c14_i32_144 dim 0 : vector<16x64xf32>, i32 -> vector<16x64xf32>
    %580 = vector.broadcast %468 : vector<16x1xf32> to vector<16x64xf32>
    %581 = arith.mulf %580, %579 : vector<16x64xf32>
    %582 = arith.addf %577, %581 : vector<16x64xf32>
    %cst_145 = arith.constant dense<0.000000e+00> : vector<64xf32>
    %583 = vector.multi_reduction <add>, %582, %cst_145 [0] : vector<16x64xf32> to vector<64xf32>
    %584 = vector.shape_cast %583 : vector<64xf32> to vector<1x64xf32>
    %cst_146 = arith.constant 1.600000e+01 : f32
    %585 = vector.broadcast %cst_146 : f32 to vector<1x64xf32>
    %586 = arith.divf %584, %585 : vector<1x64xf32>
    %587 = arith.mulf %582, %582 : vector<16x64xf32>
    %cst_147 = arith.constant dense<0.000000e+00> : vector<64xf32>
    %588 = vector.multi_reduction <add>, %587, %cst_147 [0] : vector<16x64xf32> to vector<64xf32>
    %589 = vector.shape_cast %588 : vector<64xf32> to vector<1x64xf32>
    %cst_148 = arith.constant 1.600000e+01 : f32
    %590 = vector.broadcast %cst_148 : f32 to vector<1x64xf32>
    %591 = arith.divf %589, %590 : vector<1x64xf32>
    %c275 = arith.constant 275 : index
    %c0_149 = arith.constant 0 : index
    %592 = vector.load %arg2[%c275, %c0_149] : memref<304x64xf32, #tpu.memory_space<vmem>>, vector<1x64xf32>
    %593 = arith.mulf %586, %586 : vector<1x64xf32>
    %594 = arith.subf %591, %593 : vector<1x64xf32>
    %cst_150 = arith.constant 9.99999974E-6 : f32
    %595 = vector.broadcast %cst_150 : f32 to vector<1x64xf32>
    %596 = arith.addf %594, %595 : vector<1x64xf32>
    %597 = math.rsqrt %596 : vector<1x64xf32>
    %598 = arith.mulf %592, %597 : vector<1x64xf32>
    %c279 = arith.constant 279 : index
    %c0_151 = arith.constant 0 : index
    %599 = vector.load %arg2[%c279, %c0_151] : memref<304x64xf32, #tpu.memory_space<vmem>>, vector<1x64xf32>
    %600 = arith.mulf %586, %598 : vector<1x64xf32>
    %601 = arith.subf %599, %600 : vector<1x64xf32>
    %602 = vector.broadcast %598 : vector<1x64xf32> to vector<16x64xf32>
    %603 = arith.mulf %582, %602 : vector<16x64xf32>
    %604 = vector.broadcast %601 : vector<1x64xf32> to vector<16x64xf32>
    %605 = arith.addf %603, %604 : vector<16x64xf32>
    %cst_152 = arith.constant 0.000000e+00 : f32
    %606 = vector.broadcast %cst_152 : f32 to vector<16x64xf32>
    %607 = arith.maximumf %605, %606 : vector<16x64xf32>
    %c192 = arith.constant 192 : index
    %c0_153 = arith.constant 0 : index
    %608 = vector.load %arg2[%c192, %c0_153] : memref<304x64xf32, #tpu.memory_space<vmem>>, vector<64x30xf32>
    %cst_154 = arith.constant dense<0.000000e+00> : vector<16x30xf32>
    %609 = tpu.matmul %607, %608, %cst_154 {dimension_numbers = #tpu.dot_dimension_numbers<[1], [0], [0], [1], [0, 0, 1, 1], [], []>} : vector<16x64xf32>, vector<64x30xf32>, vector<16x30xf32> -> vector<16x30xf32>
    %610 = vector.extract_strided_slice %609 {offsets = [0, 10], sizes = [16, 10], strides = [1, 1]} : vector<16x30xf32> to vector<16x10xf32>
    %611 = vector.extract_strided_slice %609 {offsets = [0, 0], sizes = [16, 10], strides = [1, 1]} : vector<16x30xf32> to vector<16x10xf32>
    %c2_i32_155 = arith.constant 2 : i32
    %612 = tpu.dynamic_rotate %611 by %c2_i32_155 dim 0 : vector<16x10xf32>, i32 -> vector<16x10xf32>
    %613 = vector.broadcast %467 : vector<16x1xf32> to vector<16x10xf32>
    %614 = arith.mulf %613, %612 : vector<16x10xf32>
    %615 = arith.addf %610, %614 : vector<16x10xf32>
    %616 = vector.extract_strided_slice %609 {offsets = [0, 20], sizes = [16, 10], strides = [1, 1]} : vector<16x30xf32> to vector<16x10xf32>
    %c14_i32_156 = arith.constant 14 : i32
    %617 = tpu.dynamic_rotate %616 by %c14_i32_156 dim 0 : vector<16x10xf32>, i32 -> vector<16x10xf32>
    %618 = vector.broadcast %468 : vector<16x1xf32> to vector<16x10xf32>
    %619 = arith.mulf %618, %617 : vector<16x10xf32>
    %620 = arith.addf %615, %619 : vector<16x10xf32>
    %c0_157 = arith.constant 0 : index
    %c0_158 = arith.constant 0 : index
    %621 = vector.load %arg3[%c0_157, %c0_158] : memref<16x10xf32, #tpu.memory_space<vmem>>, vector<16x10xf32>
    tpu.vector_store %arg3[%c0_157, %c0_158], %620 {strides = array<i32>} : memref<16x10xf32, #tpu.memory_space<vmem>>, vector<16x10xf32>,
    return
  }
}

</mosaic_0001>

<bundles_post_ra>
// kernel: auw_forward.1
= control target key start
LH: loop header
LB: loop body
LE: loop exit
PB: predicated region body
PF: predicated region fallthrough
CT: control target
= control target key end

     0   :  { %v5803_v5 = vmov 0.0   ;;  %s5799_s0 = inlined_call_operand.vmem [shape: f32[16,24], index: 0, kind: input, shape index: {}]   ;;  %s5800_s1 = inlined_call_operand.vmem [shape: f32[224,192], index: 1, kind: input, shape index: {}]   ;;  %s5801_s2 = inlined_call_operand.vmem [shape: f32[304,64], index: 2, kind: input, shape index: {}]   ;;  %s5802_s3 = inlined_call_operand.hbm [shape: f32[16,10], index: 3, kind: output, shape index: {}]  }
   0x1   :  { %v18_v0 = vld [vmem:[%s5800_s1 + $0x8] sm:$0xff]  ;;  %v20_v1 = vld [vmem:[%s5800_s1 + $0x18] sm:$0xff]  ;;  %v17_v2 = vld [vmem:[%s5800_s1] sm:$0xff]  ;;  %107 = vmatprep.mubr.f32.mxu0 %v5803_v5 }
   0x2   :  { %v4271_v3 = vpack.c.bf16 %v20_v1, %v18_v0  ;;  %v19_v4 = vld [vmem:[%s5800_s1 + $0x10] sm:$0xff]  ;;  %v22_v7 = vld [vmem:[%s5800_s1 + $0x28] sm:$0xff] }
   0x3   :  { %v4273_v6 = vpack.c.bf16 %v19_v4, %v17_v2 }
   0x4   :  { %4272 = vmatprep.subr.bf16.mxu0 %v4271_v3 }
   0x5   :  { %8 = vsyncpa [#allocation3], 0  ;;  %4274 = vmatpush1.bf16.msra.mxu0 %v4273_v6  ;;  %v21_v8 = vld [vmem:[%s5800_s1 + $0x20] sm:$0xff]  ;;  %vm36_vm0 = vcmask 195584   ;;  %v16_v10 = vld [vmem:[%s5799_s0 + $0x8] sm:$0xff]  ;;  %v26_v11 = vlaneseq  ;;  %vm131_vm1 = vcmask 523264  }
   0x6   :  { %47 = vmatprep.subr.mxu0 %v22_v7  ;;  %v15_v9 = vld [vmem:[%s5799_s0] sm:$0xff]  ;;  %v3918_v14 = vld [vmem:[%s5800_s1 + $0x30] ss:$8 sm:$0x3]  ;;  %s4520_s0 = smov 96   ;;  %s4521_s30 = smov 112  }
   0x7   :  { %v4583_v12 = vshrl.u32 %v26_v11, 7  ;;  %s4522_s4 = smov 80   ;;  %s4523_s5 = smov 64   ;;  %v261_v2 = vld [vmem:[%s5801_s2 + $0x100] sm:$0xff]  ;;  %v262_v3 = vld [vmem:[%s5801_s2 + $0x108] sm:$0xff]  ;;  %vm277_vm2 = vcmask 130048  }
   0x8   :  { %s4524_s6 = smov 48   ;;  %s4525_s7 = smov 32   ;;  %v4652_v4 = vpack.c.bf16 %v262_v3, %v261_v2  ;;  %vm1421_vm3 = vcmask 261248   ;;  %vm3274_vm6 = vcmask 1048064   ;;  %vm3899_vm9 = vcmask 80896  }
   0x9   :  { %48 = vmatpush1.msra.mxu0 %v21_v8  ;;  %5812 = vst [vmem:[#allocation5_spill] sm:$0xff] %v4583_v12  ;;  %v4586_v13 = vsub.s32 0, %v4583_v12  ;;  %v32_v19 = vsub.s32 1, %v4583_v12  ;;  %s4526_s8 = smov 16   ;;  %s4533_s13 = smov 118  }
   0xa   :  { %3919 = vmatmul.mubr.msk.f32.vlgmr.msra.gmra.mrb[0].mxu0 %vm36_vm0, %v15_v9  ;;  %4276 = vmatprep.subr.bf16.mxu0 %v4652_v4  ;;  %s4534_s14 = smov [#allocation2]  }
   0xb   :  { %113 = vmatprep.mubr.f32.mxu0 %v5803_v5  ;;  %v29_v15 = vrot.slane %v3918_v14, %v4586_v13  ;;  %v33_v25 = vrot.slane %v3918_v14, %v32_v19  ;;  %4280 = vmatprep.subr.bf16.mxu1 %v4652_v4  ;;  %s3907_s15 = sshll.u32 %s4534_s14, 4  ;;  %s3908_s15 = int_to_ptr.vmem [resolvable:$true] %s3907_s15 }
   0xc   :  { %4278 = vmatpush3.bf16.msra.mxu0 %v4652_v4  ;;  %4282 = vmatpush3.bf16.msra.mxu1 %v4652_v4  ;;  %s4495_s16 = scalar_lea.vmem %s3908_s15, 256  ;;  %p4500_p1 = scmp.lt.s32.totalorder %s3908_s15, %s3908_s15 }
   0xd   :  { %4284 = vmatprep.subr.bf16.mxu1 %v4652_v4  ;;  %4288 = vmatprep.subr.bf16.mxu0 %v4652_v4  ;;  %p4496_p0 = scmp.ne.s32.totalorder %s3908_s15, %s4495_s16  ;;  %p4501_p2 = scmp.lt.s32.totalorder %s4495_s16, %s4495_s16 }
   0xe   :  { %3920 = vmatmul.mubr.msk.f32.gmra.mrb[2].mxu0 %vm36_vm0, %v16_v10 }
   0xf   :  { %p4502_p3 = por %p4501_p2, %p4500_p1 }
  0x11   :  { %p4503_p4 = pnand %p4502_p3, %p4496_p0 }
  0xdd   :  { %v109_v16 = vpop.f32.mrb[0].mxu0 }
  0xde   :  { %v110_v17 = vadd.f32 %v109_v16, %v29_v15  ;;  %v111_v18 = vpop.f32.mrb[1].mxu0 }
  0xdf   :  { %v112_v32 = vadd.f32 %v111_v18, %v33_v25 }
  0xe0   :  { %v4593_v21 = vmax.f32 %v110_v17, 0.0 }
  0xe1   :  { %v115_v20 = vpop.f32.mrb[2].mxu0  ;;  %v4605_v38 = vmax.f32 %v112_v32, 0.0 }
  0xe2   :  { %v116_v22 = vadd.f32 %v115_v20, %v29_v15  ;;  %v117_v23 = vpop.f32.mrb[3].mxu0  ;;  %v141_v27 = vmul.f32 %v4593_v21, %v4593_v21 }
  0xe3   :  { %v118_v29 = vadd.f32 %v117_v23, %v33_v25  ;;  %v142_v44 = vmul.f32 %v4605_v38, %v4605_v38  ;;  %v132_v50 = vsel %vm131_vm1, %v4605_v38, 0.0 }
  0xe4   :  { %v4595_v24 = vmax.f32 %v116_v22, 0.0 }
  0xe5   :  { %v4603_v35 = vmax.f32 %v118_v29, 0.0  ;;  %v152_v49 = vsel %vm131_vm1, %v142_v44, 0.0 }
  0xe6   :  { %v124_v26 = vadd.f32 %v4595_v24, %v4593_v21  ;;  %v143_v28 = vmul.f32 %v4595_v24, %v4595_v24 }
  0xe7   :  { %v144_v41 = vmul.f32 %v4603_v35, %v4603_v35  ;;  %v133_v48 = vsel %vm131_vm1, %v4603_v35, 0.0 }
  0xe8   :  { %v125_v30 = vrot.slane %v124_v26, 4  ;;  %v145_v31 = vadd.f32 %v143_v28, %v141_v27  ;;  %v134_v53 = vadd.f32 %v133_v48, %v132_v50 }
  0xe9   :  { %v153_v47 = vsel %vm131_vm1, %v144_v41, 0.0 }
  0xea   :  { %v126_v33 = vadd.f32 %v125_v30, %v124_v26  ;;  %v146_v34 = vrot.slane %v145_v31, 4  ;;  %v154_v52 = vadd.f32 %v153_v47, %v152_v49  ;;  %v135_v55 = vrot.slane %v134_v53, 4 }
  0xec   :  { %v127_v36 = vrot.slane %v126_v33, 2  ;;  %v147_v37 = vadd.f32 %v146_v34, %v145_v31  ;;  %v155_v54 = vrot.slane %v154_v52, 4  ;;  %v136_v57 = vadd.f32 %v135_v55, %v134_v53 }
  0xee   :  { %v128_v39 = vadd.f32 %v127_v36, %v126_v33  ;;  %v148_v40 = vrot.slane %v147_v37, 2  ;;  %v156_v56 = vadd.f32 %v155_v54, %v154_v52  ;;  %v137_v59 = vrot.slane %v136_v57, 2 }
  0xf0   :  { %v129_v42 = vrot.slane %v128_v39, 1  ;;  %v149_v43 = vadd.f32 %v148_v40, %v147_v37  ;;  %v157_v58 = vrot.slane %v156_v56, 2  ;;  %v138_v61 = vadd.f32 %v137_v59, %v136_v57  ;;  %v254_v59 = vld [vmem:[%s5801_s2 + $0x119] sm:$0x1] }
  0xf2   :  { %v4611_v45 = vadd.f32 %v129_v42, %v128_v39  ;;  %v150_v46 = vrot.slane %v149_v43, 1  ;;  %v158_v60 = vadd.f32 %v157_v58, %v156_v56  ;;  %v139_v63 = vrot.slane %v138_v61, 1 }
  0xf4   :  { %173 = vrot.lane.b32.xlu1 %v4611_v45, %s4520_s0  ;;  %164 = vrot.lane.b32.xlu0 %v4611_v45, %s4521_s30  ;;  %v151_v51 = vadd.f32 %v150_v46, %v149_v43  ;;  %v159_v62 = vrot.slane %v158_v60, 1  ;;  %v140_v1 = vadd.f32 %v139_v63, %v138_v61 }
  0xf6   :  { %v160_v0 = vadd.f32 %v159_v62, %v158_v60  ;;  %v258_v62 = vld [vmem:[%s5801_s2 + $0x11a] sm:$0x1] }
  0xf8   :  { %177 = vrot.lane.b32.xlu1 %v151_v51, %s4520_s0  ;;  %181 = vrot.lane.b32.xlu0 %v4611_v45, %s4522_s4 }
  0xfc   :  { %185 = vrot.lane.b32.xlu1 %v151_v51, %s4522_s4  ;;  %189 = vrot.lane.b32.xlu0 %v4611_v45, %s4523_s5 }
 0x100   :  { %193 = vrot.lane.b32.xlu1 %v151_v51, %s4523_s5  ;;  %197 = vrot.lane.b32.xlu0 %v4611_v45, %s4524_s6 }
 0x104   :  { %201 = vrot.lane.b32.xlu1 %v151_v51, %s4524_s6  ;;  %169 = vrot.lane.b32.xlu0 %v151_v51, %s4521_s30 }
 0x108   :  { %209 = vrot.lane.b32.xlu1 %v151_v51, %s4525_s7  ;;  %205 = vrot.lane.b32.xlu0 %v4611_v45, %s4525_s7 }
 0x10c   :  { %217 = vrot.lane.b32.xlu1 %v151_v51, %s4526_s8  ;;  %213 = vrot.lane.b32.xlu0 %v4611_v45, %s4526_s8 }
 0x110   :  { %229 = vrot.lane.b32.xlu1 %v160_v0, %s4521_s30  ;;  %224 = vrot.lane.b32.xlu0 %v140_v1, %s4521_s30 }
 0x114   :  { %237 = vrot.lane.b32.xlu1 %v160_v0, %s4520_s0  ;;  %233 = vrot.lane.b32.xlu0 %v140_v1, %s4520_s0 }
 0x118   :  { %245 = vrot.lane.b32.xlu1 %v160_v0, %s4522_s4  ;;  %241 = vrot.lane.b32.xlu0 %v140_v1, %s4522_s4 }
 0x166   :  { %v174_v6 = vpop.permute.xlu1 %173  ;;  %v165_v7 = vpop.permute.xlu0 %164 }
 0x167   :  { %v167_v14 = vadd.f32 %v165_v7, %v4611_v45 }
 0x169   :  { %v176_v17 = vadd.f32 %v174_v6, %v167_v14 }
 0x16a   :  { %v178_v8 = vpop.permute.xlu1 %177  ;;  %v182_v9 = vpop.permute.xlu0 %181 }
 0x16b   :  { %v184_v20 = vadd.f32 %v182_v9, %v176_v17 }
 0x16e   :  { %v186_v10 = vpop.permute.xlu1 %185  ;;  %v190_v11 = vpop.permute.xlu0 %189 }
 0x16f   :  { %v192_v23 = vadd.f32 %v190_v11, %v184_v20 }
 0x172   :  { %v194_v15 = vpop.permute.xlu1 %193  ;;  %v198_v16 = vpop.permute.xlu0 %197 }
 0x173   :  { %v200_v28 = vadd.f32 %v198_v16, %v192_v23 }
 0x176   :  { %v202_v18 = vpop.permute.xlu1 %201  ;;  %v170_v19 = vpop.permute.xlu0 %169 }
 0x177   :  { %v172_v22 = vadd.f32 %v170_v19, %v151_v51 }
 0x179   :  { %v180_v25 = vadd.f32 %v178_v8, %v172_v22 }
 0x17a   :  { %v210_v26 = vpop.permute.xlu1 %209  ;;  %v206_v27 = vpop.permute.xlu0 %205 }
 0x17b   :  { %v188_v29 = vadd.f32 %v186_v10, %v180_v25  ;;  %v208_v31 = vadd.f32 %v206_v27, %v200_v28 }
 0x17d   :  { %v196_v30 = vadd.f32 %v194_v15, %v188_v29 }
 0x17e   :  { %v218_v32 = vpop.permute.xlu1 %217  ;;  %v214_v33 = vpop.permute.xlu0 %213 }
 0x17f   :  { %v204_v34 = vadd.f32 %v202_v18, %v196_v30  ;;  %v216_v36 = vadd.f32 %v214_v33, %v208_v31 }
 0x181   :  { %v212_v37 = vadd.f32 %v210_v26, %v204_v34  ;;  %v221_v42 = vadd.f32 %v216_v36, %v140_v1 }
 0x182   :  { %v230_v39 = vpop.permute.xlu1 %229  ;;  %v225_v40 = vpop.permute.xlu0 %224 }
 0x183   :  { %v220_v41 = vadd.f32 %v218_v32, %v212_v37  ;;  %v227_v47 = vadd.f32 %v225_v40, %v221_v42 }
 0x185   :  { %v222_v43 = vadd.f32 %v220_v41, %v160_v0 }
 0x186   :  { %v238_v44 = vpop.permute.xlu1 %237  ;;  %v234_v45 = vpop.permute.xlu0 %233 }
 0x187   :  { %v232_v46 = vadd.f32 %v230_v39, %v222_v43  ;;  %v236_v49 = vadd.f32 %v234_v45, %v227_v47 }
 0x189   :  { %v240_v48 = vadd.f32 %v238_v44, %v232_v46 }
 0x18a   :  { %v246_v50 = vpop.permute.xlu1 %245  ;;  %v242_v51 = vpop.permute.xlu0 %241 }
 0x18b   :  { %v248_v52 = vadd.f32 %v246_v50, %v240_v48  ;;  %v244_v53 = vadd.f32 %v242_v51, %v236_v49 }
 0x18d   :  { %v250_v54 = vmul.f32 0.0052083335, %v244_v53  ;;  %v251_v55 = vmul.f32 0.0052083335, %v248_v52 }
 0x18f   :  { %v252_v56 = vmul.f32 %v250_v54, %v250_v54 }
 0x191   :  { %v253_v57 = vsub.f32 %v251_v55, %v252_v56 }
 0x193   :  { %v255_v58 = vadd.f32 1e-05, %v253_v57 }
 0x195   :  { %4483 = vrsqrt.f32 %v255_v58 }
 0x19f   :  { %v4484_v60 = vpop.eup %4483 }
 0x1a0   :  { %v257_v61 = vmul.f32 %v4484_v60, %v254_v59 }
 0x1a2   :  { %v259_v63 = vmul.f32 %v257_v61, %v250_v54  ;;  %v266_v0 = vrot.slane %v257_v61, %v4586_v13 }
 0x1a4   :  { %v260_v1 = vsub.f32 %v258_v62, %v259_v63  ;;  %360 = vrot.lane.b32.xlu0 %v266_v0, %s4526_s8  ;;  %v267_v3 = vmul.f32 %v266_v0, %v4593_v21  ;;  %v268_v6 = vmul.f32 %v266_v0, %v4595_v24  ;;  %v1040_v7 = vmul.f32 %v266_v0, %v4605_v38 }
 0x1a5   :  { %v1041_v8 = vmul.f32 %v266_v0, %v4603_v35 }
 0x1a6   :  { %v272_v2 = vrot.slane %v260_v1, %v4586_v13 }
 0x1a8   :  { %458 = vrot.lane.b32.xlu0 %v266_v0, %s4525_s7  ;;  %366 = vrot.lane.b32.xlu1 %v272_v2, %s4526_s8  ;;  %v273_v9 = vadd.f32 %v272_v2, %v267_v3  ;;  %v274_v10 = vadd.f32 %v272_v2, %v268_v6  ;;  %v4676_v11 = vadd.f32 %v1040_v7, %v272_v2 }
 0x1a9   :  { %v4678_v14 = vadd.f32 %v1041_v8, %v272_v2 }
 0x1aa   :  { %v275_v15 = vmax.f32 %v273_v9, 0.0  ;;  %v276_v16 = vmax.f32 %v274_v10, 0.0 }
 0x1ac   :  { %555 = vrot.lane.b32.xlu0 %v266_v0, %s4524_s6  ;;  %463 = vrot.lane.b32.xlu1 %v272_v2, %s4525_s7 }
 0x1ad   :  { %4088 = vmatprep.mubr.msk.f32.mxu0 %vm277_vm2, %v275_v15 }
 0x1ae   :  { %4089 = vmatmul.mubr.msk.f32.vlgmr.msra.gmra.mrb[4].mxu0 %vm277_vm2, %v276_v16 }
 0x1af   :  { %4290 = vmatpush3.bf16.msra.mxu0 %v4652_v4 }
 0x1b0   :  { %652 = vrot.lane.b32.xlu0 %v266_v0, %s4523_s5  ;;  %560 = vrot.lane.b32.xlu1 %v272_v2, %s4524_s6 }
 0x1b1   :  { %4296 = vmatprep.subr.bf16.mxu0 %v4652_v4 }
 0x1b4   :  { %749 = vrot.lane.b32.xlu0 %v266_v0, %s4522_s4  ;;  %657 = vrot.lane.b32.xlu1 %v272_v2, %s4523_s5 }
 0x1b8   :  { %846 = vrot.lane.b32.xlu0 %v266_v0, %s4520_s0  ;;  %754 = vrot.lane.b32.xlu1 %v272_v2, %s4522_s4 }
 0x1bc   :  { %943 = vrot.lane.b32.xlu0 %v266_v0, %s4521_s30  ;;  %851 = vrot.lane.b32.xlu1 %v272_v2, %s4520_s0 }
 0x1c0   :  { %948 = vrot.lane.b32.xlu1 %v272_v2, %s4521_s30 }
 0x216   :  { %v4695_v17 = vpop.permute.xlu0 %360 }
 0x217   :  { %v364_v18 = vmul.f32 %v4695_v17, %v4595_v24  ;;  %v363_v19 = vmul.f32 %v4695_v17, %v4593_v21 }
 0x21a   :  { %v4701_v20 = vpop.permute.xlu0 %458  ;;  %v4703_v22 = vpop.permute.xlu1 %366 }
 0x21b   :  { %v370_v23 = vadd.f32 %v4703_v22, %v364_v18  ;;  %v369_v25 = vadd.f32 %v4703_v22, %v363_v19  ;;  %v462_v28 = vmul.f32 %v4701_v20, %v4595_v24  ;;  %v461_v29 = vmul.f32 %v4701_v20, %v4593_v21 }
 0x21c   :  { %v1128_v18 = vmul.f32 %v4695_v17, %v4603_v35  ;;  %v1127_v19 = vmul.f32 %v4695_v17, %v4605_v38 }
 0x21d   :  { %v372_v26 = vmax.f32 %v370_v23, 0.0  ;;  %v371_v27 = vmax.f32 %v369_v25, 0.0 }
 0x21e   :  { %v4711_v30 = vpop.permute.xlu0 %555  ;;  %v4713_v31 = vpop.permute.xlu1 %463 }
 0x21f   :  { %377 = vrot.lane.b32.xlu1 %v372_v26, %s4521_s30  ;;  %375 = vrot.lane.b32.xlu0 %v371_v27, %s4521_s30  ;;  %v467_v32 = vadd.f32 %v4713_v31, %v462_v28  ;;  %v466_v33 = vadd.f32 %v4713_v31, %v461_v29  ;;  %v559_v37 = vmul.f32 %v4711_v30, %v4595_v24 }
 0x220   :  { %v558_v41 = vmul.f32 %v4711_v30, %v4593_v21  ;;  %v1219_v26 = vmul.f32 %v4701_v20, %v4603_v35  ;;  %v1218_v27 = vmul.f32 %v4701_v20, %v4605_v38 }
 0x221   :  { %v469_v34 = vmax.f32 %v467_v32, 0.0  ;;  %v468_v36 = vmax.f32 %v466_v33, 0.0  ;;  %v1309_v33 = vmul.f32 %v4711_v30, %v4605_v38 }
 0x222   :  { %v653_v39 = vpop.permute.xlu0 %652  ;;  %v4721_v40 = vpop.permute.xlu1 %560  ;;  %v1221_v29 = vadd.f32 %v1219_v26, %v4713_v31  ;;  %v1220_v32 = vadd.f32 %v1218_v27, %v4713_v31 }
 0x223   :  { %474 = vrot.lane.b32.xlu1 %v469_v34, %s4520_s0  ;;  %472 = vrot.lane.b32.xlu0 %v468_v36, %s4520_s0  ;;  %v564_v42 = vadd.f32 %v4721_v40, %v559_v37  ;;  %v563_v43 = vadd.f32 %v4721_v40, %v558_v41  ;;  %v655_v44 = vmul.f32 %v653_v39, %v4593_v21 }
 0x224   :  { %v656_v45 = vmul.f32 %v653_v39, %v4595_v24  ;;  %v1223_v34 = vmax.f32 %v1221_v29, 0.0  ;;  %v1222_v20 = vmax.f32 %v1220_v32, 0.0  ;;  %v1311_v37 = vadd.f32 %v1309_v33, %v4721_v40 }
 0x225   :  { %v566_v46 = vmax.f32 %v564_v42, 0.0  ;;  %v565_v49 = vmax.f32 %v563_v43, 0.0 }
 0x226   :  { %v750_v47 = vpop.permute.xlu0 %749  ;;  %v658_v48 = vpop.permute.xlu1 %657  ;;  %v1313_v39 = vmax.f32 %v1311_v37, 0.0 }
 0x227   :  { %v660_v50 = vadd.f32 %v658_v48, %v655_v44  ;;  %v661_v51 = vadd.f32 %v658_v48, %v656_v45  ;;  %571 = vrot.lane.b32.xlu1 %v566_v46, %s4522_s4  ;;  %569 = vrot.lane.b32.xlu0 %v565_v49, %s4522_s4  ;;  %v752_v52 = vmul.f32 %v750_v47, %v4593_v21 }
 0x228   :  { %v753_v53 = vmul.f32 %v750_v47, %v4595_v24 }
 0x229   :  { %v663_v54 = vmax.f32 %v661_v51, 0.0  ;;  %v662_v55 = vmax.f32 %v660_v50, 0.0 }
 0x22a   :  { %v847_v56 = vpop.permute.xlu0 %846  ;;  %v755_v57 = vpop.permute.xlu1 %754 }
 0x22b   :  { %v757_v58 = vadd.f32 %v755_v57, %v752_v52  ;;  %v758_v59 = vadd.f32 %v755_v57, %v753_v53  ;;  %668 = vrot.lane.b32.xlu1 %v663_v54, %s4523_s5  ;;  %666 = vrot.lane.b32.xlu0 %v662_v55, %s4523_s5  ;;  %v849_v60 = vmul.f32 %v847_v56, %v4593_v21  ;;  %v1044_v52 = vmax.f32 %v4676_v11, 0.0 }
 0x22c   :  { %v850_v61 = vmul.f32 %v847_v56, %v4595_v24  ;;  %v1045_v55 = vmax.f32 %v4678_v14, 0.0 }
 0x22d   :  { %v760_v62 = vmax.f32 %v758_v59, 0.0  ;;  %v759_v63 = vmax.f32 %v757_v58, 0.0 }
 0x22e   :  { %v944_v0 = vpop.permute.xlu0 %943  ;;  %v852_v1 = vpop.permute.xlu1 %851 }
 0x22f   :  { %v854_v2 = vadd.f32 %v852_v1, %v849_v60  ;;  %v855_v3 = vadd.f32 %v852_v1, %v850_v61  ;;  %765 = vrot.lane.b32.xlu1 %v760_v62, %s4524_s6  ;;  %763 = vrot.lane.b32.xlu0 %v759_v63, %s4524_s6  ;;  %v946_v6 = vmul.f32 %v944_v0, %v4593_v21 }
 0x230   :  { %v947_v7 = vmul.f32 %v944_v0, %v4595_v24  ;;  %v1130_v21 = vadd.f32 %v1128_v18, %v4703_v22  ;;  %v1129_v24 = vadd.f32 %v1127_v19, %v4703_v22  ;;  %v1310_v22 = vmul.f32 %v4711_v30, %v4603_v35  ;;  %v3945_v35 = vld [vmem:[%s5801_s2 + $0x118] ss:$0 sm:$0xff] }
 0x231   :  { %v857_v8 = vmax.f32 %v855_v3, 0.0  ;;  %v856_v9 = vmax.f32 %v854_v2, 0.0 }
 0x232   :  { %v949_v10 = vpop.permute.xlu1 %948  ;;  %v1132_v28 = vmax.f32 %v1130_v21, 0.0  ;;  %v1131_v17 = vmax.f32 %v1129_v24, 0.0  ;;  %v1312_v36 = vadd.f32 %v1310_v22, %v4721_v40 }
 0x233   :  { %v951_v15 = vadd.f32 %v949_v10, %v946_v6  ;;  %v952_v16 = vadd.f32 %v949_v10, %v947_v7  ;;  %862 = vrot.lane.b32.xlu1 %v857_v8, %s4525_s7  ;;  %860 = vrot.lane.b32.xlu0 %v856_v9, %s4525_s7 }
 0x234   :  { %v1314_v31 = vmax.f32 %v1312_v36, 0.0 }
 0x235   :  { %v954_v23 = vmax.f32 %v952_v16, 0.0  ;;  %v953_v25 = vmax.f32 %v951_v15, 0.0 }
 0x237   :  { %959 = vrot.lane.b32.xlu1 %v954_v23, %s4526_s8  ;;  %957 = vrot.lane.b32.xlu0 %v953_v25, %s4526_s8 }
 0x23b   :  { %1137 = vrot.lane.b32.xlu1 %v1132_v28, %s4521_s30  ;;  %1135 = vrot.lane.b32.xlu0 %v1131_v17, %s4521_s30 }
 0x23f   :  { %1228 = vrot.lane.b32.xlu1 %v1223_v34, %s4520_s0  ;;  %1226 = vrot.lane.b32.xlu0 %v1222_v20, %s4520_s0 }
 0x243   :  { %1319 = vrot.lane.b32.xlu1 %v1314_v31, %s4522_s4  ;;  %1317 = vrot.lane.b32.xlu0 %v1313_v39, %s4522_s4 }
 0x247   :  { %1406 = vrot.lane.b32.xlu0 %v3945_v35, %s4526_s8 }
 0x281   :  { %v4775_v38 = vpop.f32.mrb[4].mxu0 }
 0x282   :  { %1450 = vrot.lane.b32.xlu0 %v4775_v38, %s4526_s8  ;;  %v4779_v30 = vpop.f32.mrb[5].mxu0 }
 0x283   :  { %1448 = vrot.lane.b32.xlu1 %v4779_v30, %s4526_s8 }
 0x291   :  { %v376_v40 = vpop.permute.xlu0 %375  ;;  %v378_v41 = vpop.permute.xlu1 %377 }
 0x292   :  { %4095 = vmatprep.mubr.msk.f32.mxu1 %vm277_vm2, %v376_v40 }
 0x293   :  { %4096 = vmatmul.mubr.msk.f32.vlgmr.msra.gmra.mrb[0].mxu1 %vm277_vm2, %v378_v41 }
 0x294   :  { %4286 = vmatpush3.bf16.msra.mxu1 %v4652_v4 }
 0x295   :  { %v473_v42 = vpop.permute.xlu0 %472  ;;  %v475_v43 = vpop.permute.xlu1 %474  ;;  %4292 = vmatprep.subr.bf16.mxu1 %v4652_v4 }
 0x296   :  { %4102 = vmatprep.mubr.msk.f32.mxu1 %vm277_vm2, %v473_v42 }
 0x297   :  { %4103 = vmatmul.mubr.msk.f32.vlgmr.msra.gmra.mrb[2].mxu1 %vm277_vm2, %v475_v43 }
 0x298   :  { %4294 = vmatpush3.bf16.msra.mxu1 %v4652_v4 }
 0x299   :  { %v572_v44 = vpop.permute.xlu1 %571  ;;  %4300 = vmatprep.subr.bf16.mxu1 %v4652_v4  ;;  %v570_v45 = vpop.permute.xlu0 %569 }
 0x29a   :  { %4109 = vmatprep.mubr.msk.f32.mxu0 %vm277_vm2, %v570_v45 }
 0x29b   :  { %4110 = vmatmul.mubr.msk.f32.vlgmr.msra.gmra.mrb[6].mxu0 %vm277_vm2, %v572_v44 }
 0x29c   :  { %4298 = vmatpush3.bf16.msra.mxu0 %v4652_v4 }
 0x29d   :  { %v669_v46 = vpop.permute.xlu1 %668  ;;  %v667_v47 = vpop.permute.xlu0 %666  ;;  %4304 = vmatprep.subr.bf16.mxu0 %v4652_v4 }
 0x29e   :  { %4116 = vmatprep.mubr.msk.f32.mxu1 %vm277_vm2, %v667_v47 }
 0x29f   :  { %4117 = vmatmul.mubr.msk.f32.vlgmr.msra.gmra.mrb[4].mxu1 %vm277_vm2, %v669_v46 }
 0x2a0   :  { %4302 = vmatpush3.bf16.msra.mxu1 %v4652_v4 }
 0x2a1   :  { %v766_v48 = vpop.permute.xlu1 %765  ;;  %v764_v49 = vpop.permute.xlu0 %763  ;;  %4308 = vmatprep.subr.bf16.mxu1 %v4652_v4 }
 0x2a2   :  { %4123 = vmatprep.mubr.msk.f32.mxu0 %vm277_vm2, %v764_v49 }
 0x2a3   :  { %4124 = vmatmul.mubr.msk.f32.vlgmr.msra.gmra.mrb[8].mxu0 %vm277_vm2, %v766_v48 }
 0x2a4   :  { %4306 = vmatpush3.bf16.msra.mxu0 %v4652_v4 }
 0x2a5   :  { %v863_v50 = vpop.permute.xlu1 %862  ;;  %v861_v51 = vpop.permute.xlu0 %860  ;;  %4312 = vmatprep.subr.bf16.mxu0 %v4652_v4 }
 0x2a6   :  { %4130 = vmatprep.mubr.msk.f32.mxu1 %vm277_vm2, %v861_v51 }
 0x2a7   :  { %4131 = vmatmul.mubr.msk.f32.vlgmr.msra.gmra.mrb[6].mxu1 %vm277_vm2, %v863_v50 }
 0x2a8   :  { %4310 = vmatpush3.bf16.msra.mxu1 %v4652_v4  ;;  %4144 = vmatprep.mubr.msk.f32.mxu1 %vm277_vm2, %v1044_v52 }
 0x2a9   :  { %v960_v53 = vpop.permute.xlu1 %959  ;;  %v958_v54 = vpop.permute.xlu0 %957  ;;  %4316 = vmatprep.subr.bf16.mxu1 %v4652_v4 }
 0x2aa   :  { %4137 = vmatprep.mubr.msk.f32.mxu0 %vm277_vm2, %v958_v54 }
 0x2ab   :  { %4138 = vmatmul.mubr.msk.f32.vlgmr.msra.gmra.mrb[10].mxu0 %vm277_vm2, %v960_v53  ;;  %4145 = vmatmul.mubr.msk.f32.vlgmr.msra.gmra.mrb[8].mxu1 %vm277_vm2, %v1045_v55 }
 0x2ac   :  { %4314 = vmatpush3.bf16.msra.mxu0 %v4652_v4  ;;  %4318 = vmatpush3.bf16.msra.mxu1 %v4652_v4 }
 0x2ad   :  { %v1138_v11 = vpop.permute.xlu1 %1137  ;;  %v1136_v56 = vpop.permute.xlu0 %1135  ;;  %4320 = vmatprep.subr.bf16.mxu0 %v4652_v4 }
 0x2ae   :  { %4151 = vmatprep.mubr.msk.f32.mxu0 %vm277_vm2, %v1136_v56 }
 0x2af   :  { %4152 = vmatmul.mubr.msk.f32.vlgmr.msra.gmra.mrb[12].mxu0 %vm277_vm2, %v1138_v11 }
 0x2b0   :  { %4322 = vmatpush3.bf16.msra.mxu0 %v4652_v4 }
 0x2b1   :  { %v1229_v14 = vpop.permute.xlu1 %1228  ;;  %v1227_v57 = vpop.permute.xlu0 %1226 }
 0x2b2   :  { %4158 = vmatprep.mubr.msk.f32.mxu1 %vm277_vm2, %v1227_v57 }
 0x2b3   :  { %4159 = vmatmul.mubr.msk.f32.vlgmr.msra.gmra.mrb[10].mxu1 %vm277_vm2, %v1229_v14 }
 0x2b5   :  { %v1320_v58 = vpop.permute.xlu1 %1319  ;;  %v1318_v59 = vpop.permute.xlu0 %1317 }
 0x2b6   :  { %4165 = vmatprep.mubr.msk.f32.mxu0 %vm277_vm2, %v1318_v59 }
 0x2b7   :  { %4166 = vmatmul.mubr.msk.f32.vlgmr.msra.gmra.mrb[14].mxu0 %vm277_vm2, %v1320_v58 }
 0x2b8   :  { %3207 = vmatprep.mubr.f32.mxu0 %v5803_v5 }
 0x2b9   :  { %v4952_v26 = vpop.permute.xlu0 %1406 }
 0x2ba   :  { %v1410_v33 = vadd.f32 %v4775_v38, %v4952_v26  ;;  %v1409_v34 = vadd.f32 %v4952_v26, %v4779_v30 }
 0x2f4   :  { %v1451_v27 = vpop.permute.xlu0 %1450 }
 0x2f5   :  { %v1449_v28 = vpop.permute.xlu1 %1448 }
 0x366   :  { %v4824_v60 = vpop.f32.mrb[0].mxu1 }
 0x367   :  { %v4826_v61 = vpop.f32.mrb[1].mxu1  ;;  %1415 = vrot.lane.b32.xlu0 %v4824_v60, %s4521_s30  ;;  %v1445_v35 = vadd.f32 %v4824_v60, %v4952_v26 }
 0x368   :  { %1413 = vrot.lane.b32.xlu1 %v4826_v61, %s4521_s30  ;;  %v1444_v40 = vadd.f32 %v4952_v26, %v4826_v61 }
 0x369   :  { %v1455_v48 = vadd.f32 %v1451_v27, %v1445_v35 }
 0x36a   :  { %v4832_v4 = vpop.f32.mrb[2].mxu1  ;;  %v1454_v49 = vadd.f32 %v1449_v28, %v1444_v40 }
 0x36b   :  { %v4834_v62 = vpop.f32.mrb[3].mxu1  ;;  %1492 = vrot.lane.b32.xlu0 %v4824_v60, %s4526_s8  ;;  %v1489_v44 = vadd.f32 %v4832_v4, %v4952_v26 }
 0x36c   :  { %1490 = vrot.lane.b32.xlu1 %v4826_v61, %s4526_s8  ;;  %v1488_v45 = vadd.f32 %v4952_v26, %v4834_v62 }
 0x36e   :  { %v4840_v63 = vpop.f32.mrb[6].mxu0 }
 0x36f   :  { %1502 = vrot.lane.b32.xlu0 %v4840_v63, %s4521_s30  ;;  %v4844_v0 = vpop.f32.mrb[7].mxu0  ;;  %v1531_v61 = vadd.f32 %v4840_v63, %v4952_v26 }
 0x370   :  { %1500 = vrot.lane.b32.xlu1 %v4844_v0, %s4521_s30 }
 0x372   :  { %v4848_v1 = vpop.f32.mrb[4].mxu1 }
 0x373   :  { %v4850_v2 = vpop.f32.mrb[5].mxu1  ;;  %1576 = vrot.lane.b32.xlu0 %v4840_v63, %s4526_s8 }
 0x374   :  { %1574 = vrot.lane.b32.xlu1 %v4844_v0, %s4526_s8  ;;  %v1572_v63 = vadd.f32 %v4952_v26, %v4850_v2 }
 0x376   :  { %v4856_v3 = vpop.f32.mrb[8].mxu0 }
 0x377   :  { %1460 = vrot.lane.b32.xlu0 %v4832_v4, %s4521_s30  ;;  %v4860_v6 = vpop.f32.mrb[9].mxu0 }
 0x378   :  { %1458 = vrot.lane.b32.xlu1 %v4834_v62, %s4521_s30 }
 0x37a   :  { %v4864_v7 = vpop.f32.mrb[6].mxu1 }
 0x37b   :  { %v4866_v8 = vpop.f32.mrb[7].mxu1  ;;  %1534 = vrot.lane.b32.xlu0 %v4832_v4, %s4526_s8  ;;  %v1530_v4 = vadd.f32 %v4952_v26, %v4844_v0  ;;  %v5006_v0 = vadd.f32 %v4952_v26, %v4860_v6 }
 0x37c   :  { %1532 = vrot.lane.b32.xlu1 %v4834_v62, %s4526_s8  ;;  %v1573_v62 = vadd.f32 %v4848_v1, %v4952_v26 }
 0x37e   :  { %v4872_v9 = vpop.f32.mrb[10].mxu0  ;;  %v4874_v10 = vpop.f32.mrb[8].mxu1 }
 0x37f   :  { %v4876_v15 = vpop.f32.mrb[9].mxu1  ;;  %1586 = vrot.lane.b32.xlu0 %v4856_v3, %s4521_s30  ;;  %v4880_v16 = vpop.f32.mrb[11].mxu0  ;;  %v5026_v40 = vadd.f32 %v4874_v10, %v4952_v26 }
 0x380   :  { %1584 = vrot.lane.b32.xlu1 %v4860_v6, %s4521_s30 }
 0x382   :  { %v4884_v18 = vpop.f32.mrb[12].mxu0 }
 0x383   :  { %1660 = vrot.lane.b32.xlu0 %v4856_v3, %s4526_s8  ;;  %v4888_v19 = vpop.f32.mrb[13].mxu0 }
 0x384   :  { %1658 = vrot.lane.b32.xlu1 %v4860_v6, %s4526_s8  ;;  %v1656_v6 = vadd.f32 %v4952_v26, %v4866_v8 }
 0x386   :  { %v4892_v23 = vpop.f32.mrb[10].mxu1 }
 0x387   :  { %v4894_v25 = vpop.f32.mrb[11].mxu1  ;;  %1544 = vrot.lane.b32.xlu0 %v4848_v1, %s4521_s30 }
 0x388   :  { %1542 = vrot.lane.b32.xlu1 %v4850_v2, %s4521_s30 }
 0x38a   :  { %v4900_v21 = vpop.f32.mrb[14].mxu0 }
 0x38b   :  { %1618 = vrot.lane.b32.xlu0 %v4848_v1, %s4526_s8  ;;  %v4904_v24 = vpop.f32.mrb[15].mxu0 }
 0x38c   :  { %1616 = vrot.lane.b32.xlu1 %v4850_v2, %s4526_s8 }
 0x38f   :  { %1670 = vrot.lane.b32.xlu0 %v4872_v9, %s4521_s30 }
 0x390   :  { %1668 = vrot.lane.b32.xlu1 %v4880_v16, %s4521_s30 }
 0x393   :  { %1744 = vrot.lane.b32.xlu0 %v4872_v9, %s4526_s8 }
 0x394   :  { %1742 = vrot.lane.b32.xlu1 %v4880_v16, %s4526_s8 }
 0x397   :  { %1628 = vrot.lane.b32.xlu0 %v4864_v7, %s4521_s30 }
 0x398   :  { %1626 = vrot.lane.b32.xlu1 %v4866_v8, %s4521_s30 }
 0x39b   :  { %1702 = vrot.lane.b32.xlu0 %v4864_v7, %s4526_s8 }
 0x39c   :  { %1700 = vrot.lane.b32.xlu1 %v4866_v8, %s4526_s8 }
 0x39f   :  { %1754 = vrot.lane.b32.xlu0 %v4884_v18, %s4521_s30 }
 0x3a0   :  { %1752 = vrot.lane.b32.xlu1 %v4888_v19, %s4521_s30 }
 0x3a3   :  { %1828 = vrot.lane.b32.xlu0 %v4884_v18, %s4526_s8 }
 0x3a4   :  { %1826 = vrot.lane.b32.xlu1 %v4888_v19, %s4526_s8 }
 0x3a7   :  { %1712 = vrot.lane.b32.xlu0 %v4874_v10, %s4521_s30 }
 0x3a8   :  { %1710 = vrot.lane.b32.xlu1 %v4876_v15, %s4521_s30 }
 0x3ab   :  { %1786 = vrot.lane.b32.xlu0 %v4874_v10, %s4526_s8 }
 0x3ac   :  { %1784 = vrot.lane.b32.xlu1 %v4876_v15, %s4526_s8 }
 0x3af   :  { %1838 = vrot.lane.b32.xlu0 %v4900_v21, %s4521_s30 }
 0x3b0   :  { %1836 = vrot.lane.b32.xlu1 %v4904_v24, %s4521_s30 }
 0x3b3   :  { %1796 = vrot.lane.b32.xlu0 %v4892_v23, %s4521_s30 }
 0x3b4   :  { %1794 = vrot.lane.b32.xlu1 %v4894_v25, %s4521_s30 }
 0x3b7   :  { %1870 = vrot.lane.b32.xlu0 %v4892_v23, %s4526_s8 }
 0x3b8   :  { %1868 = vrot.lane.b32.xlu1 %v4894_v25, %s4526_s8 }
 0x3d9   :  { %v1416_v29 = vpop.permute.xlu0 %1415 }
 0x3da   :  { %v1414_v17 = vpop.permute.xlu1 %1413  ;;  %v4958_v20 = vadd.f32 %v1416_v29, %v1410_v33  ;;  %v5010_v33 = vadd.f32 %v4856_v3, %v4952_v26 }
 0x3db   :  { %v4960_v31 = vadd.f32 %v1414_v17, %v1409_v34  ;;  %v1657_v34 = vadd.f32 %v4864_v7, %v4952_v26 }
 0x3dc   :  { %v1433_v38 = vmul.f32 %v4958_v20, %v4958_v20  ;;  %v1423_v42 = vsel %vm1421_vm3, %v4958_v20, 0.0 }
 0x3dd   :  { %v1493_v32 = vpop.permute.xlu0 %1492  ;;  %v1432_v30 = vmul.f32 %v4960_v31, %v4960_v31  ;;  %v1422_v43 = vsel %vm1421_vm3, %v4960_v31, 0.0 }
 0x3de   :  { %v1491_v22 = vpop.permute.xlu1 %1490  ;;  %v1435_v47 = vsel %vm1421_vm3, %v1433_v38, 0.0  ;;  %v1424_v51 = vadd.f32 %v1423_v42, %v1422_v43  ;;  %v1497_v53 = vadd.f32 %v1493_v32, %v1489_v44 }
 0x3df   :  { %v1434_v52 = vsel %vm1421_vm3, %v1432_v30, 0.0  ;;  %v1496_v54 = vadd.f32 %v1491_v22, %v1488_v45 }
 0x3e0   :  { %v1436_v58 = vadd.f32 %v1435_v47, %v1434_v52  ;;  %v1425_v60 = vrot.slane %v1424_v51, 4 }
 0x3e1   :  { %v1503_v36 = vpop.permute.xlu0 %1502 }
 0x3e2   :  { %v1501_v37 = vpop.permute.xlu1 %1500  ;;  %v4980_v55 = vadd.f32 %v1503_v36, %v1497_v53  ;;  %v1437_v1 = vrot.slane %v1436_v58, 4  ;;  %v1426_v36 = vadd.f32 %v1425_v60, %v1424_v51  ;;  %v5046_v60 = vadd.f32 %v4952_v26, %v4880_v16 }
 0x3e3   :  { %v4982_v11 = vadd.f32 %v1501_v37, %v1496_v54 }
 0x3e4   :  { %v1519_v27 = vmul.f32 %v4980_v55, %v4980_v55  ;;  %v1509_v37 = vsel %vm1421_vm3, %v4980_v55, 0.0  ;;  %v1438_v8 = vadd.f32 %v1437_v1, %v1436_v58  ;;  %v1427_v10 = vrot.slane %v1426_v36, 2 }
 0x3e5   :  { %v1577_v39 = vpop.permute.xlu0 %1576  ;;  %v1518_v28 = vmul.f32 %v4982_v11, %v4982_v11  ;;  %v1508_v2 = vsel %vm1421_vm3, %v4982_v11, 0.0 }
 0x3e6   :  { %v1575_v41 = vpop.permute.xlu1 %1574  ;;  %v1521_v7 = vsel %vm1421_vm3, %v1519_v27, 0.0  ;;  %v1510_v44 = vadd.f32 %v1509_v37, %v1508_v2  ;;  %v1581_v45 = vadd.f32 %v1577_v39, %v1573_v62  ;;  %v1439_v62 = vrot.slane %v1438_v8, 2 }
 0x3e7   :  { %v1520_v38 = vsel %vm1421_vm3, %v1518_v28, 0.0  ;;  %v5054_v28 = vadd.f32 %v4892_v23, %v4952_v26 }
 0x3e8   :  { %v1522_v51 = vadd.f32 %v1521_v7, %v1520_v38 }
 0x3e9   :  { %v1461_v46 = vpop.permute.xlu0 %1460 }
 0x3ea   :  { %v1459_v50 = vpop.permute.xlu1 %1458  ;;  %v4984_v56 = vadd.f32 %v1461_v46, %v1455_v48  ;;  %v1580_v46 = vadd.f32 %v1575_v41, %v1572_v63  ;;  %v5034_v48 = vadd.f32 %v4952_v26, %v4876_v15  ;;  %v5050_v15 = vadd.f32 %v4884_v18, %v4952_v26 }
 0x3eb   :  { %v4986_v14 = vadd.f32 %v1459_v50, %v1454_v49  ;;  %v5038_v50 = vadd.f32 %v4872_v9, %v4952_v26  ;;  %v1511_v9 = vrot.slane %v1510_v44, 4 }
 0x3ec   :  { %v1477_v29 = vmul.f32 %v4984_v56, %v4984_v56  ;;  %v1467_v35 = vsel %vm1421_vm3, %v4984_v56, 0.0 }
 0x3ed   :  { %v1535_v57 = vpop.permute.xlu0 %1534  ;;  %v1476_v17 = vmul.f32 %v4986_v14, %v4986_v14  ;;  %v1466_v3 = vsel %vm1421_vm3, %v4986_v14, 0.0  ;;  %v1512_v37 = vadd.f32 %v1511_v9, %v1510_v44 }
 0x3ee   :  { %v1533_v59 = vpop.permute.xlu1 %1532  ;;  %v1479_v30 = vsel %vm1421_vm3, %v1477_v29, 0.0  ;;  %v1468_v49 = vadd.f32 %v1467_v35, %v1466_v3  ;;  %v1539_v58 = vadd.f32 %v1535_v57, %v1531_v61  ;;  %v5058_v57 = vadd.f32 %v4952_v26, %v4888_v19 }
 0x3ef   :  { %v1478_v42 = vsel %vm1421_vm3, %v1476_v17, 0.0  ;;  %v1538_v39 = vadd.f32 %v1533_v59, %v1530_v4  ;;  %v1428_v59 = vadd.f32 %v1427_v10, %v1426_v36  ;;  %v1523_v29 = vrot.slane %v1522_v51, 4 }
 0x3f0   :  { %v1480_v52 = vadd.f32 %v1479_v30, %v1478_v42  ;;  %v1469_v61 = vrot.slane %v1468_v49, 4  ;;  %v1440_v36 = vadd.f32 %v1439_v62, %v1438_v8  ;;  %v5084_v62 = vadd.f32 %v4952_v26, %v4894_v25 }
 0x3f1   :  { %v1587_v32 = vpop.permute.xlu0 %1586  ;;  %v1524_v8 = vadd.f32 %v1523_v29, %v1522_v51 }
 0x3f2   :  { %v1585_v22 = vpop.permute.xlu1 %1584  ;;  %v5040_v53 = vadd.f32 %v1587_v32, %v1581_v45  ;;  %v1481_v18 = vrot.slane %v1480_v52, 4  ;;  %v1470_v7 = vadd.f32 %v1469_v61, %v1468_v49 }
 0x3f3   :  { %v5042_v54 = vadd.f32 %v1585_v22, %v1580_v46  ;;  %v1525_v29 = vrot.slane %v1524_v8, 2 }
 0x3f4   :  { %v1593_v17 = vsel %vm1421_vm3, %v5040_v53, 0.0  ;;  %v1603_v2 = vmul.f32 %v5040_v53, %v5040_v53  ;;  %v1482_v45 = vadd.f32 %v1481_v18, %v1480_v52  ;;  %v1513_v52 = vrot.slane %v1512_v37, 2 }
 0x3f5   :  { %v1661_v43 = vpop.permute.xlu0 %1660  ;;  %5813 = vst [vmem:[#allocation6_spill] sm:$0xff] %v5042_v54  ;;  %v1592_v32 = vsel %vm1421_vm3, %v5042_v54, 0.0  ;;  %v1602_v35 = vmul.f32 %v5042_v54, %v5042_v54  ;;  %v1471_v18 = vrot.slane %v1470_v7, 2 }
 0x3f6   :  { %v1659_v47 = vpop.permute.xlu1 %1658  ;;  %v1594_v46 = vadd.f32 %v1593_v17, %v1592_v32  ;;  %v1665_v10 = vadd.f32 %v1661_v43, %v1657_v34  ;;  %v1605_v9 = vsel %vm1421_vm3, %v1603_v2, 0.0  ;;  %v1483_v25 = vrot.slane %v1482_v45, 2 }
 0x3f7   :  { %v1664_v44 = vadd.f32 %v1659_v47, %v1656_v6  ;;  %v1604_v49 = vsel %vm1421_vm3, %v1602_v35, 0.0  ;;  %v5094_v6 = vadd.f32 %v4900_v21, %v4952_v26  ;;  %v1441_v47 = vrot.slane %v1440_v36, 1 }
 0x3f8   :  { %v1595_v51 = vrot.slane %v1594_v46, 4  ;;  %v1606_v17 = vadd.f32 %v1605_v9, %v1604_v49  ;;  %v1484_v9 = vadd.f32 %v1483_v25, %v1482_v45 }
 0x3f9   :  { %v1545_v41 = vpop.permute.xlu0 %1544  ;;  %v1442_v12 = vadd.f32 %v1441_v47, %v1440_v36 }
 0x3fa   :  { %v1543_v27 = vpop.permute.xlu1 %1542  ;;  %v5060_v4 = vadd.f32 %v1545_v41, %v1539_v58  ;;  %v1596_v49 = vadd.f32 %v1595_v51, %v1594_v46 }
 0x3fb   :  { %v5062_v16 = vadd.f32 %v1543_v27, %v1538_v39  ;;  %v1429_v39 = vrot.slane %v1428_v59, 1 }
 0x3fc   :  { %v1551_v23 = vsel %vm1421_vm3, %v5060_v4, 0.0  ;;  %v1561_v19 = vmul.f32 %v5060_v4, %v5060_v4 }
 0x3fd   :  { %v1550_v63 = vsel %vm1421_vm3, %v5062_v16, 0.0  ;;  %v1560_v1 = vmul.f32 %v5062_v16, %v5062_v16  ;;  %v1619_v22 = vpop.permute.xlu0 %1618 }
 0x3fe   :  { %v1617_v3 = vpop.permute.xlu1 %1616  ;;  %v1563_v38 = vsel %vm1421_vm3, %v1561_v19, 0.0  ;;  %v1552_v30 = vadd.f32 %v1551_v23, %v1550_v63 }
 0x3ff   :  { %v1562_v42 = vsel %vm1421_vm3, %v1560_v1, 0.0  ;;  %v5102_v1 = vadd.f32 %v4952_v26, %v4904_v24  ;;  %v1526_v24 = vadd.f32 %v1525_v29, %v1524_v8  ;;  %v1607_v26 = vrot.slane %v1606_v17, 4 }
 0x400   :  { %v1564_v58 = vadd.f32 %v1563_v38, %v1562_v42  ;;  %v1553_v27 = vrot.slane %v1552_v30, 4  ;;  %v1430_v42 = vadd.f32 %v1429_v39, %v1428_v59 }
 0x401   :  { %v1671_v41 = vpop.permute.xlu0 %1670  ;;  %v1608_v47 = vadd.f32 %v1607_v26, %v1606_v17 }
 0x402   :  { %v5088_v61 = vadd.f32 %v1671_v41, %v1665_v10  ;;  %v1669_v23 = vpop.permute.xlu1 %1668  ;;  %v1565_v34 = vrot.slane %v1564_v58, 4  ;;  %v1554_v2 = vadd.f32 %v1553_v27, %v1552_v30  ;;  %v1514_v10 = vadd.f32 %v1513_v52, %v1512_v37 }
 0x403   :  { %v5090_v43 = vadd.f32 %v1669_v23, %v1664_v44  ;;  %v1472_v44 = vadd.f32 %v1471_v18, %v1470_v7  ;;  %v1623_v23 = vadd.f32 %v1619_v22, %v5010_v33  ;;  %v1622_v30 = vadd.f32 %v1617_v3, %v5006_v0 }
 0x404   :  { %5814 = vst [vmem:[#allocation7_spill] sm:$0xff] %v5088_v61  ;;  %v1677_v32 = vsel %vm1421_vm3, %v5088_v61, 0.0  ;;  %v1687_v21 = vmul.f32 %v5088_v61, %v5088_v61  ;;  %v1566_v41 = vadd.f32 %v1565_v34, %v1564_v58  ;;  %v1555_v61 = vrot.slane %v1554_v2, 2 }
 0x405   :  { %5815 = vst [vmem:[#allocation8_spill] sm:$0xff] %v5090_v43  ;;  %v1676_v19 = vsel %vm1421_vm3, %v5090_v43, 0.0  ;;  %v1745_v63 = vpop.permute.xlu0 %1744  ;;  %v1686_v35 = vmul.f32 %v5090_v43, %v5090_v43  ;;  %v1515_v7 = vrot.slane %v1514_v10, 1  ;;  %v1473_v45 = vrot.slane %v1472_v44, 1 }
 0x406   :  { %v1743_v38 = vpop.permute.xlu1 %1742  ;;  %v1678_v5 = vadd.f32 %v1677_v32, %v1676_v19  ;;  %v1689_v54 = vsel %vm1421_vm3, %v1687_v21, 0.0  ;;  %v1567_v46 = vrot.slane %v1566_v41, 2  ;;  %v1485_v33 = vrot.slane %v1484_v9, 1 }
 0x407   :  { %v1688_v43 = vsel %vm1421_vm3, %v1686_v35, 0.0  ;;  %v1597_v22 = vrot.slane %v1596_v49, 2  ;;  %v1527_v34 = vrot.slane %v1526_v24, 1  ;;  %v1556_v25 = vadd.f32 %v1555_v61, %v1554_v2 }
 0x408   :  { %v1679_v36 = vrot.slane %v1678_v5, 4  ;;  %v1690_v3 = vadd.f32 %v1689_v54, %v1688_v43  ;;  %v1474_v32 = vadd.f32 %v1473_v45, %v1472_v44  ;;  %v1568_v19 = vadd.f32 %v1567_v46, %v1566_v41 }
 0x409   :  { %v1629_v27 = vpop.permute.xlu0 %1628  ;;  %v1486_v43 = vadd.f32 %v1485_v33, %v1484_v9  ;;  %v1609_v61 = vrot.slane %v1608_v47, 2  ;;  %v1557_v2 = vrot.slane %v1556_v25, 1  ;;  %v1516_v45 = vadd.f32 %v1515_v7, %v1514_v10 }
 0x40a   :  { %v5112_v59 = vadd.f32 %v1629_v27, %v1623_v23  ;;  %v1627_v37 = vpop.permute.xlu1 %1626  ;;  %v1680_v35 = vadd.f32 %v1679_v36, %v1678_v5  ;;  %v1749_v23 = vadd.f32 %v1745_v63, %v5026_v40  ;;  %v1598_v27 = vadd.f32 %v1597_v22, %v1596_v49 }
 0x40b   :  { %v5114_v58 = vadd.f32 %v1627_v37, %v1622_v30  ;;  %v1691_v37 = vrot.slane %v1690_v3, 4  ;;  %v1569_v46 = vrot.slane %v1568_v19, 1  ;;  %v1528_v5 = vadd.f32 %v1527_v34, %v1526_v24 }
 0x40c   :  { %5816 = vst [vmem:[#allocation9_spill] sm:$0xff] %v5112_v59  ;;  %v1635_v0 = vsel %vm1421_vm3, %v5112_v59, 0.0  ;;  %v1645_v39 = vmul.f32 %v5112_v59, %v5112_v59  ;;  %v1681_v40 = vrot.slane %v1680_v35, 2  ;;  %v1558_v10 = vadd.f32 %v1557_v2, %v1556_v25 }
 0x40d   :  { %5817 = vst [vmem:[#allocation10_spill] sm:$0xff] %v5114_v58  ;;  %v1634_v8 = vsel %vm1421_vm3, %v5114_v58, 0.0  ;;  %v1644_v52 = vmul.f32 %v5114_v58, %v5114_v58  ;;  %v1703_v18 = vpop.permute.xlu0 %1702  ;;  %v1748_v58 = vadd.f32 %v1743_v38, %v5034_v48  ;;  %v1475_v48 = vadd.f32 %v1474_v32, %v1430_v42 }
 0x40e   :  { %v1636_v51 = vadd.f32 %v1635_v0, %v1634_v8  ;;  %v1701_v29 = vpop.permute.xlu1 %1700  ;;  %v1647_v21 = vsel %vm1421_vm3, %v1645_v39, 0.0  ;;  %v1487_v38 = vadd.f32 %v1486_v43, %v1442_v12  ;;  %v1692_v33 = vadd.f32 %v1691_v37, %v1690_v3 }
 0x40f   :  { %v1646_v54 = vsel %vm1421_vm3, %v1644_v52, 0.0  ;;  %v1599_v39 = vrot.slane %v1598_v27, 1  ;;  %v1610_v8 = vadd.f32 %v1609_v61, %v1608_v47  ;;  %v1682_v42 = vadd.f32 %v1681_v40, %v1680_v35 }
 0x410   :  { %v1637_v30 = vrot.slane %v1636_v51, 4  ;;  %v1648_v59 = vadd.f32 %v1647_v21, %v1646_v54  ;;  %v1707_v12 = vadd.f32 %v1703_v18, %v5038_v50  ;;  %v1517_v21 = vadd.f32 %v1516_v45, %v1475_v48 }
 0x411   :  { %v1755_v17 = vpop.permute.xlu0 %1754  ;;  %v1529_v47 = vadd.f32 %v1528_v5, %v1487_v38  ;;  %v1693_v25 = vrot.slane %v1692_v33, 2  ;;  %v1611_v54 = vrot.slane %v1610_v8, 1 }
 0x412   :  { %v1638_v26 = vadd.f32 %v1637_v30, %v1636_v51  ;;  %v5128_v44 = vadd.f32 %v1755_v17, %v1749_v23  ;;  %v1753_v41 = vpop.permute.xlu1 %1752  ;;  %v1649_v0 = vrot.slane %v1648_v59, 4  ;;  %v1600_v17 = vadd.f32 %v1599_v39, %v1598_v27 }
 0x413   :  { %v5130_v9 = vadd.f32 %v1753_v41, %v1748_v58  ;;  %v1570_v58 = vadd.f32 %v1569_v46, %v1568_v19  ;;  %v1559_v18 = vadd.f32 %v1558_v10, %v1517_v21  ;;  %v5150_v45 = vadd.f32 %v1693_v25, %v1692_v33 }
 0x414   :  { %v1639_v63 = vrot.slane %v1638_v26, 2  ;;  %v1771_v49 = vmul.f32 %v5128_v44, %v5128_v44  ;;  %v1650_v7 = vadd.f32 %v1649_v0, %v1648_v59  ;;  %v1761_v24 = vsel %vm1421_vm3, %v5128_v44, 0.0 }
 0x415   :  { %v1770_v22 = vmul.f32 %v5130_v9, %v5130_v9  ;;  %v1829_v36 = vpop.permute.xlu0 %1828  ;;  %v1760_v34 = vsel %vm1421_vm3, %v5130_v9, 0.0  ;;  %v1706_v59 = vadd.f32 %v1701_v29, %v5046_v60  ;;  %v1571_v2 = vadd.f32 %v1570_v58, %v1529_v47 }
 0x416   :  { %v1827_v52 = vpop.permute.xlu1 %1826  ;;  %v1640_v51 = vadd.f32 %v1639_v63, %v1638_v26  ;;  %v1773_v3 = vsel %vm1421_vm3, %v1771_v49, 0.0  ;;  %v1651_v43 = vrot.slane %v1650_v7, 2  ;;  %v1762_v23 = vadd.f32 %v1761_v24, %v1760_v34 }
 0x417   :  { %v1772_v32 = vsel %vm1421_vm3, %v1770_v22, 0.0  ;;  %v1683_v26 = vrot.slane %v1682_v42, 1  ;;  %v1612_v0 = vadd.f32 %v1611_v54, %v1610_v8  ;;  %v1601_v39 = vadd.f32 %v1600_v17, %v1559_v18 }
 0x418   :  { %v1641_v35 = vrot.slane %v1640_v51, 1  ;;  %v1774_v61 = vadd.f32 %v1773_v3, %v1772_v32  ;;  %v1652_v5 = vadd.f32 %v1651_v43, %v1650_v7  ;;  %v1763_v40 = vrot.slane %v1762_v23, 4 }
 0x419   :  { %v1713_v19 = vpop.permute.xlu0 %1712  ;;  %v1613_v10 = vadd.f32 %v1612_v0, %v1571_v2  ;;  %v1684_v34 = vadd.f32 %v1683_v26, %v1682_v42  ;;  %v1833_v3 = vadd.f32 %v1829_v36, %v5054_v28  ;;  %v1832_v8 = vadd.f32 %v1827_v52, %v5084_v62 }
 0x41a   :  { %v5144_v30 = vadd.f32 %v1713_v19, %v1707_v12  ;;  %v1711_v37 = vpop.permute.xlu1 %1710  ;;  %v1642_v48 = vadd.f32 %v1641_v35, %v1640_v51  ;;  %v1775_v38 = vrot.slane %v1774_v61, 4  ;;  %v1695_v12 = vrot.slane %v5150_v45, 1 }
 0x41b   :  { %v5146_v50 = vadd.f32 %v1711_v37, %v1706_v59  ;;  %v1653_v32 = vrot.slane %v1652_v5, 1  ;;  %v1764_v21 = vadd.f32 %v1763_v40, %v1762_v23 }
 0x41c   :  { %v1719_v41 = vsel %vm1421_vm3, %v5144_v30, 0.0  ;;  %v1729_v60 = vmul.f32 %v5144_v30, %v5144_v30  ;;  %v1643_v59 = vadd.f32 %v1642_v48, %v1601_v39  ;;  %v1776_v19 = vadd.f32 %v1775_v38, %v1774_v61 }
 0x41d   :  { %v1718_v29 = vsel %vm1421_vm3, %v5146_v50, 0.0  ;;  %v1728_v27 = vmul.f32 %v5146_v50, %v5146_v50  ;;  %v1787_v46 = vpop.permute.xlu0 %1786 }
 0x41e   :  { %v1720_v63 = vadd.f32 %v1719_v41, %v1718_v29  ;;  %v1785_v49 = vpop.permute.xlu1 %1784  ;;  %v1731_v33 = vsel %vm1421_vm3, %v1729_v60, 0.0  ;;  %v1791_v17 = vadd.f32 %v1787_v46, %v5050_v15 }
 0x41f   :  { %v1730_v22 = vsel %vm1421_vm3, %v1728_v27, 0.0  ;;  %v1790_v28 = vadd.f32 %v1785_v49, %v5058_v57  ;;  %v1765_v57 = vrot.slane %v1764_v21, 2  ;;  %v1654_v27 = vadd.f32 %v1653_v32, %v1652_v5 }
 0x420   :  { %v1721_v58 = vrot.slane %v1720_v63, 4  ;;  %v1732_v24 = vadd.f32 %v1731_v33, %v1730_v22  ;;  %v1777_v22 = vrot.slane %v1776_v19, 2  ;;  %v1696_v32 = vadd.f32 %v1695_v12, %v5150_v45 }
 0x421   :  { %v1839_v7 = vpop.permute.xlu0 %1838 }
 0x422   :  { %v1722_v51 = vadd.f32 %v1721_v58, %v1720_v63  ;;  %v1733_v47 = vrot.slane %v1732_v24, 4  ;;  %v1837_v25 = vpop.permute.xlu1 %1836  ;;  %v5163_v54 = vadd.f32 %v1839_v7, %v1833_v3 }
 0x423   :  { %v5165_v43 = vadd.f32 %v1837_v25, %v1832_v8 }
 0x424   :  { %v1723_v37 = vrot.slane %v1722_v51, 2  ;;  %v1734_v42 = vadd.f32 %v1733_v47, %v1732_v24  ;;  %v1845_v62 = vsel %vm1421_vm3, %v5163_v54, 0.0  ;;  %v1855_v36 = vmul.f32 %v5163_v54, %v5163_v54 }
 0x425   :  { %v1844_v52 = vsel %vm1421_vm3, %v5165_v43, 0.0  ;;  %v1854_v23 = vmul.f32 %v5165_v43, %v5165_v43  ;;  %v1797_v35 = vpop.permute.xlu0 %1796 }
 0x426   :  { %v1724_v61 = vadd.f32 %v1723_v37, %v1722_v51  ;;  %v1735_v18 = vrot.slane %v1734_v42, 2  ;;  %v1846_v2 = vadd.f32 %v1845_v62, %v1844_v52  ;;  %v5177_v26 = vadd.f32 %v1797_v35, %v1791_v17  ;;  %v1795_v15 = vpop.permute.xlu1 %1794 }
 0x427   :  { %v1857_v41 = vsel %vm1421_vm3, %v1855_v36, 0.0  ;;  %v1856_v60 = vsel %vm1421_vm3, %v1854_v23, 0.0  ;;  %v5181_v29 = vadd.f32 %v1795_v15, %v1790_v28  ;;  %v1766_v51 = vadd.f32 %v1765_v57, %v1764_v21 }
 0x428   :  { %v1736_v46 = vadd.f32 %v1735_v18, %v1734_v42  ;;  %v1847_v0 = vrot.slane %v1846_v2, 4  ;;  %v1858_v40 = vadd.f32 %v1857_v41, %v1856_v60  ;;  %v1803_v63 = vsel %vm1421_vm3, %v5177_v26, 0.0 }
 0x429   :  { %v1813_v49 = vmul.f32 %v5177_v26, %v5177_v26  ;;  %v1802_v48 = vsel %vm1421_vm3, %v5181_v29, 0.0  ;;  %v1812_v38 = vmul.f32 %v5181_v29, %v5181_v29  ;;  %v1871_v33 = vpop.permute.xlu0 %1870  ;;  %v1725_v39 = vrot.slane %v1724_v61, 1 }
 0x42a   :  { %v1848_v58 = vadd.f32 %v1847_v0, %v1846_v2  ;;  %v1859_v5 = vrot.slane %v1858_v40, 4  ;;  %v1804_v3 = vadd.f32 %v1803_v63, %v1802_v48  ;;  %v5194_v7 = vadd.f32 %v1871_v33, %v5094_v6  ;;  %v1869_v37 = vpop.permute.xlu1 %1868 }
 0x42b   :  { %v1815_v24 = vsel %vm1421_vm3, %v1813_v49, 0.0  ;;  %v1814_v8 = vsel %vm1421_vm3, %v1812_v38, 0.0  ;;  %v1737_v47 = vrot.slane %v1736_v46, 1  ;;  %v1685_v42 = vadd.f32 %v1684_v34, %v1643_v59 }
 0x42c   :  { %v1860_v25 = vadd.f32 %v1859_v5, %v1858_v40  ;;  %v1805_v17 = vrot.slane %v1804_v3, 4  ;;  %v1816_v28 = vadd.f32 %v1815_v24, %v1814_v8  ;;  %v1887_v62 = vmul.f32 %v5194_v7, %v5194_v7 }
 0x42d   :  { %v1655_v36 = vadd.f32 %v1654_v27, %v1613_v10  ;;  %v1778_v52 = vadd.f32 %v1777_v22, %v1776_v19  ;;  %v1726_v23 = vadd.f32 %v1725_v39, %v1724_v61  ;;  %v1849_v35 = vrot.slane %v1848_v58, 2 }
 0x42e   :  { %v1806_v18 = vadd.f32 %v1805_v17, %v1804_v3  ;;  %v1817_v2 = vrot.slane %v1816_v28, 4  ;;  %v1877_v6 = vsel %vm1421_vm3, %v5194_v7, 0.0  ;;  %v5202_v45 = vadd.f32 %v1869_v37, %v5102_v1 }
 0x42f   :  { %v1767_v12 = vrot.slane %v1766_v51, 1  ;;  %v1738_v21 = vadd.f32 %v1737_v47, %v1736_v46  ;;  %v1861_v34 = vrot.slane %v1860_v25, 2  ;;  %v1889_v59 = vsel %vm1421_vm3, %v1887_v62, 0.0 }
 0x430   :  { %v1807_v15 = vrot.slane %v1806_v18, 2  ;;  %v1818_v57 = vadd.f32 %v1817_v2, %v1816_v28  ;;  %v1876_v10 = vsel %vm1421_vm3, %v5202_v45, 0.0  ;;  %v1886_v19 = vmul.f32 %v5202_v45, %v5202_v45 }
 0x431   :  { %v1779_v61 = vrot.slane %v1778_v52, 1  ;;  %v1697_v41 = vadd.f32 %v1696_v32, %v1655_v36  ;;  %v1850_v60 = vadd.f32 %v1849_v35, %v1848_v58  ;;  %v1878_v27 = vadd.f32 %v1877_v6, %v1876_v10 }
 0x432   :  { %v1727_v0 = vadd.f32 %v1726_v23, %v1685_v42  ;;  %v1808_v1 = vadd.f32 %v1807_v15, %v1806_v18  ;;  %v1819_v40 = vrot.slane %v1818_v57, 2  ;;  %v1888_v46 = vsel %vm1421_vm3, %v1886_v19, 0.0 }
 0x433   :  { %v1862_v63 = vadd.f32 %v1861_v34, %v1860_v25  ;;  %v1879_v49 = vrot.slane %v1878_v27, 4  ;;  %v1890_v48 = vadd.f32 %v1889_v59, %v1888_v46  ;;  %v1768_v38 = vadd.f32 %v1767_v12, %v1766_v51 }
 0x434   :  { %v1739_v33 = vadd.f32 %v1738_v21, %v1697_v41  ;;  %v1809_v22 = vrot.slane %v1808_v1, 1  ;;  %v1820_v39 = vadd.f32 %v1819_v40, %v1818_v57  ;;  %v1851_v5 = vrot.slane %v1850_v60, 1 }
 0x435   :  { %v1880_v24 = vadd.f32 %v1879_v49, %v1878_v27  ;;  %v1891_v3 = vrot.slane %v1890_v48, 4  ;;  %v1780_v8 = vadd.f32 %v1779_v61, %v1778_v52  ;;  %v1769_v47 = vadd.f32 %v1768_v38, %v1727_v0  ;;  %v1902_v0 = vld [vmem:[%s5801_s2 + $0x11b] sm:$0x1] }
 0x436   :  { %v1810_v32 = vadd.f32 %v1809_v22, %v1808_v1  ;;  %v1821_v58 = vrot.slane %v1820_v39, 1  ;;  %v1863_v37 = vrot.slane %v1862_v63, 1  ;;  %v1852_v25 = vadd.f32 %v1851_v5, %v1850_v60  ;;  %v1952_v5 = vld [vmem:[%s5801_s2 + $0x18] sm:$0xff] }
 0x437   :  { %v1881_v42 = vrot.slane %v1880_v24, 2  ;;  %v1892_v17 = vadd.f32 %v1891_v3, %v1890_v48  ;;  %v1781_v28 = vadd.f32 %v1780_v8, %v1739_v33  ;;  %v1910_v48 = vld [vmem:[%s5801_s2 + $0x11c] sm:$0x1]  ;;  %v1943_v3 = vld [vmem:[%s5801_s2] sm:$0xff]  ;;  %v1944_v8 = vld [vmem:[%s5801_s2 + $0x8] sm:$0xff] }
 0x438   :  { %v1811_v62 = vadd.f32 %v1810_v32, %v1769_v47  ;;  %v1822_v36 = vadd.f32 %v1821_v58, %v1820_v39  ;;  %v1864_v18 = vadd.f32 %v1863_v37, %v1862_v63  ;;  %v1951_v39 = vld [vmem:[%s5801_s2 + $0x10] sm:$0xff]  ;;  %v5235_v47 = vpack.c.bf16 %v1944_v8, %v1943_v3 }
 0x439   :  { %v1882_v23 = vadd.f32 %v1881_v42, %v1880_v24  ;;  %v1893_v35 = vrot.slane %v1892_v17, 2  ;;  %v4323_v24 = vpack.c.bf16 %v1952_v5, %v1951_v39 }
 0x43a   :  { %v1823_v51 = vadd.f32 %v1822_v36, %v1781_v28  ;;  %v1853_v2 = vadd.f32 %v1852_v25, %v1811_v62 }
 0x43b   :  { %v1883_v6 = vrot.slane %v1882_v23, 1  ;;  %v1894_v12 = vadd.f32 %v1893_v35, %v1892_v17  ;;  %4324 = vmatprep.subr.bf16.mxu1 %v4323_v24 }
 0x43c   :  { %v1865_v21 = vadd.f32 %v1864_v18, %v1823_v51  ;;  %4326 = vmatpush3.bf16.msra.mxu1 %v4323_v24 }
 0x43d   :  { %v1884_v34 = vadd.f32 %v1883_v6, %v1882_v23  ;;  %v1895_v52 = vrot.slane %v1894_v12, 1  ;;  %4328 = vmatprep.subr.bf16.mxu1 %v5235_v47 }
 0x43f   :  { %v1885_v59 = vadd.f32 %v1884_v34, %v1853_v2  ;;  %v1896_v15 = vadd.f32 %v1895_v52, %v1894_v12 }
 0x441   :  { %v1897_v57 = vadd.f32 %v1896_v15, %v1865_v21  ;;  %v1898_v10 = vmul.f32 0.0052083335, %v1885_v59  ;;  %v5818_v59 = vld [vmem:[#allocation6_spill] sm:$0xff] }
 0x443   :  { %v1899_v19 = vmul.f32 0.0052083335, %v1897_v57  ;;  %v1900_v61 = vmul.f32 %v1898_v10, %v1898_v10 }
 0x445   :  { %v1901_v41 = vsub.f32 %v1899_v19, %v1900_v61  ;;  %v5819_v19 = vld [vmem:[#allocation9_spill] sm:$0xff] }
 0x447   :  { %v1903_v27 = vadd.f32 1e-05, %v1901_v41  ;;  %v5820_v41 = vld [vmem:[#allocation10_spill] sm:$0xff] }
 0x449   :  { %4485 = vrsqrt.f32 %v1903_v27 }
 0x453   :  { %v4486_v60 = vpop.eup %4485 }
 0x454   :  { %1906 = vrot.lane.b32.xlu1 %v4486_v60, %s4521_s30 }
 0x4c6   :  { %v1907_v1 = vpop.permute.xlu1 %1906 }
 0x4c7   :  { %v1909_v40 = vmul.f32 %v1907_v1, %v1902_v0 }
 0x4c9   :  { %1912 = vrot.lane.b32.xlu0 %v1909_v40, %s4526_s8  ;;  %v1924_v46 = vrot.slane %v1909_v40, %v4586_v13  ;;  %v5821_v40 = vld [vmem:[#allocation7_spill] sm:$0xff] }
 0x4cd   :  { %1926 = vrot.lane.b32.xlu0 %v1924_v46, %s4526_s8 }
 0x53b   :  { %v1913_v63 = vpop.permute.xlu0 %1912 }
 0x53c   :  { %v1915_v49 = vmul.f32 %v1913_v63, %v1898_v10  ;;  %v5822_v63 = vld [vmem:[#allocation8_spill] sm:$0xff] }
 0x53e   :  { %1917 = vrot.lane.b32.xlu1 %v1915_v49, %s4521_s30 }
 0x53f   :  { %v5238_v32 = vpop.permute.xlu0 %1926 }
 0x540   :  { %v1946_v58 = vmul.f32 %v5238_v32, %v4984_v56  ;;  %v1945_v37 = vmul.f32 %v5238_v32, %v4986_v14  ;;  %v1930_v62 = vmul.f32 %v5238_v32, %v4958_v20  ;;  %v1929_v36 = vmul.f32 %v5238_v32, %v4960_v31 }
 0x541   :  { %v2124_v14 = vmul.f32 %v5238_v32, %v4980_v55  ;;  %v2123_v51 = vmul.f32 %v5238_v32, %v4982_v11  ;;  %v2219_v6 = vmul.f32 %v5238_v32, %v5060_v4  ;;  %v2218_v12 = vmul.f32 %v5238_v32, %v5062_v16 }
 0x542   :  { %v2314_v52 = vmul.f32 %v5238_v32, %v5040_v53  ;;  %v2313_v15 = vmul.f32 %v5238_v32, %v5818_v59  ;;  %v2409_v61 = vmul.f32 %v5238_v32, %v5819_v19  ;;  %v2408_v27 = vmul.f32 %v5238_v32, %v5820_v41  ;;  %v2415_v41 = vld [vmem:[%s5801_s2 + $0x58] sm:$0xff] }
 0x543   :  { %v2504_v46 = vmul.f32 %v5238_v32, %v5821_v40  ;;  %v2503_v49 = vmul.f32 %v5238_v32, %v5822_v63  ;;  %v2599_v39 = vmul.f32 %v5238_v32, %v5144_v30  ;;  %v2598_v5 = vmul.f32 %v5238_v32, %v5146_v50 }
 0x5b0   :  { %v1918_v38 = vpop.permute.xlu1 %1917 }
 0x5b1   :  { %v1920_v33 = vsub.f32 %v1910_v48, %v1918_v38 }
 0x5b3   :  { %v1934_v22 = vrot.slane %v1920_v33, %v4586_v13 }
 0x5b5   :  { %1936 = vrot.lane.b32.xlu1 %v1934_v22, %s4526_s8 }
 0x627   :  { %v5244_v42 = vpop.permute.xlu1 %1936 }
 0x628   :  { %v1948_v17 = vadd.f32 %v1946_v58, %v5244_v42  ;;  %v1947_v28 = vadd.f32 %v1945_v37, %v5244_v42  ;;  %v1940_v35 = vadd.f32 %v5244_v42, %v1930_v62  ;;  %v1939_v56 = vadd.f32 %v5244_v42, %v1929_v36 }
 0x629   :  { %v2126_v31 = vadd.f32 %v2124_v14, %v5244_v42  ;;  %v2125_v2 = vadd.f32 %v2123_v51, %v5244_v42  ;;  %v2221_v11 = vadd.f32 %v2219_v6, %v5244_v42  ;;  %v2220_v34 = vadd.f32 %v2218_v12, %v5244_v42 }
 0x62a   :  { %v1950_v25 = vmax.f32 %v1948_v17, 0.0  ;;  %v1949_v23 = vmax.f32 %v1947_v28, 0.0  ;;  %v1942_v20 = vmax.f32 %v1940_v35, 0.0  ;;  %v1941_v18 = vmax.f32 %v1939_v56, 0.0 }
 0x62b   :  { %v2128_v55 = vmax.f32 %v2126_v31, 0.0  ;;  %v2127_v21 = vmax.f32 %v2125_v2, 0.0  ;;  %v2223_v4 = vmax.f32 %v2221_v11, 0.0  ;;  %v2222_v57 = vmax.f32 %v2220_v34, 0.0  ;;  %v2224_v34 = vld [vmem:[%s5801_s2 + $0x30] sm:$0xff] }
 0x62c   :  { %1957 = vrot.lane.b32.xlu1 %v1950_v25, %s4521_s30  ;;  %1955 = vrot.lane.b32.xlu0 %v1949_v23, %s4521_s30  ;;  %v2316_v16 = vadd.f32 %v2314_v52, %v5244_v42  ;;  %v2315_v10 = vadd.f32 %v2313_v15, %v5244_v42  ;;  %v2411_v0 = vadd.f32 %v2409_v61, %v5244_v42  ;;  %v2225_v52 = vld [vmem:[%s5801_s2 + $0x38] sm:$0xff]  ;;  %v2414_v61 = vld [vmem:[%s5801_s2 + $0x50] sm:$0xff] }
 0x62d   :  { %v2410_v1 = vadd.f32 %v2408_v27, %v5244_v42  ;;  %v2506_v33 = vadd.f32 %v2504_v46, %v5244_v42  ;;  %v2505_v22 = vadd.f32 %v2503_v49, %v5244_v42  ;;  %v2601_v8 = vadd.f32 %v2599_v39, %v5244_v42  ;;  %v2604_v49 = vld [vmem:[%s5801_s2 + $0x70] sm:$0xff]  ;;  %v2699_v39 = vld [vmem:[%s5801_s2 + $0x80] sm:$0xff] }
 0x62e   :  { %v2318_v53 = vmax.f32 %v2316_v16, 0.0  ;;  %v2317_v60 = vmax.f32 %v2315_v10, 0.0  ;;  %v2413_v48 = vmax.f32 %v2411_v0, 0.0  ;;  %v2600_v58 = vadd.f32 %v2598_v5, %v5244_v42  ;;  %v2509_v0 = vld [vmem:[%s5801_s2 + $0x60] sm:$0xff]  ;;  %v2700_v5 = vld [vmem:[%s5801_s2 + $0x88] sm:$0xff] }
 0x62f   :  { %v2412_v38 = vmax.f32 %v2410_v1, 0.0  ;;  %v2508_v24 = vmax.f32 %v2506_v33, 0.0  ;;  %v2507_v3 = vmax.f32 %v2505_v22, 0.0  ;;  %v2694_v37 = vmul.f32 %v5238_v32, %v5128_v44  ;;  %v2510_v1 = vld [vmem:[%s5801_s2 + $0x68] sm:$0xff] }
 0x630   :  { %2042 = vrot.lane.b32.xlu1 %v1942_v20, %s4521_s30  ;;  %2040 = vrot.lane.b32.xlu0 %v1941_v18, %s4521_s30  ;;  %v2693_v17 = vmul.f32 %v5238_v32, %v5130_v9  ;;  %v2603_v30 = vmax.f32 %v2601_v8, 0.0  ;;  %v2602_v28 = vmax.f32 %v2600_v58, 0.0  ;;  %v2789_v36 = vmul.f32 %v5238_v32, %v5177_v26  ;;  %v2794_v58 = vld [vmem:[%s5801_s2 + $0x90] sm:$0xff] }
 0x631   :  { %v2696_v50 = vadd.f32 %v2694_v37, %v5244_v42  ;;  %v2788_v25 = vmul.f32 %v5238_v32, %v5181_v29  ;;  %v2884_v56 = vmul.f32 %v5238_v32, %v5163_v54  ;;  %v2883_v14 = vmul.f32 %v5238_v32, %v5165_v43  ;;  %v2795_v37 = vld [vmem:[%s5801_s2 + $0x98] sm:$0xff] }
 0x632   :  { %v2695_v62 = vadd.f32 %v2693_v17, %v5244_v42  ;;  %v2791_v9 = vadd.f32 %v2789_v36, %v5244_v42  ;;  %v2979_v18 = vmul.f32 %v5238_v32, %v5194_v7  ;;  %v2978_v31 = vmul.f32 %v5238_v32, %v5202_v45  ;;  %v2129_v7 = vld [vmem:[%s5801_s2 + $0x20] sm:$0xff]  ;;  %v2130_v45 = vld [vmem:[%s5801_s2 + $0x28] sm:$0xff] }
 0x633   :  { %v2698_v44 = vmax.f32 %v2696_v50, 0.0  ;;  %v2790_v35 = vadd.f32 %v2788_v25, %v5244_v42  ;;  %v2886_v29 = vadd.f32 %v2884_v56, %v5244_v42  ;;  %v2885_v20 = vadd.f32 %v2883_v14, %v5244_v42  ;;  %v2889_v50 = vld [vmem:[%s5801_s2 + $0xa0] sm:$0xff] }
 0x634   :  { %2135 = vrot.lane.b32.xlu1 %v2128_v55, %s4521_s30  ;;  %2133 = vrot.lane.b32.xlu0 %v2127_v21, %s4521_s30  ;;  %v2697_v23 = vmax.f32 %v2695_v62, 0.0  ;;  %v2793_v26 = vmax.f32 %v2791_v9, 0.0  ;;  %v2981_v43 = vadd.f32 %v2979_v18, %v5244_v42  ;;  %v2980_v6 = vadd.f32 %v2978_v31, %v5244_v42  ;;  %v2890_v62 = vld [vmem:[%s5801_s2 + $0xa8] sm:$0xff]  ;;  %v2985_v9 = vld [vmem:[%s5801_s2 + $0xb8] sm:$0xff] }
 0x635   :  { %v2792_v51 = vmax.f32 %v2790_v35, 0.0  ;;  %v2888_v54 = vmax.f32 %v2886_v29, 0.0  ;;  %v2887_v2 = vmax.f32 %v2885_v20, 0.0  ;;  %v4331_v21 = vpack.c.bf16 %v2130_v45, %v2129_v7  ;;  %v3122_v20 = vld [vmem:[%s5800_s1 + $0x48] sm:$0xff]  ;;  %v3124_v18 = vld [vmem:[%s5800_s1 + $0x58] sm:$0xff]  ;;  %v3125_v7 = vld [vmem:[%s5800_s1 + $0x60] sm:$0xff] }
 0x636   :  { %v2983_v12 = vmax.f32 %v2981_v43, 0.0  ;;  %v2982_v55 = vmax.f32 %v2980_v6, 0.0  ;;  %v4335_v59 = vpack.c.bf16 %v2225_v52, %v2224_v34  ;;  %v4343_v27 = vpack.c.bf16 %v2415_v41, %v2414_v61  ;;  %v3126_v6 = vld [vmem:[%s5800_s1 + $0x68] sm:$0xff]  ;;  %v3127_v45 = vld [vmem:[%s5800_s1 + $0x70] sm:$0xff]  ;;  %v5479_v61 = vld [vmem:[%s5801_s2 + $0x120] sm:$0xff] }
 0x637   :  { %v4347_v40 = vpack.c.bf16 %v2510_v1, %v2509_v0  ;;  %v4359_v17 = vpack.c.bf16 %v2795_v37, %v2794_v58  ;;  %v4363_v36 = vpack.c.bf16 %v2890_v62, %v2889_v50  ;;  %v4371_v31 = vpack.c.bf16 %v3124_v18, %v3122_v20  ;;  %v3131_v52 = vld [vmem:[%s5800_s1 + $0x90] sm:$0xff] }
 0x638   :  { %2230 = vrot.lane.b32.xlu1 %v2223_v4, %s4521_s30  ;;  %2228 = vrot.lane.b32.xlu0 %v2222_v57, %s4521_s30  ;;  %v2320_v57 = vld [vmem:[%s5801_s2 + $0x48] sm:$0xff]  ;;  %v4527_v41 = vmov 0  }
 0x639   :  { %4372 = vmatprep.subr.bf16.mxu0 %v4371_v31  ;;  %4476 = vset.pattern.permute.xlu1 %v4527_v41 }
 0x63a   :  { %4475 = vset.pattern.permute.xlu0 %v4527_v41 }
 0x63c   :  { %2325 = vrot.lane.b32.xlu1 %v2318_v53, %s4521_s30  ;;  %2323 = vrot.lane.b32.xlu0 %v2317_v60, %s4521_s30 }
 0x640   :  { %2420 = vrot.lane.b32.xlu1 %v2413_v48, %s4521_s30  ;;  %2418 = vrot.lane.b32.xlu0 %v2412_v38, %s4521_s30  ;;  %v2605_v48 = vld [vmem:[%s5801_s2 + $0x78] sm:$0xff] }
 0x641   :  { %v4351_v38 = vpack.c.bf16 %v2605_v48, %v2604_v49 }
 0x644   :  { %2515 = vrot.lane.b32.xlu1 %v2508_v24, %s4521_s30  ;;  %2513 = vrot.lane.b32.xlu0 %v2507_v3, %s4521_s30  ;;  %v4355_v24 = vpack.c.bf16 %v2700_v5, %v2699_v39 }
 0x648   :  { %2610 = vrot.lane.b32.xlu1 %v2603_v30, %s4521_s30  ;;  %2608 = vrot.lane.b32.xlu0 %v2602_v28, %s4521_s30 }
 0x64c   :  { %2705 = vrot.lane.b32.xlu1 %v2698_v44, %s4521_s30  ;;  %2703 = vrot.lane.b32.xlu0 %v2697_v23, %s4521_s30  ;;  %v2984_v23 = vld [vmem:[%s5801_s2 + $0xb0] sm:$0xff] }
 0x64d   :  { %v4367_v35 = vpack.c.bf16 %v2985_v9, %v2984_v23  ;;  %v3098_v23 = vld [vmem:[%s5801_s2 + $0x110] sm:$0x1] }
 0x650   :  { %2800 = vrot.lane.b32.xlu1 %v2793_v26, %s4521_s30  ;;  %2798 = vrot.lane.b32.xlu0 %v2792_v51, %s4521_s30 }
 0x654   :  { %2895 = vrot.lane.b32.xlu1 %v2888_v54, %s4521_s30  ;;  %2893 = vrot.lane.b32.xlu0 %v2887_v2, %s4521_s30  ;;  %v3121_v54 = vld [vmem:[%s5800_s1 + $0x40] sm:$0xff]  ;;  %v3123_v2 = vld [vmem:[%s5800_s1 + $0x50] sm:$0xff] }
 0x655   :  { %v4373_v43 = vpack.c.bf16 %v3123_v2, %v3121_v54 }
 0x657   :  { %4374 = vmatpush1.bf16.msra.mxu0 %v4373_v43  ;;  %v5823_v43 = vmov 0.0  }
 0x658   :  { %2990 = vrot.lane.b32.xlu1 %v2983_v12, %s4521_s30  ;;  %2988 = vrot.lane.b32.xlu0 %v2982_v55, %s4521_s30  ;;  %v3128_v12 = vld [vmem:[%s5800_s1 + $0x78] sm:$0xff] }
 0x659   :  { %v4375_v55 = vpack.c.bf16 %v3128_v12, %v3126_v6 }
 0x65b   :  { %4376 = vmatprep.subr.bf16.mxu0 %v4375_v55 }
 0x65c   :  { %3229 = vperm.xlu0 %4475, %v5479_v61  }
 0x69e   :  { %v1958_v32 = vpop.permute.xlu1 %1957  ;;  %v1956_v42 = vpop.permute.xlu0 %1955 }
 0x69f   :  { %4172 = vmatprep.mubr.msk.f32.mxu1 %vm277_vm2, %v1956_v42  ;;  %v3130_v42 = vld [vmem:[%s5800_s1 + $0x88] sm:$0xff] }
 0x6a0   :  { %4173 = vmatmul.mubr.msk.f32.vlgmr.msra.gmra.mrb[12].mxu1 %vm277_vm2, %v1958_v32  ;;  %v4377_v32 = vpack.c.bf16 %v3127_v45, %v3125_v7 }
 0x6a1   :  { %4330 = vmatpush3.bf16.msra.mxu1 %v5235_v47  ;;  %v2319_v47 = vld [vmem:[%s5801_s2 + $0x40] sm:$0xff] }
 0x6a2   :  { %v2041_v11 = vpop.permute.xlu0 %2040  ;;  %4332 = vmatprep.subr.bf16.mxu1 %v4331_v21  ;;  %v2043_v15 = vpop.permute.xlu1 %2042  ;;  %v4339_v16 = vpack.c.bf16 %v2320_v57, %v2319_v47  ;;  %4378 = vmatpush1.bf16.msra.mxu0 %v4377_v32  ;;  %v3133_v57 = vld [vmem:[%s5800_s1 + $0xa0] sm:$0xff]  ;;  %v5824_v32 = vld [vmem:[#allocation5_spill] sm:$0xff] }
 0x6a3   :  { %4179 = vmatprep.mubr.msk.f32.mxu1 %vm277_vm2, %v2041_v11  ;;  %v3129_v11 = vld [vmem:[%s5800_s1 + $0x80] sm:$0xff]  ;;  %vm3224_vm4 = vcmp.lt.s32.totalorder %v5824_v32, 1  ;;  %vm3251_vm5 = vcmp.lt.s32.totalorder %v5824_v32, 7  ;;  %vm3445_vm7 = vcmp.lt.s32.totalorder %v5824_v32, 2  ;;  %vm3470_vm8 = vcmp.lt.s32.totalorder %v5824_v32, 6 }
 0x6a6   :  { %v2134_v4 = vpop.permute.xlu0 %2133  ;;  %v2136_v10 = vpop.permute.xlu1 %2135 }
 0x6a8   :  { %4180 = vmatmul.mubr.msk.f32.vlgmr.msra.gmra.mrb[12].mxu1 %vm277_vm2, %v2043_v15  ;;  %v3136_v15 = vld [vmem:[%s5800_s1 + $0xb8] sm:$0xff] }
 0x6a9   :  { %4334 = vmatpush3.bf16.msra.mxu1 %v4331_v21  ;;  %4186 = vmatprep.mubr.msk.f32.mxu1 %vm277_vm2, %v2134_v4  ;;  %v3132_v21 = vld [vmem:[%s5800_s1 + $0x98] sm:$0xff]  ;;  %v4381_v4 = vpack.c.bf16 %v3131_v52, %v3129_v11 }
 0x6aa   :  { %4336 = vmatprep.subr.bf16.mxu1 %v4335_v59  ;;  %v2229_v19 = vpop.permute.xlu0 %2228  ;;  %v2231_v53 = vpop.permute.xlu1 %2230  ;;  %v4379_v34 = vpack.c.bf16 %v3132_v21, %v3130_v42 }
 0x6ac   :  { %4380 = vmatprep.subr.bf16.mxu0 %v4379_v34 }
 0x6ad   :  { %4382 = vmatpush1.bf16.msra.mxu0 %v4381_v4 }
 0x6ae   :  { %v2324_v60 = vpop.permute.xlu0 %2323  ;;  %v2326_v46 = vpop.permute.xlu1 %2325 }
 0x6b0   :  { %4187 = vmatmul.mubr.msk.f32.vlgmr.msra.gmra.mrb[12].mxu1 %vm277_vm2, %v2136_v10 }
 0x6b1   :  { %4338 = vmatpush3.bf16.msra.mxu1 %v4335_v59  ;;  %4193 = vmatprep.mubr.msk.f32.mxu1 %vm277_vm2, %v2229_v19  ;;  %v3134_v59 = vld [vmem:[%s5800_s1 + $0xa8] sm:$0xff] }
 0x6b2   :  { %4340 = vmatprep.subr.bf16.mxu1 %v4339_v16  ;;  %v2419_v63 = vpop.permute.xlu0 %2418  ;;  %v2421_v33 = vpop.permute.xlu1 %2420  ;;  %v4383_v47 = vpack.c.bf16 %v3136_v15, %v3134_v59  ;;  %v5474_v19 = vld [vmem:[%s5801_s2 + $0x128] sm:$0xff] }
 0x6b3   :  { %3234 = vperm.xlu1 %4476, %v5474_v19  }
 0x6b4   :  { %4384 = vmatprep.subr.bf16.mxu0 %v4383_v47 }
 0x6b6   :  { %v2514_v22 = vpop.permute.xlu0 %2513  ;;  %v2516_v3 = vpop.permute.xlu1 %2515 }
 0x6b8   :  { %4194 = vmatmul.mubr.msk.f32.vlgmr.msra.gmra.mrb[12].mxu1 %vm277_vm2, %v2231_v53 }
 0x6b9   :  { %4342 = vmatpush3.bf16.msra.mxu1 %v4339_v16  ;;  %4200 = vmatprep.mubr.msk.f32.mxu1 %vm277_vm2, %v2324_v60  ;;  %v3135_v16 = vld [vmem:[%s5800_s1 + $0xb0] sm:$0xff] }
 0x6ba   :  { %4344 = vmatprep.subr.bf16.mxu1 %v4343_v27  ;;  %v2609_v8 = vpop.permute.xlu0 %2608  ;;  %v2611_v30 = vpop.permute.xlu1 %2610  ;;  %v4385_v10 = vpack.c.bf16 %v3135_v16, %v3133_v57 }
 0x6bc   :  { %4386 = vmatpush1.bf16.msra.mxu0 %v4385_v10 }
 0x6be   :  { %v2704_v28 = vpop.permute.xlu0 %2703  ;;  %v2706_v25 = vpop.permute.xlu1 %2705 }
 0x6c0   :  { %4201 = vmatmul.mubr.msk.f32.vlgmr.msra.gmra.mrb[12].mxu1 %vm277_vm2, %v2326_v46 }
 0x6c1   :  { %4346 = vmatpush3.bf16.msra.mxu1 %v4343_v27  ;;  %4207 = vmatprep.mubr.msk.f32.mxu1 %vm277_vm2, %v2419_v63  ;;  %v4528_v27 = vmov 1  }
 0x6c2   :  { %4348 = vmatprep.subr.bf16.mxu1 %v4347_v40  ;;  %v2799_v44 = vpop.permute.xlu0 %2798  ;;  %v2801_v56 = vpop.permute.xlu1 %2800  ;;  %4477 = vset.pattern.permute.xlu1 %v4528_v27 }
 0x6c3   :  { %4478 = vset.pattern.permute.xlu0 %v4528_v27  ;;  %3255 = vperm.xlu1 %4477, %v5479_v61  }
 0x6c4   :  { %3259 = vperm.xlu0 %4478, %v5474_v19  }
 0x6c6   :  { %v2894_v14 = vpop.permute.xlu0 %2893  ;;  %v2896_v26 = vpop.permute.xlu1 %2895 }
 0x6c8   :  { %4208 = vmatmul.mubr.msk.f32.vlgmr.msra.gmra.mrb[12].mxu1 %vm277_vm2, %v2421_v33 }
 0x6c9   :  { %4350 = vmatpush3.bf16.msra.mxu1 %v4347_v40  ;;  %4214 = vmatprep.mubr.msk.f32.mxu1 %vm277_vm2, %v2514_v22 }
 0x6ca   :  { %4352 = vmatprep.subr.bf16.mxu1 %v4351_v38  ;;  %v2989_v51 = vpop.permute.xlu0 %2988  ;;  %v2991_v29 = vpop.permute.xlu1 %2990 }
 0x6d0   :  { %4215 = vmatmul.mubr.msk.f32.vlgmr.msra.gmra.mrb[12].mxu1 %vm277_vm2, %v2516_v3 }
 0x6d1   :  { %4354 = vmatpush3.bf16.msra.mxu1 %v4351_v38  ;;  %4221 = vmatprep.mubr.msk.f32.mxu1 %vm277_vm2, %v2609_v8 }
 0x6d2   :  { %4356 = vmatprep.subr.bf16.mxu1 %v4355_v24 }
 0x6d8   :  { %4222 = vmatmul.mubr.msk.f32.vlgmr.msra.gmra.mrb[12].mxu1 %vm277_vm2, %v2611_v30 }
 0x6d9   :  { %4358 = vmatpush3.bf16.msra.mxu1 %v4355_v24  ;;  %4228 = vmatprep.mubr.msk.f32.mxu1 %vm277_vm2, %v2704_v28 }
 0x6da   :  { %4360 = vmatprep.subr.bf16.mxu1 %v4359_v17 }
 0x6db   :  { %v3230_v47 = vpop.permute.xlu0 %3229 }
 0x6e0   :  { %4229 = vmatmul.mubr.msk.f32.vlgmr.msra.gmra.mrb[12].mxu1 %vm277_vm2, %v2706_v25 }
 0x6e1   :  { %4362 = vmatpush3.bf16.msra.mxu1 %v4359_v17  ;;  %4235 = vmatprep.mubr.msk.f32.mxu1 %vm277_vm2, %v2799_v44 }
 0x6e2   :  { %4364 = vmatprep.subr.bf16.mxu1 %v4363_v36 }
 0x6e8   :  { %4236 = vmatmul.mubr.msk.f32.vlgmr.msra.gmra.mrb[12].mxu1 %vm277_vm2, %v2801_v56  ;;  %v3104_v56 = vld [vmem:[%s5801_s2 + $0x114] sm:$0x1] }
 0x6e9   :  { %4366 = vmatpush3.bf16.msra.mxu1 %v4363_v36  ;;  %4242 = vmatprep.mubr.msk.f32.mxu1 %vm277_vm2, %v2894_v14 }
 0x6ea   :  { %4368 = vmatprep.subr.bf16.mxu1 %v4367_v35 }
 0x6f0   :  { %4243 = vmatmul.mubr.msk.f32.vlgmr.msra.gmra.mrb[12].mxu1 %vm277_vm2, %v2896_v26 }
 0x6f1   :  { %4370 = vmatpush3.bf16.msra.mxu1 %v4367_v35  ;;  %4249 = vmatprep.mubr.msk.f32.mxu1 %vm277_vm2, %v2989_v51 }
 0x6f8   :  { %4250 = vmatmul.mubr.msk.f32.vlgmr.msra.gmra.mrb[12].mxu1 %vm277_vm2, %v2991_v29 }
 0x732   :  { %v3235_v55 = vpop.permute.xlu1 %3234 }
 0x742   :  { %v3256_v59 = vpop.permute.xlu1 %3255 }
 0x7cb   :  { %v4251_v53 = vpop.f32.mrb[12].mxu1 }
 0x7cc   :  { %v3076_v60 = vsel %vm131_vm1, %v4251_v53, 0.0  ;;  %v3087_v0 = vmul.f32 %v4251_v53, %v4251_v53  ;;  %v3062_v1 = vpop.f32.mrb[13].mxu1 }
 0x7cd   :  { %v3075_v40 = vsel %vm131_vm1, %v3062_v1, 0.0  ;;  %v3086_v46 = vmul.f32 %v3062_v1, %v3062_v1 }
 0x7ce   :  { %v3089_v63 = vsel %vm131_vm1, %v3087_v0, 0.0  ;;  %v3077_v49 = vadd.f32 %v3076_v60, %v3075_v40 }
 0x7cf   :  { %v3088_v48 = vsel %vm131_vm1, %v3086_v46, 0.0 }
 0x7d0   :  { %v3078_v38 = vrot.slane %v3077_v49, 4  ;;  %v3090_v33 = vadd.f32 %v3089_v63, %v3088_v48 }
 0x7d2   :  { %v3079_v22 = vadd.f32 %v3078_v38, %v3077_v49  ;;  %v3091_v39 = vrot.slane %v3090_v33, 4 }
 0x7d4   :  { %v3080_v5 = vrot.slane %v3079_v22, 2  ;;  %v3092_v24 = vadd.f32 %v3091_v39, %v3090_v33 }
 0x7d6   :  { %v3081_v3 = vadd.f32 %v3080_v5, %v3079_v22  ;;  %v3093_v8 = vrot.slane %v3092_v24, 2 }
 0x7d8   :  { %v3082_v58 = vrot.slane %v3081_v3, 1  ;;  %v3094_v37 = vadd.f32 %v3093_v8, %v3092_v24 }
 0x7da   :  { %v3083_v17 = vadd.f32 %v3082_v58, %v3081_v3  ;;  %v3095_v30 = vrot.slane %v3094_v37, 1 }
 0x7dc   :  { %v3085_v28 = vmul.f32 0.0625, %v3083_v17  ;;  %v3096_v50 = vadd.f32 %v3095_v30, %v3094_v37 }
 0x7de   :  { %v3097_v62 = vmul.f32 0.0625, %v3096_v50  ;;  %v3099_v36 = vmul.f32 %v3085_v28, %v3085_v28 }
 0x7e0   :  { %v3100_v25 = vsub.f32 %v3097_v62, %v3099_v36 }
 0x7e2   :  { %v3101_v44 = vadd.f32 1e-05, %v3100_v25 }
 0x7e4   :  { %4487 = vrsqrt.f32 %v3101_v44 }
 0x7ee   :  { %v4488_v9 = vpop.eup %4487 }
 0x7ef   :  { %v3103_v35 = vmul.f32 %v4488_v9, %v3098_v23 }
 0x7f1   :  { %v3105_v14 = vmul.f32 %v3103_v35, %v3085_v28  ;;  %v3110_v26 = vrot.slane %v3103_v35, %v4586_v13 }
 0x7f3   :  { %v3106_v51 = vsub.f32 %v3104_v56, %v3105_v14  ;;  %v3111_v29 = vmul.f32 %v3110_v26, %v3062_v1  ;;  %v3112_v20 = vmul.f32 %v4251_v53, %v3110_v26  ;;  %v3260_v53 = vpop.permute.xlu0 %3259 }
 0x7f5   :  { %v3116_v18 = vrot.slane %v3106_v51, %v4586_v13 }
 0x7f7   :  { %v3117_v31 = vadd.f32 %v3116_v18, %v3111_v29  ;;  %v3118_v54 = vadd.f32 %v3116_v18, %v3112_v20  ;;  %v3297_v18 = vld [vmem:[%s5801_s2 + $0x111] sm:$0x1] }
 0x7f9   :  { %v3119_v2 = vmax.f32 %v3117_v31, 0.0  ;;  %v3120_v6 = vmax.f32 %v3118_v54, 0.0 }
 0x7fb   :  { %3970 = vmatmul.mubr.msk.f32.vlgmr.msra.gmra.mrb[16].mxu0 %vm131_vm1, %v3119_v2 }
 0x7fc   :  { %3213 = vmatprep.mubr.f32.mxu0 %v5823_v43 }
 0x7ff   :  { %3971 = vmatmul.mubr.msk.f32.gmra.mrb[18].mxu0 %vm131_vm1, %v3120_v6 }
 0x800   :  { %3430 = vmatprep.mubr.f32.mxu0 %v5823_v43 }
 0x8ce   :  { %v3209_v12 = vpop.f32.mrb[16].mxu0 }
 0x8cf   :  { %v3211_v7 = vpop.f32.mrb[17].mxu0  ;;  %v3220_v42 = vrot.slane %v3209_v12, 7 }
 0x8d0   :  { %v3249_v34 = vrot.slane %v3211_v7, 1  ;;  %v3341_v7 = vld [vmem:[%s5800_s1 + $0xc8] sm:$0xff] }
 0x8d2   :  { %v3215_v45 = vpop.f32.mrb[18].mxu0 }
 0x8d3   :  { %v3221_v21 = vrot.slane %v3215_v45, 7  ;;  %v3217_v11 = vpop.f32.mrb[19].mxu0 }
 0x8d4   :  { %v3250_v52 = vrot.slane %v3217_v11, 1  ;;  %v3342_v11 = vld [vmem:[%s5800_s1 + $0xd0] sm:$0xff] }
 0x8d5   :  { %v3225_v15 = vsel %vm3224_vm4, %v3220_v42, %v3221_v21  ;;  %v3226_v4 = vsel %vm3224_vm4, %v3221_v21, %v3220_v42  ;;  %v3340_v42 = vld [vmem:[%s5800_s1 + $0xc0] sm:$0xff] }
 0x8d6   :  { %v3237_v57 = vmul.f32 %v3230_v47, %v3226_v4  ;;  %v3252_v16 = vsel %vm3251_vm5, %v3249_v34, %v3250_v52  ;;  %v3253_v10 = vsel %vm3251_vm5, %v3250_v52, %v3249_v34  ;;  %v3238_v27 = vmul.f32 %v3235_v55, %v3225_v15  ;;  %v3307_v55 = vld [vmem:[%s5801_s2 + $0x115] sm:$0x1]  ;;  %v3345_v34 = vld [vmem:[%s5800_s1 + $0xe8] sm:$0xff]  ;;  %v3347_v52 = vld [vmem:[%s5800_s1 + $0xf8] sm:$0xff] }
 0x8d7   :  { %v3262_v41 = vmul.f32 %v3256_v59, %v3252_v16  ;;  %v3263_v60 = vmul.f32 %v3260_v53, %v3253_v10  ;;  %v4389_v59 = vpack.c.bf16 %v3342_v11, %v3340_v42  ;;  %v4391_v15 = vpack.c.bf16 %v3347_v52, %v3345_v34  ;;  %v3344_v4 = vld [vmem:[%s5800_s1 + $0xe0] sm:$0xff]  ;;  %v3346_v47 = vld [vmem:[%s5800_s1 + $0xf0] sm:$0xff]  ;;  %v3351_v16 = vld [vmem:[%s5800_s1 + $0x118] sm:$0xff] }
 0x8d8   :  { %3241 = vrot.lane.b32.xlu1 %v3237_v57, %s4523_s5  ;;  %v3349_v57 = vld [vmem:[%s5800_s1 + $0x108] sm:$0xff] }
 0x8d9   :  { %3266 = vrot.lane.b32.xlu0 %v3262_v41, %s4523_s5  ;;  %v4393_v41 = vpack.c.bf16 %v3346_v47, %v3344_v4  ;;  %v4395_v53 = vpack.c.bf16 %v3351_v16, %v3349_v57 }
 0x8dc   :  { %3243 = vrot.lane.b32.xlu1 %v3238_v27, %s4523_s5 }
 0x8e0   :  { %3268 = vrot.lane.b32.xlu1 %v3263_v60, %s4523_s5  ;;  %v3348_v60 = vld [vmem:[%s5800_s1 + $0x100] sm:$0xff] }
 0x94a   :  { %v3242_v0 = vpop.permute.xlu1 %3241 }
 0x94b   :  { %v3247_v1 = vadd.f32 %v3242_v0, %v3209_v12  ;;  %v3267_v40 = vpop.permute.xlu0 %3266  ;;  %v3350_v0 = vld [vmem:[%s5800_s1 + $0x110] sm:$0xff] }
 0x94d   :  { %v5507_v63 = vadd.f32 %v3267_v40, %v3247_v1  ;;  %v3353_v1 = vld [vmem:[%s5800_s1 + $0x128] sm:$0xff]  ;;  %v3355_v40 = vld [vmem:[%s5800_s1 + $0x138] sm:$0xff] }
 0x94e   :  { %v3244_v46 = vpop.permute.xlu1 %3243 }
 0x94f   :  { %v3248_v49 = vadd.f32 %v3244_v46, %v3215_v45  ;;  %v3285_v38 = vmul.f32 %v5507_v63, %v5507_v63  ;;  %v3275_v22 = vsel %vm3274_vm6, %v5507_v63, 0.0  ;;  %v3343_v45 = vld [vmem:[%s5800_s1 + $0xd8] sm:$0xff] }
 0x950   :  { %v4387_v21 = vpack.c.bf16 %v3343_v45, %v3341_v7 }
 0x951   :  { %v3287_v3 = vsel %vm3274_vm6, %v3285_v38, 0.0  ;;  %v3352_v38 = vld [vmem:[%s5800_s1 + $0x120] sm:$0xff] }
 0x952   :  { %v3269_v48 = vpop.permute.xlu1 %3268  ;;  %4388 = vmatprep.subr.bf16.mxu0 %v4387_v21 }
 0x953   :  { %v5511_v33 = vadd.f32 %v3269_v48, %v3248_v49  ;;  %4390 = vmatpush1.bf16.msra.mxu0 %v4389_v59  ;;  %v4397_v49 = vpack.c.bf16 %v3350_v0, %v3348_v60  ;;  %v4399_v48 = vpack.c.bf16 %v3355_v40, %v3353_v1 }
 0x954   :  { %4392 = vmatprep.subr.bf16.mxu0 %v4391_v15 }
 0x955   :  { %v3276_v39 = vsel %vm3274_vm6, %v5511_v33, 0.0  ;;  %v3286_v5 = vmul.f32 %v5511_v33, %v5511_v33 }
 0x956   :  { %v3277_v24 = vadd.f32 %v3276_v39, %v3275_v22  ;;  %v3354_v22 = vld [vmem:[%s5800_s1 + $0x130] sm:$0xff] }
 0x957   :  { %v3288_v8 = vsel %vm3274_vm6, %v3286_v5, 0.0  ;;  %4394 = vmatpush1.bf16.msra.mxu0 %v4393_v41  ;;  %v4401_v39 = vpack.c.bf16 %v3354_v22, %v3352_v38 }
 0x958   :  { %v3278_v58 = vrot.slane %v3277_v24, 4  ;;  %v3289_v37 = vadd.f32 %v3288_v8, %v3287_v3  ;;  %4396 = vmatprep.subr.bf16.mxu0 %v4395_v53 }
 0x95a   :  { %v3279_v17 = vadd.f32 %v3278_v58, %v3277_v24  ;;  %v3290_v30 = vrot.slane %v3289_v37, 4  ;;  %v4529_v24 = vmov 2  }
 0x95b   :  { %4398 = vmatpush1.bf16.msra.mxu0 %v4397_v49  ;;  %4479 = vset.pattern.permute.xlu1 %v4529_v24 }
 0x95c   :  { %v3280_v28 = vrot.slane %v3279_v17, 2  ;;  %v3291_v50 = vadd.f32 %v3290_v30, %v3289_v37  ;;  %4400 = vmatprep.subr.bf16.mxu0 %v4399_v48  ;;  %4480 = vset.pattern.permute.xlu0 %v4529_v24 }
 0x95e   :  { %v3281_v62 = vadd.f32 %v3280_v28, %v3279_v17  ;;  %v3292_v36 = vrot.slane %v3291_v50, 2 }
 0x95f   :  { %4402 = vmatpush1.bf16.msra.mxu0 %v4401_v39 }
 0x960   :  { %v3282_v25 = vrot.slane %v3281_v62, 1  ;;  %v3293_v44 = vadd.f32 %v3292_v36, %v3291_v50  ;;  %v4530_v50 = vmov 3  }
 0x962   :  { %v3283_v23 = vadd.f32 %v3282_v25, %v3281_v62  ;;  %v3294_v9 = vrot.slane %v3293_v44, 1 }
 0x964   :  { %v3284_v35 = vmul.f32 0.0625, %v3283_v23  ;;  %v3295_v56 = vadd.f32 %v3294_v9, %v3293_v44 }
 0x966   :  { %v3296_v14 = vmul.f32 0.0625, %v3295_v56  ;;  %v3298_v26 = vmul.f32 %v3284_v35, %v3284_v35 }
 0x968   :  { %v3299_v51 = vsub.f32 %v3296_v14, %v3298_v26 }
 0x96a   :  { %v3300_v29 = vadd.f32 1e-05, %v3299_v51 }
 0x96c   :  { %4489 = vrsqrt.f32 %v3300_v29 }
 0x976   :  { %v4490_v20 = vpop.eup %4489 }
 0x977   :  { %3303 = vrot.lane.b32.xlu0 %v4490_v20, %s4523_s5 }
 0x9e9   :  { %v3304_v31 = vpop.permute.xlu0 %3303 }
 0x9ea   :  { %v3306_v54 = vmul.f32 %v3304_v31, %v3297_v18 }
 0x9ec   :  { %3309 = vrot.lane.b32.xlu1 %v3306_v54, %s4523_s5  ;;  %v3321_v2 = vrot.slane %v3306_v54, %v4586_v13 }
 0x9f0   :  { %3323 = vrot.lane.b32.xlu1 %v3321_v2, %s4523_s5 }
 0xa5e   :  { %v3310_v6 = vpop.permute.xlu1 %3309 }
 0xa5f   :  { %v3312_v12 = vmul.f32 %v3310_v6, %v3284_v35 }
 0xa61   :  { %3314 = vrot.lane.b32.xlu0 %v3312_v12, %s4523_s5 }
 0xa62   :  { %v3324_v5 = vpop.permute.xlu1 %3323 }
 0xa63   :  { %v3326_v3 = vmul.f32 %v3324_v5, %v5507_v63  ;;  %v3327_v8 = vmul.f32 %v3324_v5, %v5511_v33 }
 0xad3   :  { %v3315_v10 = vpop.permute.xlu0 %3314 }
 0xad4   :  { %v3317_v27 = vsub.f32 %v3307_v55, %v3315_v10 }
 0xad6   :  { %v3331_v46 = vrot.slane %v3317_v27, %v4586_v13 }
 0xad8   :  { %3333 = vrot.lane.b32.xlu0 %v3331_v46, %s4523_s5 }
 0xb4a   :  { %v3334_v58 = vpop.permute.xlu0 %3333 }
 0xb4b   :  { %v3336_v37 = vadd.f32 %v3334_v58, %v3326_v3  ;;  %v3337_v17 = vadd.f32 %v3334_v58, %v3327_v8 }
 0xb4d   :  { %v3338_v30 = vmax.f32 %v3336_v37, 0.0  ;;  %v3339_v28 = vmax.f32 %v3337_v17, 0.0  ;;  %v3515_v37 = vld [vmem:[%s5801_s2 + $0x112] sm:$0x1] }
 0xb4f   :  { %3360 = vrot.lane.b32.xlu0 %v3339_v28, %s4523_s5  ;;  %3358 = vrot.lane.b32.xlu1 %v3338_v30, %s4523_s5 }
 0xb53   :  { %3449 = vperm.xlu1 %4479, %v5479_v61   ;;  %3453 = vperm.xlu0 %4480, %v5474_v19  }
 0xb57   :  { %4481 = vset.pattern.permute.xlu1 %v4530_v50  ;;  %4482 = vset.pattern.permute.xlu0 %v4530_v50 }
 0xb58   :  { %3474 = vperm.xlu1 %4481, %v5479_v61  }
 0xb5c   :  { %3478 = vperm.xlu1 %4481, %v5474_v19  }
 0xbc1   :  { %v3359_v63 = vpop.permute.xlu1 %3358  ;;  %v3361_v33 = vpop.permute.xlu0 %3360 }
 0xbc2   :  { %3972 = vmatmul.mubr.msk.f32.vlgmr.msra.gmra.mrb[20].mxu0 %vm131_vm1, %v3359_v63 }
 0xbc3   :  { %3436 = vmatprep.mubr.f32.mxu0 %v5823_v43 }
 0xbc6   :  { %3973 = vmatmul.mubr.msk.f32.gmra.mrb[22].mxu0 %vm131_vm1, %v3361_v33  ;;  %v3525_v33 = vld [vmem:[%s5801_s2 + $0x116] sm:$0x1] }
 0xbc7   :  { %3648 = vmatprep.mubr.f32.mxu0 %v5823_v43 }
 0xbd2   :  { %v5594_v62 = vpop.permute.xlu1 %3449  ;;  %v5600_v35 = vpop.permute.xlu0 %3453 }
 0xbd7   :  { %v5596_v44 = vpop.permute.xlu1 %3474 }
 0xbdb   :  { %v5612_v54 = vpop.permute.xlu1 %3478 }
 0xc95   :  { %v3432_v36 = vpop.f32.mrb[20].mxu0 }
 0xc96   :  { %v3434_v25 = vpop.f32.mrb[21].mxu0  ;;  %v3443_v19 = vrot.slane %v3432_v36, 6 }
 0xc97   :  { %v3468_v56 = vrot.slane %v3434_v25, 2  ;;  %v3561_v25 = vld [vmem:[%s5800_s1 + $0x158] sm:$0xff] }
 0xc99   :  { %v3438_v23 = vpop.f32.mrb[22].mxu0 }
 0xc9a   :  { %v3444_v61 = vrot.slane %v3438_v23, 6  ;;  %v3440_v9 = vpop.f32.mrb[23].mxu0 }
 0xc9b   :  { %v3469_v14 = vrot.slane %v3440_v9, 2  ;;  %v3563_v9 = vld [vmem:[%s5800_s1 + $0x168] sm:$0xff] }
 0xc9c   :  { %v3447_v26 = vsel %vm3445_vm7, %v3444_v61, %v3443_v19  ;;  %v3446_v51 = vsel %vm3445_vm7, %v3443_v19, %v3444_v61  ;;  %v3560_v61 = vld [vmem:[%s5800_s1 + $0x150] sm:$0xff] }
 0xc9d   :  { %v3456_v29 = vmul.f32 %v5594_v62, %v3447_v26  ;;  %v3471_v20 = vsel %vm3470_vm8, %v3468_v56, %v3469_v14  ;;  %v3457_v18 = vmul.f32 %v5600_v35, %v3446_v51  ;;  %v3472_v31 = vsel %vm3470_vm8, %v3469_v14, %v3468_v56  ;;  %v3565_v56 = vld [vmem:[%s5800_s1 + $0x178] sm:$0xff]  ;;  %v3562_v51 = vld [vmem:[%s5800_s1 + $0x160] sm:$0xff] }
 0xc9e   :  { %v3481_v2 = vmul.f32 %v5596_v44, %v3471_v20  ;;  %v3482_v6 = vmul.f32 %v5612_v54, %v3472_v31  ;;  %v4407_v26 = vpack.c.bf16 %v3565_v56, %v3563_v9  ;;  %v3567_v20 = vld [vmem:[%s5800_s1 + $0x188] sm:$0xff] }
 0xc9f   :  { %3462 = vrot.lane.b32.xlu1 %v3457_v18, %s4523_s5  ;;  %3460 = vrot.lane.b32.xlu0 %v3456_v29, %s4523_s5  ;;  %v3564_v29 = vld [vmem:[%s5800_s1 + $0x170] sm:$0xff]  ;;  %v3569_v18 = vld [vmem:[%s5800_s1 + $0x198] sm:$0xff] }
 0xca3   :  { %3485 = vrot.lane.b32.xlu0 %v3481_v2, %s4523_s5  ;;  %3487 = vrot.lane.b32.xlu1 %v3482_v6, %s4523_s5  ;;  %v4409_v2 = vpack.c.bf16 %v3564_v29, %v3562_v51 }
 0xd11   :  { %v3461_v12 = vpop.permute.xlu0 %3460  ;;  %v3463_v55 = vpop.permute.xlu1 %3462 }
 0xd12   :  { %v3466_v7 = vadd.f32 %v3461_v12, %v3432_v36  ;;  %v3467_v45 = vadd.f32 %v3463_v55, %v3438_v23  ;;  %v3559_v36 = vld [vmem:[%s5800_s1 + $0x148] sm:$0xff]  ;;  %v3558_v23 = vld [vmem:[%s5800_s1 + $0x140] sm:$0xff]  ;;  %v4411_v12 = vpack.c.bf16 %v3569_v18, %v3567_v20 }
 0xd13   :  { %v4403_v19 = vpack.c.bf16 %v3561_v25, %v3559_v36  ;;  %v4405_v14 = vpack.c.bf16 %v3560_v61, %v3558_v23  ;;  %v3566_v55 = vld [vmem:[%s5800_s1 + $0x180] sm:$0xff] }
 0xd15   :  { %v3486_v42 = vpop.permute.xlu0 %3485  ;;  %v3488_v21 = vpop.permute.xlu1 %3487  ;;  %4404 = vmatprep.subr.bf16.mxu0 %v4403_v19 }
 0xd16   :  { %v5620_v11 = vadd.f32 %v3486_v42, %v3466_v7  ;;  %v5622_v34 = vadd.f32 %v3488_v21, %v3467_v45  ;;  %4406 = vmatpush1.bf16.msra.mxu0 %v4405_v14  ;;  %v3568_v7 = vld [vmem:[%s5800_s1 + $0x190] sm:$0xff]  ;;  %v3571_v45 = vld [vmem:[%s5800_s1 + $0x1a8] sm:$0xff]  ;;  %v3573_v42 = vld [vmem:[%s5800_s1 + $0x1b8] sm:$0xff] }
 0xd17   :  { %4408 = vmatprep.subr.bf16.mxu0 %v4407_v26 }
 0xd18   :  { %v3493_v52 = vsel %vm3274_vm6, %v5620_v11, 0.0  ;;  %v3503_v59 = vmul.f32 %v5620_v11, %v5620_v11  ;;  %v3494_v15 = vsel %vm3274_vm6, %v5622_v34, 0.0  ;;  %v3504_v4 = vmul.f32 %v5622_v34, %v5622_v34 }
 0xd19   :  { %v3495_v47 = vadd.f32 %v3494_v15, %v3493_v52  ;;  %v4413_v52 = vpack.c.bf16 %v3568_v7, %v3566_v55  ;;  %v3570_v15 = vld [vmem:[%s5800_s1 + $0x1a0] sm:$0xff] }
 0xd1a   :  { %v3505_v57 = vsel %vm3274_vm6, %v3503_v59, 0.0  ;;  %v3506_v16 = vsel %vm3274_vm6, %v3504_v4, 0.0  ;;  %4410 = vmatpush1.bf16.msra.mxu0 %v4409_v2  ;;  %v4415_v59 = vpack.c.bf16 %v3573_v42, %v3571_v45  ;;  %v3572_v4 = vld [vmem:[%s5800_s1 + $0x1b0] sm:$0xff] }
 0xd1b   :  { %v3496_v10 = vrot.slane %v3495_v47, 4  ;;  %v3507_v41 = vadd.f32 %v3506_v16, %v3505_v57  ;;  %4412 = vmatprep.subr.bf16.mxu0 %v4411_v12 }
 0xd1d   :  { %v3497_v27 = vadd.f32 %v3496_v10, %v3495_v47  ;;  %v3508_v53 = vrot.slane %v3507_v41, 4  ;;  %v4417_v47 = vpack.c.bf16 %v3572_v4, %v3570_v15 }
 0xd1e   :  { %4414 = vmatpush1.bf16.msra.mxu0 %v4413_v52 }
 0xd1f   :  { %v3498_v60 = vrot.slane %v3497_v27, 2  ;;  %v3509_v0 = vadd.f32 %v3508_v53, %v3507_v41  ;;  %4416 = vmatprep.subr.bf16.mxu0 %v4415_v59 }
 0xd21   :  { %v3499_v1 = vadd.f32 %v3498_v60, %v3497_v27  ;;  %v3510_v40 = vrot.slane %v3509_v0, 2 }
 0xd22   :  { %4418 = vmatpush1.bf16.msra.mxu0 %v4417_v47 }
 0xd23   :  { %v3500_v46 = vrot.slane %v3499_v1, 1  ;;  %v3511_v49 = vadd.f32 %v3510_v40, %v3509_v0 }
 0xd25   :  { %v3501_v48 = vadd.f32 %v3500_v46, %v3499_v1  ;;  %v3512_v38 = vrot.slane %v3511_v49, 1 }
 0xd27   :  { %v3502_v22 = vmul.f32 0.0625, %v3501_v48  ;;  %v3513_v39 = vadd.f32 %v3512_v38, %v3511_v49 }
 0xd29   :  { %v3514_v5 = vmul.f32 0.0625, %v3513_v39  ;;  %v3516_v24 = vmul.f32 %v3502_v22, %v3502_v22 }
 0xd2b   :  { %v3517_v3 = vsub.f32 %v3514_v5, %v3516_v24 }
 0xd2d   :  { %v3518_v8 = vadd.f32 1e-05, %v3517_v3 }
 0xd2f   :  { %4491 = vrsqrt.f32 %v3518_v8 }
 0xd39   :  { %v4492_v58 = vpop.eup %4491 }
 0xd3a   :  { %3521 = vrot.lane.b32.xlu0 %v4492_v58, %s4523_s5 }
 0xdac   :  { %v3522_v17 = vpop.permute.xlu0 %3521 }
 0xdad   :  { %v3524_v30 = vmul.f32 %v3522_v17, %v3515_v37 }
 0xdaf   :  { %3527 = vrot.lane.b32.xlu1 %v3524_v30, %s4523_s5  ;;  %v3539_v28 = vrot.slane %v3524_v30, %v4586_v13 }
 0xdb3   :  { %3541 = vrot.lane.b32.xlu1 %v3539_v28, %s4523_s5 }
 0xe21   :  { %v3528_v50 = vpop.permute.xlu1 %3527 }
 0xe22   :  { %v3530_v63 = vmul.f32 %v3528_v50, %v3502_v22 }
 0xe24   :  { %3532 = vrot.lane.b32.xlu0 %v3530_v63, %s4523_s5 }
 0xe25   :  { %v3542_v57 = vpop.permute.xlu1 %3541 }
 0xe26   :  { %v3544_v16 = vmul.f32 %v3542_v57, %v5620_v11  ;;  %v3545_v10 = vmul.f32 %v3542_v57, %v5622_v34 }
 0xe96   :  { %v3533_v31 = vpop.permute.xlu0 %3532 }
 0xe97   :  { %v3535_v6 = vsub.f32 %v3525_v33, %v3533_v31 }
 0xe99   :  { %v3549_v21 = vrot.slane %v3535_v6, %v4586_v13 }
 0xe9b   :  { %3551 = vrot.lane.b32.xlu0 %v3549_v21, %s4523_s5 }
 0xf0d   :  { %v3552_v41 = vpop.permute.xlu0 %3551 }
 0xf0e   :  { %v3554_v27 = vadd.f32 %v3552_v41, %v3544_v16  ;;  %v3555_v53 = vadd.f32 %v3552_v41, %v3545_v10  ;;  %v3715_v10 = vld [vmem:[%s5801_s2 + $0x113] sm:$0x1] }
 0xf10   :  { %v3556_v60 = vmax.f32 %v3554_v27, 0.0  ;;  %v3557_v0 = vmax.f32 %v3555_v53, 0.0 }
 0xf12   :  { %3578 = vrot.lane.b32.xlu0 %v3557_v0, %s4523_s5  ;;  %3576 = vrot.lane.b32.xlu1 %v3556_v60, %s4523_s5 }
 0xf84   :  { %v3577_v1 = vpop.permute.xlu1 %3576  ;;  %v3579_v40 = vpop.permute.xlu0 %3578 }
 0xf85   :  { %3974 = vmatmul.mubr.msk.f32.vlgmr.msra.gmra.mrb[24].mxu0 %vm131_vm1, %v3577_v1  ;;  %v3758_v1 = vld [vmem:[%s5801_s2 + $0xc0] sm:$0xff] }
 0xf86   :  { %3654 = vmatprep.mubr.f32.mxu0 %v5823_v43 }
 0xf89   :  { %3975 = vmatmul.mubr.msk.f32.gmra.mrb[26].mxu0 %vm131_vm1, %v3579_v40  ;;  %v3759_v40 = vld [vmem:[%s5801_s2 + $0xc8] sm:$0xff] }
0x1058   :  { %v3650_v11 = vpop.f32.mrb[24].mxu0 }
0x1059   :  { %v3652_v46 = vpop.f32.mrb[25].mxu0  ;;  %v3661_v49 = vrot.slane %v3650_v11, 6 }
0x105a   :  { %v3677_v22 = vrot.slane %v3652_v46, 2  ;;  %v4419_v46 = vpack.c.bf16 %v3759_v40, %v3758_v1 }
0x105c   :  { %v3656_v34 = vpop.f32.mrb[26].mxu0  ;;  %4420 = vmatprep.subr.bf16.mxu1 %v4419_v46 }
0x105d   :  { %v3662_v48 = vrot.slane %v3656_v34, 6  ;;  %v3658_v38 = vpop.f32.mrb[27].mxu0  ;;  %4422 = vmatpush3.bf16.msra.mxu1 %v4419_v46 }
0x105e   :  { %v3678_v39 = vrot.slane %v3658_v38, 2  ;;  %v3762_v38 = vld [vmem:[%s5801_s2 + $0xe0] sm:$0xff] }
0x105f   :  { %v3663_v5 = vsel %vm3445_vm7, %v3661_v49, %v3662_v48  ;;  %v3664_v24 = vsel %vm3445_vm7, %v3662_v48, %v3661_v49  ;;  %v3725_v49 = vld [vmem:[%s5801_s2 + $0x117] sm:$0x1] }
0x1060   :  { %v3665_v3 = vmul.f32 %v3664_v24, %v5594_v62  ;;  %v3666_v43 = vmul.f32 %v3663_v5, %v5600_v35  ;;  %v3679_v8 = vsel %vm3470_vm8, %v3677_v22, %v3678_v39  ;;  %v3680_v58 = vsel %vm3470_vm8, %v3678_v39, %v3677_v22  ;;  %v3763_v22 = vld [vmem:[%s5801_s2 + $0xe8] sm:$0xff] }
0x1061   :  { %v3681_v37 = vmul.f32 %v3679_v8, %v5596_v44  ;;  %v3682_v17 = vmul.f32 %v3680_v58, %v5612_v54  ;;  %v4427_v24 = vpack.c.bf16 %v3763_v22, %v3762_v38 }
0x1062   :  { %3669 = vrot.lane.b32.xlu1 %v3665_v3, %s4523_s5  ;;  %3671 = vrot.lane.b32.xlu0 %v3666_v43, %s4523_s5  ;;  %v3764_v3 = vld [vmem:[%s5801_s2 + $0xf0] sm:$0xff]  ;;  %v3765_v43 = vld [vmem:[%s5801_s2 + $0xf8] sm:$0xff] }
0x1063   :  { %v4431_v58 = vpack.c.bf16 %v3765_v43, %v3764_v3 }
0x1066   :  { %3687 = vrot.lane.b32.xlu0 %v3682_v17, %s4523_s5  ;;  %3685 = vrot.lane.b32.xlu1 %v3681_v37, %s4523_s5 }
0x10d4   :  { %v3670_v30 = vpop.permute.xlu1 %3669  ;;  %v3672_v28 = vpop.permute.xlu0 %3671 }
0x10d5   :  { %v3675_v50 = vadd.f32 %v3670_v30, %v3650_v11  ;;  %v3676_v63 = vadd.f32 %v3672_v28, %v3656_v34  ;;  %v3760_v11 = vld [vmem:[%s5801_s2 + $0xd0] sm:$0xff]  ;;  %v3761_v34 = vld [vmem:[%s5801_s2 + $0xd8] sm:$0xff]  ;;  %s4531_s2 = smov 108  }
0x10d6   :  { %v4423_v48 = vpack.c.bf16 %v3761_v34, %v3760_v11 }
0x10d8   :  { %v3688_v33 = vpop.permute.xlu0 %3687  ;;  %v3686_v36 = vpop.permute.xlu1 %3685  ;;  %4424 = vmatprep.subr.bf16.mxu1 %v4423_v48 }
0x10d9   :  { %v5718_v25 = vadd.f32 %v3688_v33, %v3676_v63  ;;  %v5720_v23 = vadd.f32 %v3686_v36, %v3675_v50  ;;  %4426 = vmatpush3.bf16.msra.mxu1 %v4423_v48 }
0x10da   :  { %4428 = vmatprep.subr.bf16.mxu1 %v4427_v24 }
0x10db   :  { %v3694_v19 = vsel %vm3274_vm6, %v5718_v25, 0.0  ;;  %v3704_v61 = vmul.f32 %v5718_v25, %v5718_v25  ;;  %v3693_v9 = vsel %vm3274_vm6, %v5720_v23, 0.0  ;;  %v3703_v56 = vmul.f32 %v5720_v23, %v5720_v23 }
0x10dc   :  { %v3695_v14 = vadd.f32 %v3694_v19, %v3693_v9 }
0x10dd   :  { %v3706_v26 = vsel %vm3274_vm6, %v3704_v61, 0.0  ;;  %v3705_v51 = vsel %vm3274_vm6, %v3703_v56, 0.0  ;;  %4430 = vmatpush3.bf16.msra.mxu1 %v4427_v24 }
0x10de   :  { %v3696_v29 = vrot.slane %v3695_v14, 4  ;;  %v3707_v20 = vadd.f32 %v3706_v26, %v3705_v51  ;;  %4432 = vmatprep.subr.bf16.mxu1 %v4431_v58 }
0x10e0   :  { %v3697_v18 = vadd.f32 %v3696_v29, %v3695_v14  ;;  %v3708_v31 = vrot.slane %v3707_v20, 4 }
0x10e1   :  { %4434 = vmatpush3.bf16.msra.mxu1 %v4431_v58 }
0x10e2   :  { %v3698_v2 = vrot.slane %v3697_v18, 2  ;;  %v3709_v6 = vadd.f32 %v3708_v31, %v3707_v20 }
0x10e4   :  { %v3699_v12 = vadd.f32 %v3698_v2, %v3697_v18  ;;  %v3710_v55 = vrot.slane %v3709_v6, 2 }
0x10e6   :  { %v3700_v7 = vrot.slane %v3699_v12, 1  ;;  %v3711_v45 = vadd.f32 %v3710_v55, %v3709_v6 }
0x10e8   :  { %v3701_v42 = vadd.f32 %v3700_v7, %v3699_v12  ;;  %v3712_v21 = vrot.slane %v3711_v45, 1 }
0x10ea   :  { %v3702_v52 = vmul.f32 0.0625, %v3701_v42  ;;  %v3713_v59 = vadd.f32 %v3712_v21, %v3711_v45 }
0x10ec   :  { %v3714_v15 = vmul.f32 0.0625, %v3713_v59  ;;  %v3716_v4 = vmul.f32 %v3702_v52, %v3702_v52 }
0x10ee   :  { %v3717_v47 = vsub.f32 %v3714_v15, %v3716_v4 }
0x10f0   :  { %v3718_v57 = vadd.f32 1e-05, %v3717_v47 }
0x10f2   :  { %4493 = vrsqrt.f32 %v3718_v57 }
0x10fc   :  { %v4494_v16 = vpop.eup %4493 }
0x10fd   :  { %3721 = vrot.lane.b32.xlu1 %v4494_v16, %s4523_s5 }
0x116f   :  { %v3722_v41 = vpop.permute.xlu1 %3721 }
0x1170   :  { %v3724_v27 = vmul.f32 %v3722_v41, %v3715_v10 }
0x1172   :  { %3727 = vrot.lane.b32.xlu0 %v3724_v27, %s4523_s5  ;;  %v3739_v53 = vrot.slane %v3724_v27, %v4586_v13 }
0x1176   :  { %3741 = vrot.lane.b32.xlu0 %v3739_v53, %s4523_s5 }
0x11e4   :  { %v3728_v60 = vpop.permute.xlu0 %3727 }
0x11e5   :  { %v3730_v0 = vmul.f32 %v3728_v60, %v3702_v52 }
0x11e7   :  { %3732 = vrot.lane.b32.xlu1 %v3730_v0, %s4523_s5 }
0x11e8   :  { %v3742_v37 = vpop.permute.xlu0 %3741 }
0x11e9   :  { %v3744_v17 = vmul.f32 %v3742_v37, %v5720_v23  ;;  %v3745_v30 = vmul.f32 %v3742_v37, %v5718_v25 }
0x1259   :  { %v3733_v39 = vpop.permute.xlu1 %3732 }
0x125a   :  { %v3735_v5 = vsub.f32 %v3725_v49, %v3733_v39 }
0x125c   :  { %v3749_v8 = vrot.slane %v3735_v5, %v4586_v13 }
0x125e   :  { %3751 = vrot.lane.b32.xlu1 %v3749_v8, %s4523_s5 }
0x12d0   :  { %v3752_v28 = vpop.permute.xlu1 %3751 }
0x12d1   :  { %v3754_v50 = vadd.f32 %v3752_v28, %v3744_v17  ;;  %v3755_v63 = vadd.f32 %v3752_v28, %v3745_v30 }
0x12d3   :  { %v3756_v33 = vmax.f32 %v3754_v50, 0.0  ;;  %v3757_v36 = vmax.f32 %v3755_v63, 0.0 }
0x12d5   :  { %3770 = vrot.lane.b32.xlu1 %v3757_v36, %s4523_s5  ;;  %3768 = vrot.lane.b32.xlu0 %v3756_v33, %s4523_s5  ;;  %s4532_s5 = smov 10  }
0x1347   :  { %v3771_v13 = vpop.permute.xlu1 %3770  ;;  %v3769_v19 = vpop.permute.xlu0 %3768 }
0x1348   :  { %4268 = vmatprep.mubr.msk.f32.mxu1 %vm131_vm1, %v3769_v19 }
0x1349   :  { %4269 = vmatmul.mubr.msk.f32.vlgmr.msra.gmra.mrb[14].mxu1 %vm131_vm1, %v3771_v13 }
0x141c   :  { %v4270_v61 = vpop.f32.mrb[14].mxu1 }
0x141d   :  { %v3852_v9 = vrot.slane %v4270_v61, 6  ;;  %3871 = vrot.lane.b32.xlu1 %v4270_v61, %s4531_s2  ;;  %v3842_v25 = vpop.f32.mrb[15].mxu1 }
0x141e   :  { %v3851_v23 = vrot.slane %v3842_v25, 6  ;;  %3869 = vrot.lane.b32.xlu0 %v3842_v25, %s4531_s2 }
0x1420   :  { %v3853_v56 = vsel %vm3445_vm7, %v3851_v23, %v3852_v9  ;;  %v3854_v14 = vsel %vm3445_vm7, %v3852_v9, %v3851_v23 }
0x1421   :  { %v3855_v26 = vmul.f32 %v3854_v14, %v5594_v62  ;;  %v3856_v51 = vmul.f32 %v3853_v56, %v5600_v35 }
0x1423   :  { %3859 = vrot.lane.b32.xlu0 %v3855_v26, %s4532_s5  ;;  %3861 = vrot.lane.b32.xlu1 %v3856_v51, %s4532_s5 }
0x148f   :  { %v3872_v29 = vpop.permute.xlu1 %3871 }
0x1490   :  { %v3876_v20 = vrot.slane %v3872_v29, 2  ;;  %v3870_v18 = vpop.permute.xlu0 %3869 }
0x1491   :  { %v3875_v31 = vrot.slane %v3870_v18, 2 }
0x1493   :  { %v3877_v2 = vsel %vm3470_vm8, %v3875_v31, %v3876_v20  ;;  %v3878_v6 = vsel %vm3470_vm8, %v3876_v20, %v3875_v31 }
0x1494   :  { %v3879_v12 = vmul.f32 %v3877_v2, %v5596_v44  ;;  %v3880_v55 = vmul.f32 %v3878_v6, %v5612_v54 }
0x1495   :  { %v3860_v62 = vpop.permute.xlu0 %3859  ;;  %v3862_v35 = vpop.permute.xlu1 %3861 }
0x1496   :  { %3883 = vrot.lane.b32.xlu0 %v3879_v12, %s4532_s5  ;;  %3885 = vrot.lane.b32.xlu1 %v3880_v55, %s4532_s5  ;;  %v3865_v7 = vadd.f32 %v3860_v62, %v3842_v25  ;;  %v3866_v45 = vadd.f32 %v4270_v61, %v3862_v35 }
0x1508   :  { %v3884_v42 = vpop.permute.xlu0 %3883  ;;  %v3886_v21 = vpop.permute.xlu1 %3885 }
0x1509   :  { %v3889_v52 = vadd.f32 %v3884_v42, %v3865_v7  ;;  %v3890_v59 = vadd.f32 %v3886_v21, %v3866_v45 }
0x150b   :  { %3893 = vrot.lane.b32.xlu0 %v3889_v52, %s4533_s13  ;;  %3895 = vrot.lane.b32.xlu1 %v3890_v59, %s4533_s13 }
0x157d   :  { %v3894_v32 = vpop.permute.xlu0 %3893  ;;  %v3896_v44 = vpop.permute.xlu1 %3895 }
0x157e   :  { %3900 = vst.msk [vmem:[#allocation2] sm:$0xff] %vm3899_vm9, %v3894_v32  ;;  %3901 = vst.msk [vmem:[#allocation2 + $0x8] sm:$0xff] %vm3899_vm9, %v3896_v44 }
0x157f   :  { %4506 = shalt.err (!%p4503_p4)
}
0x1580   :  { %s4507_s19 = scalar_lea.hbm %s5802_s3, 256 }
0x1581   :  { %p4508_p5 = scmp.ne.s32.totalorder %s5802_s3, %s4507_s19  ;;  %p4511_p6 = scmp.lt.u32.totalorder %s4507_s19, %s5802_s3 }
0x1583   :  { %p4513_p7 = pnand %p4511_p6, %p4508_p5 }
0x1585   :  { %4516 = shalt.err (!%p4513_p7)
}
0x1586   :  { %s4535_s23 = smov 128   ;;  %s4536_s24 = smov 8  }
0x1587   :  { %3913 = dma.vmem_to_hbm [thread:$0]  %s3908_s15, 256, %s5802_s3, [#allocation3], %s4535_s23, %s4535_s23, %s4536_s24  }
0x1588   :  { %4517 = dma.done.wait [#allocation3], 256  }
0x1589   :  { %4518 = vsyncadd [#allocation3], 4294967040 }
0x158a   :  { %3917 = vsyncpa [#allocation3], 1 }

</bundles_post_ra>
